<compile_context>
chip_gen: v7x
topology: tpu7x:2x2x1
jax: 0.10.0
libtpu: 0.0.40
codegen_flags: <defaults>
</compile_context>

<pallas_src>
import numpy as np
import jax
import jax.numpy as jnp
from jax.experimental import pallas as pl
from jax.experimental.pallas import tpu as pltpu

KSIZE = 4
PAD = 1
NTAPS = KSIZE * KSIZE
NEG_SLOPE = 0.2
IN_EPS = 1e-5


# ---------------------------------------------------------------------------
# In-kernel helpers (all ops are 2-D dots / elementwise / axis reductions).
# ---------------------------------------------------------------------------
def _leaky_relu(y):
    return jnp.where(y > 0, y, NEG_SLOPE * y)


def _instance_norm(y):
    # Per-channel mean/var over the spatial (sublane) axis, biased variance,
    # eps inside rsqrt, affine=False -- matches nn.InstanceNorm2d defaults.
    mean = jnp.mean(y, axis=0, keepdims=True)
    var = jnp.mean((y - mean) * (y - mean), axis=0, keepdims=True)
    return (y - mean) * jax.lax.rsqrt(var + IN_EPS)


def _per_tap_matmuls(t_stacked, w_ref, m_out, cin):
    """Y = sum_t T[t*m_out:(t+1)*m_out] @ W_flat[t*cin:(t+1)*cin].

    t_stacked : (16*m_out, cin) f32  -- stacked gather of the previous layer
    w_ref     : (16*cin, cout) bf16 ref (flat per-tap weights)
    returns   : (m_out, cout) f32
    """
    acc = None
    for tap in range(NTAPS):
        lhs = t_stacked[tap * m_out:(tap + 1) * m_out, :].astype(jnp.bfloat16)
        rhs = w_ref[tap * cin:(tap + 1) * cin, :]
        part = jnp.dot(lhs, rhs, preferred_element_type=jnp.float32)
        acc = part if acc is None else acc + part
    return acc


# ---------------------------------------------------------------------------
# Host-side (trace-time) helpers.
# ---------------------------------------------------------------------------
def _out_size(size, stride):
    return (size + 2 * PAD - KSIZE) // stride + 1


def _im2col_first_layer(x_nhwc, stride):
    """(N,H,W,C) -> (N, OH*OW, 16*C), columns ordered (ki, kj, cin)."""
    n, h, w, c = x_nhwc.shape
    oh, ow = _out_size(h, stride), _out_size(w, stride)
    xp = jnp.pad(x_nhwc, ((0, 0), (PAD, PAD), (PAD, PAD), (0, 0)))
    cols = []
    for ki in range(KSIZE):
        for kj in range(KSIZE):
            cols.append(xp[:, ki:ki + stride * (oh - 1) + 1:stride,
                              kj:kj + stride * (ow - 1) + 1:stride, :])
    patches = jnp.concatenate(cols, axis=-1)             # (N, OH, OW, 16*C)
    return patches.reshape(n, oh * ow, NTAPS * c)


def _tap_sources(hin, win, stride):
    """Source map for tap-expansion: row t*M_out+m reads input r*win+c.

    Returns (src, valid): src int32 (16*M_out,) clipped to 0 for padding
    taps, valid float32 (16*M_out,) is 1 for in-bounds taps else 0.
    """
    oh, ow = _out_size(hin, stride), _out_size(win, stride)
    src = np.zeros((NTAPS * oh * ow,), np.int32)
    valid = np.zeros((NTAPS * oh * ow,), np.float32)
    for ki in range(KSIZE):
        for kj in range(KSIZE):
            t = ki * KSIZE + kj
            for orow in range(oh):
                r = stride * orow + ki - PAD
                for ocol in range(ow):
                    c = stride * ocol + kj - PAD
                    idx = t * oh * ow + orow * ow + ocol
                    if 0 <= r < hin and 0 <= c < win:
                        src[idx] = r * win + c
                        valid[idx] = 1.0
    return src, valid


def _stacked_gather(hin, win, stride):
    """Stacked 0/1 gather matrix (16*M_out, M_in); rows ordered (tap, m)."""
    oh, ow = _out_size(hin, stride), _out_size(win, stride)
    m_out, m_in = oh * ow, hin * win
    g = np.zeros((NTAPS * m_out, m_in), np.float32)
    for ki in range(KSIZE):
        for kj in range(KSIZE):
            t = ki * KSIZE + kj
            for orow in range(oh):
                r = stride * orow + ki - PAD
                if r < 0 or r >= hin:
                    continue
                for ocol in range(ow):
                    c = stride * ocol + kj - PAD
                    if 0 <= c < win:
                        g[t * m_out + orow * ow + ocol, r * win + c] = 1.0
    return g


def _flat_weights(w_oihw):
    """(Cout,Cin,KH,KW) -> (KH*KW*Cin, Cout), row index = tap*Cin + cin."""
    cout, cin, kh, kw = w_oihw.shape
    return jnp.transpose(w_oihw, (2, 3, 1, 0)).reshape(kh * kw * cin, cout)


def cyclegan_discriminator(x_nchw, params):
    """Forward pass. Input / output in NCHW (PyTorch convention)."""
    n, _, h, w = x_nchw.shape
    x = jnp.transpose(x_nchw, (0, 2, 3, 1))               # NCHW -> NHWC
    bf16 = jnp.bfloat16

    # Static spatial chain (32 -> 16 -> 8 -> 4 -> 3 -> 2 for 32x32 input).
    strides = (2, 2, 2, 1, 1)
    sizes = [(h, w)]
    for s in strides:
        sizes.append((_out_size(sizes[-1][0], s), _out_size(sizes[-1][1], s)))
    (_, _), (h1, w1), (h2, w2), (h3, w3), (h4, w4), (h5, w5) = sizes
    m2, m3, m4, m5 = h2 * w2, h3 * w3, h4 * w4, h5 * w5

    c0 = x.shape[-1]
    c1 = params["w1"].shape[0]
    c2 = params["w2"].shape[0]
    c3 = params["w3"].shape[0]
    c4 = params["w4"].shape[0]

    # Layers 1+2 fused on the host side: im2col of the raw image, then
    # tap-expand the rows so one in-kernel matmul yields the stacked layer-1
    # activations ordered (layer-2 tap, layer-2 position).
    patches1 = _im2col_first_layer(x, strides[0])          # (N, h1*w1, 16*c0)
    src2, valid2 = _tap_sources(h1, w1, strides[1])        # (16*m2,)
    p12 = (patches1[:, src2, :] *
           jnp.asarray(valid2)[None, :, None]).astype(bf16)  # (N, 16*m2, k1)
    k1 = p12.shape[-1]

    # Flat 2-D weights (no 3-D tile-padded slabs) and stacked gathers.
    w1m = _flat_weights(params["w1"]).astype(bf16)         # (16*c0, c1)
    w2m = _flat_weights(params["w2"]).astype(bf16)         # (16*c1, c2)
    w3m = _flat_weights(params["w3"]).astype(bf16)         # (16*c2, c3)
    w4m = _flat_weights(params["w4"]).astype(bf16)         # (16*c3, c4)
    # Head weights as per-tap rows (16, c4): used via VPU mul + lane reduce.
    w5t = jnp.transpose(params["w5"], (2, 3, 0, 1)).reshape(NTAPS, c4)
    w5t = w5t.astype(jnp.float32)
    b5m = params["b5"].reshape(1, 1).astype(jnp.float32)   # SMEM scalar

    g3 = jnp.asarray(_stacked_gather(h2, w2, strides[2]), bf16)  # (16*m3, m2)
    g4 = jnp.asarray(_stacked_gather(h3, w3, strides[3]), bf16)  # (16*m4, m3)
    g5 = jnp.asarray(_stacked_gather(h4, w4, strides[4]), bf16)  # (16*m5, m4)

    def kernel(p12_ref, w1_ref, w2_ref, g3_ref, w3_ref, g4_ref, w4_ref,
               g5_ref, w5_ref, b5_ref, out_ref):
        f32 = jnp.float32

        # Layers 1+2: ONE matmul over tap-expanded patches, then 16 per-tap
        # weight matmuls.  Layer 1 has no InstanceNorm, so the per-position
        # LeakyReLU commutes with the host-side tap expansion.
        t2 = _leaky_relu(jnp.dot(p12_ref[...], w1_ref[...],
                                 preferred_element_type=f32))   # (16*m2, c1)
        a2 = _leaky_relu(_instance_norm(
            _per_tap_matmuls(t2, w2_ref, m2, c1)))              # (m2, c2) f32

        # Layer 3: stacked gather matmul + per-tap weight matmuls + IN + act.
        t3 = jnp.dot(g3_ref[...], a2.astype(jnp.bfloat16),
                     preferred_element_type=f32)                # (16*m3, c2)
        a3 = _leaky_relu(_instance_norm(
            _per_tap_matmuls(t3, w3_ref, m3, c2)))              # (m3, c3)

        # Layer 4 (stride 1).
        t4 = jnp.dot(g4_ref[...], a3.astype(jnp.bfloat16),
                     preferred_element_type=f32)                # (16*m4, c3)
        a4 = _leaky_relu(_instance_norm(
            _per_tap_matmuls(t4, w4_ref, m4, c3)))              # (m4, c4)

        # Layer 5 (head, Cout=1): gather matmul, then VPU broadcast-multiply
        # + XLU lane reduction instead of a lane-starved N=1 MXU matmul.
        t5 = jnp.dot(g5_ref[...], a4.astype(jnp.bfloat16),
                     preferred_element_type=f32)                # (16*m5, c4)
        w5v = w5_ref[...]                                       # (16, c4) f32
        acc = None
        for tap in range(NTAPS):
            prod = t5[tap * m5:(tap + 1) * m5, :] * w5v[tap:tap + 1, :]
            acc = prod if acc is None else acc + prod
        y5 = jnp.sum(acc, axis=-1, keepdims=True) + b5_ref[0, 0]  # (m5, 1)
        out_ref[...] = y5.astype(out_ref.dtype)

    def const(arr):
        return pl.BlockSpec(arr.shape, lambda b: (0,) * arr.ndim)

    out = pl.pallas_call(
        kernel,
        out_shape=jax.ShapeDtypeStruct((n, m5, 1), jnp.float32),
        grid=(n,),
        in_specs=[
            pl.BlockSpec((pl.Squeezed(), NTAPS * m2, k1), lambda b: (b, 0, 0)),
            const(w1m), const(w2m),
            const(g3), const(w3m),
            const(g4), const(w4m),
            const(g5), const(w5t),
            pl.BlockSpec(memory_space=pltpu.MemorySpace.SMEM),   # head bias
        ],
        out_specs=pl.BlockSpec((pl.Squeezed(), m5, 1), lambda b: (b, 0, 0)),
        compiler_params=pltpu.CompilerParams(
            dimension_semantics=("parallel",)),
    )(p12, w1m, w2m, g3, w3m, g4, w4m, g5, w5t, b5m)

    # (N, OH*OW, 1) -> (N, 1, OH, OW)  (PatchGAN map, NCHW).
    return out[:, :, 0].reshape(n, 1, h5, w5)


def init_params(key, filt=8):
    """Deterministic synthetic weights (normal * 0.02, CycleGAN-style)."""
    chans = [(3, filt), (filt, 2 * filt), (2 * filt, 4 * filt),
             (4 * filt, 8 * filt), (8 * filt, 1)]
    keys = jax.random.split(key, len(chans) + 1)
    params = {}
    for i, (ci, co) in enumerate(chans):
        params[f"w{i + 1}"] = (
            jax.random.normal(keys[i], (co, ci, KSIZE, KSIZE), jnp.float32) * 0.02)
    # Downsample convs are bias=False; only the head conv has a bias.
    params["b5"] = jax.random.normal(keys[-1], (1,), jnp.float32) * 0.02
    return params


def reference_discriminator(x_nchw, params):
    """Pure-JAX/XLA f32 reference used to validate the fused kernel."""
    def conv(x, w_oihw, stride, bias=None):
        w = jnp.transpose(w_oihw, (2, 3, 1, 0))           # OIHW -> HWIO
        y = jax.lax.conv_general_dilated(
            x, w, window_strides=(stride, stride),
            padding=((PAD, PAD), (PAD, PAD)),
            dimension_numbers=("NHWC", "HWIO", "NHWC"))
        return y if bias is None else y + bias

    def inorm(y):
        m = jnp.mean(y, axis=(1, 2), keepdims=True)
        v = jnp.mean((y - m) ** 2, axis=(1, 2), keepdims=True)
        return (y - m) * jax.lax.rsqrt(v + IN_EPS)

    def lrelu(y):
        return jnp.where(y > 0, y, NEG_SLOPE * y)

    x = jnp.transpose(x_nchw, (0, 2, 3, 1)).astype(jnp.float32)
    y = lrelu(conv(x, params["w1"], 2))
    y = lrelu(inorm(conv(y, params["w2"], 2)))
    y = lrelu(inorm(conv(y, params["w3"], 2)))
    y = lrelu(inorm(conv(y, params["w4"], 1)))
    y = conv(y, params["w5"], 1, bias=params["b5"])
    return jnp.transpose(y, (0, 3, 1, 2))


if __name__ == "__main__":
    key = jax.random.PRNGKey(0)
    k_x, k_p = jax.random.split(key)

    # Small synthetic input: batch=2, 3 channels (module hardcodes 3), 32x32.
    x = jax.random.normal(k_x, (2, 3, 32, 32), jnp.float32)
    params = init_params(k_p, filt=8)

    fwd = jax.jit(cyclegan_discriminator)
    out = jax.block_until_ready(fwd(x, params))

    # 32 -> 16 -> 8 -> 4 -> 3 -> 2 spatial; 1 output channel (PatchGAN map).
    assert out.shape == (2, 1, 2, 2), out.shape
    assert bool(jnp.all(jnp.isfinite(out)))

    # Validate against the XLA f32 reference (kernel matmuls run in bf16 with
    # f32 accumulation and f32 InstanceNorm, so this tolerance is generous).
    ref = jax.block_until_ready(reference_discriminator(x, params))
    max_err = float(jnp.max(jnp.abs(out - ref)))
    assert max_err < 0.1, f"max |kernel - reference| = {max_err}"

    print("KERNEL_OK")
</pallas_src>

<mosaic_0001>
module attributes {stable_mosaic.version = 11 : i64} {
  func.func @kernel(%arg0: i32, %arg1: memref<1x1024x48xbf16, #tpu.memory_space<vmem>>, %arg2: memref<48x8xbf16, #tpu.memory_space<vmem>>, %arg3: memref<128x16xbf16, #tpu.memory_space<vmem>>, %arg4: memref<256x64xbf16, #tpu.memory_space<vmem>>, %arg5: memref<256x32xbf16, #tpu.memory_space<vmem>>, %arg6: memref<144x16xbf16, #tpu.memory_space<vmem>>, %arg7: memref<512x64xbf16, #tpu.memory_space<vmem>>, %arg8: memref<64x9xbf16, #tpu.memory_space<vmem>>, %arg9: memref<16x64xf32, #tpu.memory_space<vmem>>, %arg10: memref<1x1xf32, #tpu.memory_space<smem>>, %arg11: memref<1x4x1xf32, #tpu.memory_space<vmem>>) attributes {dimension_semantics = [#tpu.dimension_semantics<parallel>], iteration_bounds = array<i64: 2>, scalar_prefetch = 0 : i64, scratch_operands = 0 : i64, tpu.core_type = #tpu.core_type<tc>, window_params = [{transform_indices = @transform_0, window_bounds = array<i64: 1, 1024, 48>}, {pipeline_mode = #tpu.pipeline_mode<synchronous>, transform_indices = @transform_1, window_bounds = array<i64: 48, 8>}, {pipeline_mode = #tpu.pipeline_mode<synchronous>, transform_indices = @transform_2, window_bounds = array<i64: 128, 16>}, {pipeline_mode = #tpu.pipeline_mode<synchronous>, transform_indices = @transform_3, window_bounds = array<i64: 256, 64>}, {pipeline_mode = #tpu.pipeline_mode<synchronous>, transform_indices = @transform_4, window_bounds = array<i64: 256, 32>}, {pipeline_mode = #tpu.pipeline_mode<synchronous>, transform_indices = @transform_5, window_bounds = array<i64: 144, 16>}, {pipeline_mode = #tpu.pipeline_mode<synchronous>, transform_indices = @transform_6, window_bounds = array<i64: 512, 64>}, {pipeline_mode = #tpu.pipeline_mode<synchronous>, transform_indices = @transform_7, window_bounds = array<i64: 64, 9>}, {pipeline_mode = #tpu.pipeline_mode<synchronous>, transform_indices = @transform_8, window_bounds = array<i64: 16, 64>}, {transform_indices = @transform_9, window_bounds = array<i64: 1, 1>}, {transform_indices = @transform_10, window_bounds = array<i64: 1, 4, 1>}]} {
    %c0 = arith.constant 0 : index
    %c0_0 = arith.constant 0 : index
    %c0_1 = arith.constant 0 : index
    %0 = vector.load %arg1[%c0, %c0_0, %c0_1] : memref<1x1024x48xbf16, #tpu.memory_space<vmem>>, vector<1x1024x48xbf16>
    %1 = vector.shape_cast %0 : vector<1x1024x48xbf16> to vector<1024x48xbf16>
    %c0_2 = arith.constant 0 : index
    %c0_3 = arith.constant 0 : index
    %2 = vector.load %arg2[%c0_2, %c0_3] : memref<48x8xbf16, #tpu.memory_space<vmem>>, vector<48x8xbf16>
    %cst = arith.constant dense<0.000000e+00> : vector<1024x8xf32>
    %3 = tpu.matmul %1, %2, %cst {dimension_numbers = #tpu.dot_dimension_numbers<[1], [0], [0], [1], [0, 0, 1, 1], [], []>} : vector<1024x48xbf16>, vector<48x8xbf16>, vector<1024x8xf32> -> vector<1024x8xf32>
    %cst_4 = arith.constant 0.000000e+00 : f32
    %4 = vector.broadcast %cst_4 : f32 to vector<1024x8xf32>
    %5 = arith.cmpf ogt, %3, %4 : vector<1024x8xf32>
    %cst_5 = arith.constant 2.000000e-01 : f32
    %6 = vector.broadcast %cst_5 : f32 to vector<1024x8xf32>
    %7 = arith.mulf %6, %3 : vector<1024x8xf32>
    %8 = arith.select %5, %3, %7 : vector<1024x8xi1>, vector<1024x8xf32>
    %9 = vector.extract_strided_slice %8 {offsets = [0, 0], sizes = [64, 8], strides = [1, 1]} : vector<1024x8xf32> to vector<64x8xf32>
    %10 = arith.truncf %9 : vector<64x8xf32> to vector<64x8xbf16>
    %c0_6 = arith.constant 0 : index
    %c0_7 = arith.constant 0 : index
    %11 = vector.load %arg3[%c0_6, %c0_7] : memref<128x16xbf16, #tpu.memory_space<vmem>>, vector<8x16xbf16>
    %cst_8 = arith.constant dense<0.000000e+00> : vector<64x16xf32>
    %12 = tpu.matmul %10, %11, %cst_8 {dimension_numbers = #tpu.dot_dimension_numbers<[1], [0], [0], [1], [0, 0, 1, 1], [], []>} : vector<64x8xbf16>, vector<8x16xbf16>, vector<64x16xf32> -> vector<64x16xf32>
    %13 = vector.extract_strided_slice %8 {offsets = [64, 0], sizes = [64, 8], strides = [1, 1]} : vector<1024x8xf32> to vector<64x8xf32>
    %14 = arith.truncf %13 : vector<64x8xf32> to vector<64x8xbf16>
    %c8 = arith.constant 8 : index
    %c0_9 = arith.constant 0 : index
    %15 = vector.load %arg3[%c8, %c0_9] : memref<128x16xbf16, #tpu.memory_space<vmem>>, vector<8x16xbf16>
    %cst_10 = arith.constant dense<0.000000e+00> : vector<64x16xf32>
    %16 = tpu.matmul %14, %15, %cst_10 {dimension_numbers = #tpu.dot_dimension_numbers<[1], [0], [0], [1], [0, 0, 1, 1], [], []>} : vector<64x8xbf16>, vector<8x16xbf16>, vector<64x16xf32> -> vector<64x16xf32>
    %17 = arith.addf %12, %16 : vector<64x16xf32>
    %18 = vector.extract_strided_slice %8 {offsets = [128, 0], sizes = [64, 8], strides = [1, 1]} : vector<1024x8xf32> to vector<64x8xf32>
    %19 = arith.truncf %18 : vector<64x8xf32> to vector<64x8xbf16>
    %c16 = arith.constant 16 : index
    %c0_11 = arith.constant 0 : index
    %20 = vector.load %arg3[%c16, %c0_11] : memref<128x16xbf16, #tpu.memory_space<vmem>>, vector<8x16xbf16>
    %cst_12 = arith.constant dense<0.000000e+00> : vector<64x16xf32>
    %21 = tpu.matmul %19, %20, %cst_12 {dimension_numbers = #tpu.dot_dimension_numbers<[1], [0], [0], [1], [0, 0, 1, 1], [], []>} : vector<64x8xbf16>, vector<8x16xbf16>, vector<64x16xf32> -> vector<64x16xf32>
    %22 = arith.addf %17, %21 : vector<64x16xf32>
    %23 = vector.extract_strided_slice %8 {offsets = [192, 0], sizes = [64, 8], strides = [1, 1]} : vector<1024x8xf32> to vector<64x8xf32>
    %24 = arith.truncf %23 : vector<64x8xf32> to vector<64x8xbf16>
    %c24 = arith.constant 24 : index
    %c0_13 = arith.constant 0 : index
    %25 = vector.load %arg3[%c24, %c0_13] : memref<128x16xbf16, #tpu.memory_space<vmem>>, vector<8x16xbf16>
    %cst_14 = arith.constant dense<0.000000e+00> : vector<64x16xf32>
    %26 = tpu.matmul %24, %25, %cst_14 {dimension_numbers = #tpu.dot_dimension_numbers<[1], [0], [0], [1], [0, 0, 1, 1], [], []>} : vector<64x8xbf16>, vector<8x16xbf16>, vector<64x16xf32> -> vector<64x16xf32>
    %27 = arith.addf %22, %26 : vector<64x16xf32>
    %28 = vector.extract_strided_slice %8 {offsets = [256, 0], sizes = [64, 8], strides = [1, 1]} : vector<1024x8xf32> to vector<64x8xf32>
    %29 = arith.truncf %28 : vector<64x8xf32> to vector<64x8xbf16>
    %c32 = arith.constant 32 : index
    %c0_15 = arith.constant 0 : index
    %30 = vector.load %arg3[%c32, %c0_15] : memref<128x16xbf16, #tpu.memory_space<vmem>>, vector<8x16xbf16>
    %cst_16 = arith.constant dense<0.000000e+00> : vector<64x16xf32>
    %31 = tpu.matmul %29, %30, %cst_16 {dimension_numbers = #tpu.dot_dimension_numbers<[1], [0], [0], [1], [0, 0, 1, 1], [], []>} : vector<64x8xbf16>, vector<8x16xbf16>, vector<64x16xf32> -> vector<64x16xf32>
    %32 = arith.addf %27, %31 : vector<64x16xf32>
    %33 = vector.extract_strided_slice %8 {offsets = [320, 0], sizes = [64, 8], strides = [1, 1]} : vector<1024x8xf32> to vector<64x8xf32>
    %34 = arith.truncf %33 : vector<64x8xf32> to vector<64x8xbf16>
    %c40 = arith.constant 40 : index
    %c0_17 = arith.constant 0 : index
    %35 = vector.load %arg3[%c40, %c0_17] : memref<128x16xbf16, #tpu.memory_space<vmem>>, vector<8x16xbf16>
    %cst_18 = arith.constant dense<0.000000e+00> : vector<64x16xf32>
    %36 = tpu.matmul %34, %35, %cst_18 {dimension_numbers = #tpu.dot_dimension_numbers<[1], [0], [0], [1], [0, 0, 1, 1], [], []>} : vector<64x8xbf16>, vector<8x16xbf16>, vector<64x16xf32> -> vector<64x16xf32>
    %37 = arith.addf %32, %36 : vector<64x16xf32>
    %38 = vector.extract_strided_slice %8 {offsets = [384, 0], sizes = [64, 8], strides = [1, 1]} : vector<1024x8xf32> to vector<64x8xf32>
    %39 = arith.truncf %38 : vector<64x8xf32> to vector<64x8xbf16>
    %c48 = arith.constant 48 : index
    %c0_19 = arith.constant 0 : index
    %40 = vector.load %arg3[%c48, %c0_19] : memref<128x16xbf16, #tpu.memory_space<vmem>>, vector<8x16xbf16>
    %cst_20 = arith.constant dense<0.000000e+00> : vector<64x16xf32>
    %41 = tpu.matmul %39, %40, %cst_20 {dimension_numbers = #tpu.dot_dimension_numbers<[1], [0], [0], [1], [0, 0, 1, 1], [], []>} : vector<64x8xbf16>, vector<8x16xbf16>, vector<64x16xf32> -> vector<64x16xf32>
    %42 = arith.addf %37, %41 : vector<64x16xf32>
    %43 = vector.extract_strided_slice %8 {offsets = [448, 0], sizes = [64, 8], strides = [1, 1]} : vector<1024x8xf32> to vector<64x8xf32>
    %44 = arith.truncf %43 : vector<64x8xf32> to vector<64x8xbf16>
    %c56 = arith.constant 56 : index
    %c0_21 = arith.constant 0 : index
    %45 = vector.load %arg3[%c56, %c0_21] : memref<128x16xbf16, #tpu.memory_space<vmem>>, vector<8x16xbf16>
    %cst_22 = arith.constant dense<0.000000e+00> : vector<64x16xf32>
    %46 = tpu.matmul %44, %45, %cst_22 {dimension_numbers = #tpu.dot_dimension_numbers<[1], [0], [0], [1], [0, 0, 1, 1], [], []>} : vector<64x8xbf16>, vector<8x16xbf16>, vector<64x16xf32> -> vector<64x16xf32>
    %47 = arith.addf %42, %46 : vector<64x16xf32>
    %48 = vector.extract_strided_slice %8 {offsets = [512, 0], sizes = [64, 8], strides = [1, 1]} : vector<1024x8xf32> to vector<64x8xf32>
    %49 = arith.truncf %48 : vector<64x8xf32> to vector<64x8xbf16>
    %c64 = arith.constant 64 : index
    %c0_23 = arith.constant 0 : index
    %50 = vector.load %arg3[%c64, %c0_23] : memref<128x16xbf16, #tpu.memory_space<vmem>>, vector<8x16xbf16>
    %cst_24 = arith.constant dense<0.000000e+00> : vector<64x16xf32>
    %51 = tpu.matmul %49, %50, %cst_24 {dimension_numbers = #tpu.dot_dimension_numbers<[1], [0], [0], [1], [0, 0, 1, 1], [], []>} : vector<64x8xbf16>, vector<8x16xbf16>, vector<64x16xf32> -> vector<64x16xf32>
    %52 = arith.addf %47, %51 : vector<64x16xf32>
    %53 = vector.extract_strided_slice %8 {offsets = [576, 0], sizes = [64, 8], strides = [1, 1]} : vector<1024x8xf32> to vector<64x8xf32>
    %54 = arith.truncf %53 : vector<64x8xf32> to vector<64x8xbf16>
    %c72 = arith.constant 72 : index
    %c0_25 = arith.constant 0 : index
    %55 = vector.load %arg3[%c72, %c0_25] : memref<128x16xbf16, #tpu.memory_space<vmem>>, vector<8x16xbf16>
    %cst_26 = arith.constant dense<0.000000e+00> : vector<64x16xf32>
    %56 = tpu.matmul %54, %55, %cst_26 {dimension_numbers = #tpu.dot_dimension_numbers<[1], [0], [0], [1], [0, 0, 1, 1], [], []>} : vector<64x8xbf16>, vector<8x16xbf16>, vector<64x16xf32> -> vector<64x16xf32>
    %57 = arith.addf %52, %56 : vector<64x16xf32>
    %58 = vector.extract_strided_slice %8 {offsets = [640, 0], sizes = [64, 8], strides = [1, 1]} : vector<1024x8xf32> to vector<64x8xf32>
    %59 = arith.truncf %58 : vector<64x8xf32> to vector<64x8xbf16>
    %c80 = arith.constant 80 : index
    %c0_27 = arith.constant 0 : index
    %60 = vector.load %arg3[%c80, %c0_27] : memref<128x16xbf16, #tpu.memory_space<vmem>>, vector<8x16xbf16>
    %cst_28 = arith.constant dense<0.000000e+00> : vector<64x16xf32>
    %61 = tpu.matmul %59, %60, %cst_28 {dimension_numbers = #tpu.dot_dimension_numbers<[1], [0], [0], [1], [0, 0, 1, 1], [], []>} : vector<64x8xbf16>, vector<8x16xbf16>, vector<64x16xf32> -> vector<64x16xf32>
    %62 = arith.addf %57, %61 : vector<64x16xf32>
    %63 = vector.extract_strided_slice %8 {offsets = [704, 0], sizes = [64, 8], strides = [1, 1]} : vector<1024x8xf32> to vector<64x8xf32>
    %64 = arith.truncf %63 : vector<64x8xf32> to vector<64x8xbf16>
    %c88 = arith.constant 88 : index
    %c0_29 = arith.constant 0 : index
    %65 = vector.load %arg3[%c88, %c0_29] : memref<128x16xbf16, #tpu.memory_space<vmem>>, vector<8x16xbf16>
    %cst_30 = arith.constant dense<0.000000e+00> : vector<64x16xf32>
    %66 = tpu.matmul %64, %65, %cst_30 {dimension_numbers = #tpu.dot_dimension_numbers<[1], [0], [0], [1], [0, 0, 1, 1], [], []>} : vector<64x8xbf16>, vector<8x16xbf16>, vector<64x16xf32> -> vector<64x16xf32>
    %67 = arith.addf %62, %66 : vector<64x16xf32>
    %68 = vector.extract_strided_slice %8 {offsets = [768, 0], sizes = [64, 8], strides = [1, 1]} : vector<1024x8xf32> to vector<64x8xf32>
    %69 = arith.truncf %68 : vector<64x8xf32> to vector<64x8xbf16>
    %c96 = arith.constant 96 : index
    %c0_31 = arith.constant 0 : index
    %70 = vector.load %arg3[%c96, %c0_31] : memref<128x16xbf16, #tpu.memory_space<vmem>>, vector<8x16xbf16>
    %cst_32 = arith.constant dense<0.000000e+00> : vector<64x16xf32>
    %71 = tpu.matmul %69, %70, %cst_32 {dimension_numbers = #tpu.dot_dimension_numbers<[1], [0], [0], [1], [0, 0, 1, 1], [], []>} : vector<64x8xbf16>, vector<8x16xbf16>, vector<64x16xf32> -> vector<64x16xf32>
    %72 = arith.addf %67, %71 : vector<64x16xf32>
    %73 = vector.extract_strided_slice %8 {offsets = [832, 0], sizes = [64, 8], strides = [1, 1]} : vector<1024x8xf32> to vector<64x8xf32>
    %74 = arith.truncf %73 : vector<64x8xf32> to vector<64x8xbf16>
    %c104 = arith.constant 104 : index
    %c0_33 = arith.constant 0 : index
    %75 = vector.load %arg3[%c104, %c0_33] : memref<128x16xbf16, #tpu.memory_space<vmem>>, vector<8x16xbf16>
    %cst_34 = arith.constant dense<0.000000e+00> : vector<64x16xf32>
    %76 = tpu.matmul %74, %75, %cst_34 {dimension_numbers = #tpu.dot_dimension_numbers<[1], [0], [0], [1], [0, 0, 1, 1], [], []>} : vector<64x8xbf16>, vector<8x16xbf16>, vector<64x16xf32> -> vector<64x16xf32>
    %77 = arith.addf %72, %76 : vector<64x16xf32>
    %78 = vector.extract_strided_slice %8 {offsets = [896, 0], sizes = [64, 8], strides = [1, 1]} : vector<1024x8xf32> to vector<64x8xf32>
    %79 = arith.truncf %78 : vector<64x8xf32> to vector<64x8xbf16>
    %c112 = arith.constant 112 : index
    %c0_35 = arith.constant 0 : index
    %80 = vector.load %arg3[%c112, %c0_35] : memref<128x16xbf16, #tpu.memory_space<vmem>>, vector<8x16xbf16>
    %cst_36 = arith.constant dense<0.000000e+00> : vector<64x16xf32>
    %81 = tpu.matmul %79, %80, %cst_36 {dimension_numbers = #tpu.dot_dimension_numbers<[1], [0], [0], [1], [0, 0, 1, 1], [], []>} : vector<64x8xbf16>, vector<8x16xbf16>, vector<64x16xf32> -> vector<64x16xf32>
    %82 = arith.addf %77, %81 : vector<64x16xf32>
    %83 = vector.extract_strided_slice %8 {offsets = [960, 0], sizes = [64, 8], strides = [1, 1]} : vector<1024x8xf32> to vector<64x8xf32>
    %84 = arith.truncf %83 : vector<64x8xf32> to vector<64x8xbf16>
    %c120 = arith.constant 120 : index
    %c0_37 = arith.constant 0 : index
    %85 = vector.load %arg3[%c120, %c0_37] : memref<128x16xbf16, #tpu.memory_space<vmem>>, vector<8x16xbf16>
    %cst_38 = arith.constant dense<0.000000e+00> : vector<64x16xf32>
    %86 = tpu.matmul %84, %85, %cst_38 {dimension_numbers = #tpu.dot_dimension_numbers<[1], [0], [0], [1], [0, 0, 1, 1], [], []>} : vector<64x8xbf16>, vector<8x16xbf16>, vector<64x16xf32> -> vector<64x16xf32>
    %87 = arith.addf %82, %86 : vector<64x16xf32>
    %cst_39 = arith.constant dense<0.000000e+00> : vector<16xf32>
    %88 = vector.multi_reduction <add>, %87, %cst_39 [0] : vector<64x16xf32> to vector<16xf32>
    %89 = vector.shape_cast %88 : vector<16xf32> to vector<1x16xf32>
    %cst_40 = arith.constant 6.400000e+01 : f32
    %90 = vector.broadcast %cst_40 : f32 to vector<1x16xf32>
    %91 = arith.divf %89, %90 : vector<1x16xf32>
    %92 = vector.broadcast %91 : vector<1x16xf32> to vector<64x16xf32>
    %93 = arith.subf %87, %92 : vector<64x16xf32>
    %94 = vector.broadcast %91 : vector<1x16xf32> to vector<64x16xf32>
    %95 = arith.subf %87, %94 : vector<64x16xf32>
    %96 = arith.mulf %93, %95 : vector<64x16xf32>
    %cst_41 = arith.constant dense<0.000000e+00> : vector<16xf32>
    %97 = vector.multi_reduction <add>, %96, %cst_41 [0] : vector<64x16xf32> to vector<16xf32>
    %98 = vector.shape_cast %97 : vector<16xf32> to vector<1x16xf32>
    %cst_42 = arith.constant 6.400000e+01 : f32
    %99 = vector.broadcast %cst_42 : f32 to vector<1x16xf32>
    %100 = arith.divf %98, %99 : vector<1x16xf32>
    %101 = vector.broadcast %91 : vector<1x16xf32> to vector<64x16xf32>
    %102 = arith.subf %87, %101 : vector<64x16xf32>
    %cst_43 = arith.constant 9.99999974E-6 : f32
    %103 = vector.broadcast %cst_43 : f32 to vector<1x16xf32>
    %104 = arith.addf %100, %103 : vector<1x16xf32>
    %105 = math.rsqrt %104 : vector<1x16xf32>
    %106 = vector.broadcast %105 : vector<1x16xf32> to vector<64x16xf32>
    %107 = arith.mulf %102, %106 : vector<64x16xf32>
    %cst_44 = arith.constant 0.000000e+00 : f32
    %108 = vector.broadcast %cst_44 : f32 to vector<64x16xf32>
    %109 = arith.cmpf ogt, %107, %108 : vector<64x16xf32>
    %cst_45 = arith.constant 2.000000e-01 : f32
    %110 = vector.broadcast %cst_45 : f32 to vector<64x16xf32>
    %111 = arith.mulf %110, %107 : vector<64x16xf32>
    %112 = arith.select %109, %107, %111 : vector<64x16xi1>, vector<64x16xf32>
    %c0_46 = arith.constant 0 : index
    %c0_47 = arith.constant 0 : index
    %113 = vector.load %arg4[%c0_46, %c0_47] : memref<256x64xbf16, #tpu.memory_space<vmem>>, vector<256x64xbf16>
    %114 = arith.truncf %112 : vector<64x16xf32> to vector<64x16xbf16>
    %cst_48 = arith.constant dense<0.000000e+00> : vector<256x16xf32>
    %115 = tpu.matmul %113, %114, %cst_48 {dimension_numbers = #tpu.dot_dimension_numbers<[1], [0], [0], [1], [0, 0, 1, 1], [], []>} : vector<256x64xbf16>, vector<64x16xbf16>, vector<256x16xf32> -> vector<256x16xf32>
    %116 = vector.extract_strided_slice %115 {offsets = [0, 0], sizes = [16, 16], strides = [1, 1]} : vector<256x16xf32> to vector<16x16xf32>
    %117 = arith.truncf %116 : vector<16x16xf32> to vector<16x16xbf16>
    %c0_49 = arith.constant 0 : index
    %c0_50 = arith.constant 0 : index
    %118 = vector.load %arg5[%c0_49, %c0_50] : memref<256x32xbf16, #tpu.memory_space<vmem>>, vector<16x32xbf16>
    %cst_51 = arith.constant dense<0.000000e+00> : vector<16x32xf32>
    %119 = tpu.matmul %117, %118, %cst_51 {dimension_numbers = #tpu.dot_dimension_numbers<[1], [0], [0], [1], [0, 0, 1, 1], [], []>} : vector<16x16xbf16>, vector<16x32xbf16>, vector<16x32xf32> -> vector<16x32xf32>
    %120 = vector.extract_strided_slice %115 {offsets = [16, 0], sizes = [16, 16], strides = [1, 1]} : vector<256x16xf32> to vector<16x16xf32>
    %121 = arith.truncf %120 : vector<16x16xf32> to vector<16x16xbf16>
    %c16_52 = arith.constant 16 : index
    %c0_53 = arith.constant 0 : index
    %122 = vector.load %arg5[%c16_52, %c0_53] : memref<256x32xbf16, #tpu.memory_space<vmem>>, vector<16x32xbf16>
    %cst_54 = arith.constant dense<0.000000e+00> : vector<16x32xf32>
    %123 = tpu.matmul %121, %122, %cst_54 {dimension_numbers = #tpu.dot_dimension_numbers<[1], [0], [0], [1], [0, 0, 1, 1], [], []>} : vector<16x16xbf16>, vector<16x32xbf16>, vector<16x32xf32> -> vector<16x32xf32>
    %124 = arith.addf %119, %123 : vector<16x32xf32>
    %125 = vector.extract_strided_slice %115 {offsets = [32, 0], sizes = [16, 16], strides = [1, 1]} : vector<256x16xf32> to vector<16x16xf32>
    %126 = arith.truncf %125 : vector<16x16xf32> to vector<16x16xbf16>
    %c32_55 = arith.constant 32 : index
    %c0_56 = arith.constant 0 : index
    %127 = vector.load %arg5[%c32_55, %c0_56] : memref<256x32xbf16, #tpu.memory_space<vmem>>, vector<16x32xbf16>
    %cst_57 = arith.constant dense<0.000000e+00> : vector<16x32xf32>
    %128 = tpu.matmul %126, %127, %cst_57 {dimension_numbers = #tpu.dot_dimension_numbers<[1], [0], [0], [1], [0, 0, 1, 1], [], []>} : vector<16x16xbf16>, vector<16x32xbf16>, vector<16x32xf32> -> vector<16x32xf32>
    %129 = arith.addf %124, %128 : vector<16x32xf32>
    %130 = vector.extract_strided_slice %115 {offsets = [48, 0], sizes = [16, 16], strides = [1, 1]} : vector<256x16xf32> to vector<16x16xf32>
    %131 = arith.truncf %130 : vector<16x16xf32> to vector<16x16xbf16>
    %c48_58 = arith.constant 48 : index
    %c0_59 = arith.constant 0 : index
    %132 = vector.load %arg5[%c48_58, %c0_59] : memref<256x32xbf16, #tpu.memory_space<vmem>>, vector<16x32xbf16>
    %cst_60 = arith.constant dense<0.000000e+00> : vector<16x32xf32>
    %133 = tpu.matmul %131, %132, %cst_60 {dimension_numbers = #tpu.dot_dimension_numbers<[1], [0], [0], [1], [0, 0, 1, 1], [], []>} : vector<16x16xbf16>, vector<16x32xbf16>, vector<16x32xf32> -> vector<16x32xf32>
    %134 = arith.addf %129, %133 : vector<16x32xf32>
    %135 = vector.extract_strided_slice %115 {offsets = [64, 0], sizes = [16, 16], strides = [1, 1]} : vector<256x16xf32> to vector<16x16xf32>
    %136 = arith.truncf %135 : vector<16x16xf32> to vector<16x16xbf16>
    %c64_61 = arith.constant 64 : index
    %c0_62 = arith.constant 0 : index
    %137 = vector.load %arg5[%c64_61, %c0_62] : memref<256x32xbf16, #tpu.memory_space<vmem>>, vector<16x32xbf16>
    %cst_63 = arith.constant dense<0.000000e+00> : vector<16x32xf32>
    %138 = tpu.matmul %136, %137, %cst_63 {dimension_numbers = #tpu.dot_dimension_numbers<[1], [0], [0], [1], [0, 0, 1, 1], [], []>} : vector<16x16xbf16>, vector<16x32xbf16>, vector<16x32xf32> -> vector<16x32xf32>
    %139 = arith.addf %134, %138 : vector<16x32xf32>
    %140 = vector.extract_strided_slice %115 {offsets = [80, 0], sizes = [16, 16], strides = [1, 1]} : vector<256x16xf32> to vector<16x16xf32>
    %141 = arith.truncf %140 : vector<16x16xf32> to vector<16x16xbf16>
    %c80_64 = arith.constant 80 : index
    %c0_65 = arith.constant 0 : index
    %142 = vector.load %arg5[%c80_64, %c0_65] : memref<256x32xbf16, #tpu.memory_space<vmem>>, vector<16x32xbf16>
    %cst_66 = arith.constant dense<0.000000e+00> : vector<16x32xf32>
    %143 = tpu.matmul %141, %142, %cst_66 {dimension_numbers = #tpu.dot_dimension_numbers<[1], [0], [0], [1], [0, 0, 1, 1], [], []>} : vector<16x16xbf16>, vector<16x32xbf16>, vector<16x32xf32> -> vector<16x32xf32>
    %144 = arith.addf %139, %143 : vector<16x32xf32>
    %145 = vector.extract_strided_slice %115 {offsets = [96, 0], sizes = [16, 16], strides = [1, 1]} : vector<256x16xf32> to vector<16x16xf32>
    %146 = arith.truncf %145 : vector<16x16xf32> to vector<16x16xbf16>
    %c96_67 = arith.constant 96 : index
    %c0_68 = arith.constant 0 : index
    %147 = vector.load %arg5[%c96_67, %c0_68] : memref<256x32xbf16, #tpu.memory_space<vmem>>, vector<16x32xbf16>
    %cst_69 = arith.constant dense<0.000000e+00> : vector<16x32xf32>
    %148 = tpu.matmul %146, %147, %cst_69 {dimension_numbers = #tpu.dot_dimension_numbers<[1], [0], [0], [1], [0, 0, 1, 1], [], []>} : vector<16x16xbf16>, vector<16x32xbf16>, vector<16x32xf32> -> vector<16x32xf32>
    %149 = arith.addf %144, %148 : vector<16x32xf32>
    %150 = vector.extract_strided_slice %115 {offsets = [112, 0], sizes = [16, 16], strides = [1, 1]} : vector<256x16xf32> to vector<16x16xf32>
    %151 = arith.truncf %150 : vector<16x16xf32> to vector<16x16xbf16>
    %c112_70 = arith.constant 112 : index
    %c0_71 = arith.constant 0 : index
    %152 = vector.load %arg5[%c112_70, %c0_71] : memref<256x32xbf16, #tpu.memory_space<vmem>>, vector<16x32xbf16>
    %cst_72 = arith.constant dense<0.000000e+00> : vector<16x32xf32>
    %153 = tpu.matmul %151, %152, %cst_72 {dimension_numbers = #tpu.dot_dimension_numbers<[1], [0], [0], [1], [0, 0, 1, 1], [], []>} : vector<16x16xbf16>, vector<16x32xbf16>, vector<16x32xf32> -> vector<16x32xf32>
    %154 = arith.addf %149, %153 : vector<16x32xf32>
    %155 = vector.extract_strided_slice %115 {offsets = [128, 0], sizes = [16, 16], strides = [1, 1]} : vector<256x16xf32> to vector<16x16xf32>
    %156 = arith.truncf %155 : vector<16x16xf32> to vector<16x16xbf16>
    %c128 = arith.constant 128 : index
    %c0_73 = arith.constant 0 : index
    %157 = vector.load %arg5[%c128, %c0_73] : memref<256x32xbf16, #tpu.memory_space<vmem>>, vector<16x32xbf16>
    %cst_74 = arith.constant dense<0.000000e+00> : vector<16x32xf32>
    %158 = tpu.matmul %156, %157, %cst_74 {dimension_numbers = #tpu.dot_dimension_numbers<[1], [0], [0], [1], [0, 0, 1, 1], [], []>} : vector<16x16xbf16>, vector<16x32xbf16>, vector<16x32xf32> -> vector<16x32xf32>
    %159 = arith.addf %154, %158 : vector<16x32xf32>
    %160 = vector.extract_strided_slice %115 {offsets = [144, 0], sizes = [16, 16], strides = [1, 1]} : vector<256x16xf32> to vector<16x16xf32>
    %161 = arith.truncf %160 : vector<16x16xf32> to vector<16x16xbf16>
    %c144 = arith.constant 144 : index
    %c0_75 = arith.constant 0 : index
    %162 = vector.load %arg5[%c144, %c0_75] : memref<256x32xbf16, #tpu.memory_space<vmem>>, vector<16x32xbf16>
    %cst_76 = arith.constant dense<0.000000e+00> : vector<16x32xf32>
    %163 = tpu.matmul %161, %162, %cst_76 {dimension_numbers = #tpu.dot_dimension_numbers<[1], [0], [0], [1], [0, 0, 1, 1], [], []>} : vector<16x16xbf16>, vector<16x32xbf16>, vector<16x32xf32> -> vector<16x32xf32>
    %164 = arith.addf %159, %163 : vector<16x32xf32>
    %165 = vector.extract_strided_slice %115 {offsets = [160, 0], sizes = [16, 16], strides = [1, 1]} : vector<256x16xf32> to vector<16x16xf32>
    %166 = arith.truncf %165 : vector<16x16xf32> to vector<16x16xbf16>
    %c160 = arith.constant 160 : index
    %c0_77 = arith.constant 0 : index
    %167 = vector.load %arg5[%c160, %c0_77] : memref<256x32xbf16, #tpu.memory_space<vmem>>, vector<16x32xbf16>
    %cst_78 = arith.constant dense<0.000000e+00> : vector<16x32xf32>
    %168 = tpu.matmul %166, %167, %cst_78 {dimension_numbers = #tpu.dot_dimension_numbers<[1], [0], [0], [1], [0, 0, 1, 1], [], []>} : vector<16x16xbf16>, vector<16x32xbf16>, vector<16x32xf32> -> vector<16x32xf32>
    %169 = arith.addf %164, %168 : vector<16x32xf32>
    %170 = vector.extract_strided_slice %115 {offsets = [176, 0], sizes = [16, 16], strides = [1, 1]} : vector<256x16xf32> to vector<16x16xf32>
    %171 = arith.truncf %170 : vector<16x16xf32> to vector<16x16xbf16>
    %c176 = arith.constant 176 : index
    %c0_79 = arith.constant 0 : index
    %172 = vector.load %arg5[%c176, %c0_79] : memref<256x32xbf16, #tpu.memory_space<vmem>>, vector<16x32xbf16>
    %cst_80 = arith.constant dense<0.000000e+00> : vector<16x32xf32>
    %173 = tpu.matmul %171, %172, %cst_80 {dimension_numbers = #tpu.dot_dimension_numbers<[1], [0], [0], [1], [0, 0, 1, 1], [], []>} : vector<16x16xbf16>, vector<16x32xbf16>, vector<16x32xf32> -> vector<16x32xf32>
    %174 = arith.addf %169, %173 : vector<16x32xf32>
    %175 = vector.extract_strided_slice %115 {offsets = [192, 0], sizes = [16, 16], strides = [1, 1]} : vector<256x16xf32> to vector<16x16xf32>
    %176 = arith.truncf %175 : vector<16x16xf32> to vector<16x16xbf16>
    %c192 = arith.constant 192 : index
    %c0_81 = arith.constant 0 : index
    %177 = vector.load %arg5[%c192, %c0_81] : memref<256x32xbf16, #tpu.memory_space<vmem>>, vector<16x32xbf16>
    %cst_82 = arith.constant dense<0.000000e+00> : vector<16x32xf32>
    %178 = tpu.matmul %176, %177, %cst_82 {dimension_numbers = #tpu.dot_dimension_numbers<[1], [0], [0], [1], [0, 0, 1, 1], [], []>} : vector<16x16xbf16>, vector<16x32xbf16>, vector<16x32xf32> -> vector<16x32xf32>
    %179 = arith.addf %174, %178 : vector<16x32xf32>
    %180 = vector.extract_strided_slice %115 {offsets = [208, 0], sizes = [16, 16], strides = [1, 1]} : vector<256x16xf32> to vector<16x16xf32>
    %181 = arith.truncf %180 : vector<16x16xf32> to vector<16x16xbf16>
    %c208 = arith.constant 208 : index
    %c0_83 = arith.constant 0 : index
    %182 = vector.load %arg5[%c208, %c0_83] : memref<256x32xbf16, #tpu.memory_space<vmem>>, vector<16x32xbf16>
    %cst_84 = arith.constant dense<0.000000e+00> : vector<16x32xf32>
    %183 = tpu.matmul %181, %182, %cst_84 {dimension_numbers = #tpu.dot_dimension_numbers<[1], [0], [0], [1], [0, 0, 1, 1], [], []>} : vector<16x16xbf16>, vector<16x32xbf16>, vector<16x32xf32> -> vector<16x32xf32>
    %184 = arith.addf %179, %183 : vector<16x32xf32>
    %185 = vector.extract_strided_slice %115 {offsets = [224, 0], sizes = [16, 16], strides = [1, 1]} : vector<256x16xf32> to vector<16x16xf32>
    %186 = arith.truncf %185 : vector<16x16xf32> to vector<16x16xbf16>
    %c224 = arith.constant 224 : index
    %c0_85 = arith.constant 0 : index
    %187 = vector.load %arg5[%c224, %c0_85] : memref<256x32xbf16, #tpu.memory_space<vmem>>, vector<16x32xbf16>
    %cst_86 = arith.constant dense<0.000000e+00> : vector<16x32xf32>
    %188 = tpu.matmul %186, %187, %cst_86 {dimension_numbers = #tpu.dot_dimension_numbers<[1], [0], [0], [1], [0, 0, 1, 1], [], []>} : vector<16x16xbf16>, vector<16x32xbf16>, vector<16x32xf32> -> vector<16x32xf32>
    %189 = arith.addf %184, %188 : vector<16x32xf32>
    %190 = vector.extract_strided_slice %115 {offsets = [240, 0], sizes = [16, 16], strides = [1, 1]} : vector<256x16xf32> to vector<16x16xf32>
    %191 = arith.truncf %190 : vector<16x16xf32> to vector<16x16xbf16>
    %c240 = arith.constant 240 : index
    %c0_87 = arith.constant 0 : index
    %192 = vector.load %arg5[%c240, %c0_87] : memref<256x32xbf16, #tpu.memory_space<vmem>>, vector<16x32xbf16>
    %cst_88 = arith.constant dense<0.000000e+00> : vector<16x32xf32>
    %193 = tpu.matmul %191, %192, %cst_88 {dimension_numbers = #tpu.dot_dimension_numbers<[1], [0], [0], [1], [0, 0, 1, 1], [], []>} : vector<16x16xbf16>, vector<16x32xbf16>, vector<16x32xf32> -> vector<16x32xf32>
    %194 = arith.addf %189, %193 : vector<16x32xf32>
    %cst_89 = arith.constant dense<0.000000e+00> : vector<32xf32>
    %195 = vector.multi_reduction <add>, %194, %cst_89 [0] : vector<16x32xf32> to vector<32xf32>
    %196 = vector.shape_cast %195 : vector<32xf32> to vector<1x32xf32>
    %cst_90 = arith.constant 1.600000e+01 : f32
    %197 = vector.broadcast %cst_90 : f32 to vector<1x32xf32>
    %198 = arith.divf %196, %197 : vector<1x32xf32>
    %199 = vector.broadcast %198 : vector<1x32xf32> to vector<16x32xf32>
    %200 = arith.subf %194, %199 : vector<16x32xf32>
    %201 = vector.broadcast %198 : vector<1x32xf32> to vector<16x32xf32>
    %202 = arith.subf %194, %201 : vector<16x32xf32>
    %203 = arith.mulf %200, %202 : vector<16x32xf32>
    %cst_91 = arith.constant dense<0.000000e+00> : vector<32xf32>
    %204 = vector.multi_reduction <add>, %203, %cst_91 [0] : vector<16x32xf32> to vector<32xf32>
    %205 = vector.shape_cast %204 : vector<32xf32> to vector<1x32xf32>
    %cst_92 = arith.constant 1.600000e+01 : f32
    %206 = vector.broadcast %cst_92 : f32 to vector<1x32xf32>
    %207 = arith.divf %205, %206 : vector<1x32xf32>
    %208 = vector.broadcast %198 : vector<1x32xf32> to vector<16x32xf32>
    %209 = arith.subf %194, %208 : vector<16x32xf32>
    %cst_93 = arith.constant 9.99999974E-6 : f32
    %210 = vector.broadcast %cst_93 : f32 to vector<1x32xf32>
    %211 = arith.addf %207, %210 : vector<1x32xf32>
    %212 = math.rsqrt %211 : vector<1x32xf32>
    %213 = vector.broadcast %212 : vector<1x32xf32> to vector<16x32xf32>
    %214 = arith.mulf %209, %213 : vector<16x32xf32>
    %cst_94 = arith.constant 0.000000e+00 : f32
    %215 = vector.broadcast %cst_94 : f32 to vector<16x32xf32>
    %216 = arith.cmpf ogt, %214, %215 : vector<16x32xf32>
    %cst_95 = arith.constant 2.000000e-01 : f32
    %217 = vector.broadcast %cst_95 : f32 to vector<16x32xf32>
    %218 = arith.mulf %217, %214 : vector<16x32xf32>
    %219 = arith.select %216, %214, %218 : vector<16x32xi1>, vector<16x32xf32>
    %c0_96 = arith.constant 0 : index
    %c0_97 = arith.constant 0 : index
    %220 = vector.load %arg6[%c0_96, %c0_97] : memref<144x16xbf16, #tpu.memory_space<vmem>>, vector<144x16xbf16>
    %221 = arith.truncf %219 : vector<16x32xf32> to vector<16x32xbf16>
    %cst_98 = arith.constant dense<0.000000e+00> : vector<144x32xf32>
    %222 = tpu.matmul %220, %221, %cst_98 {dimension_numbers = #tpu.dot_dimension_numbers<[1], [0], [0], [1], [0, 0, 1, 1], [], []>} : vector<144x16xbf16>, vector<16x32xbf16>, vector<144x32xf32> -> vector<144x32xf32>
    %223 = vector.extract_strided_slice %222 {offsets = [0, 0], sizes = [9, 32], strides = [1, 1]} : vector<144x32xf32> to vector<9x32xf32>
    %224 = arith.truncf %223 : vector<9x32xf32> to vector<9x32xbf16>
    %c0_99 = arith.constant 0 : index
    %c0_100 = arith.constant 0 : index
    %225 = vector.load %arg7[%c0_99, %c0_100] : memref<512x64xbf16, #tpu.memory_space<vmem>>, vector<32x64xbf16>
    %cst_101 = arith.constant dense<0.000000e+00> : vector<9x64xf32>
    %226 = tpu.matmul %224, %225, %cst_101 {dimension_numbers = #tpu.dot_dimension_numbers<[1], [0], [0], [1], [0, 0, 1, 1], [], []>} : vector<9x32xbf16>, vector<32x64xbf16>, vector<9x64xf32> -> vector<9x64xf32>
    %227 = vector.extract_strided_slice %222 {offsets = [9, 0], sizes = [9, 32], strides = [1, 1]} : vector<144x32xf32> to vector<9x32xf32>
    %228 = arith.truncf %227 : vector<9x32xf32> to vector<9x32xbf16>
    %c32_102 = arith.constant 32 : index
    %c0_103 = arith.constant 0 : index
    %229 = vector.load %arg7[%c32_102, %c0_103] : memref<512x64xbf16, #tpu.memory_space<vmem>>, vector<32x64xbf16>
    %cst_104 = arith.constant dense<0.000000e+00> : vector<9x64xf32>
    %230 = tpu.matmul %228, %229, %cst_104 {dimension_numbers = #tpu.dot_dimension_numbers<[1], [0], [0], [1], [0, 0, 1, 1], [], []>} : vector<9x32xbf16>, vector<32x64xbf16>, vector<9x64xf32> -> vector<9x64xf32>
    %231 = arith.addf %226, %230 : vector<9x64xf32>
    %232 = vector.extract_strided_slice %222 {offsets = [18, 0], sizes = [9, 32], strides = [1, 1]} : vector<144x32xf32> to vector<9x32xf32>
    %233 = arith.truncf %232 : vector<9x32xf32> to vector<9x32xbf16>
    %c64_105 = arith.constant 64 : index
    %c0_106 = arith.constant 0 : index
    %234 = vector.load %arg7[%c64_105, %c0_106] : memref<512x64xbf16, #tpu.memory_space<vmem>>, vector<32x64xbf16>
    %cst_107 = arith.constant dense<0.000000e+00> : vector<9x64xf32>
    %235 = tpu.matmul %233, %234, %cst_107 {dimension_numbers = #tpu.dot_dimension_numbers<[1], [0], [0], [1], [0, 0, 1, 1], [], []>} : vector<9x32xbf16>, vector<32x64xbf16>, vector<9x64xf32> -> vector<9x64xf32>
    %236 = arith.addf %231, %235 : vector<9x64xf32>
    %237 = vector.extract_strided_slice %222 {offsets = [27, 0], sizes = [9, 32], strides = [1, 1]} : vector<144x32xf32> to vector<9x32xf32>
    %238 = arith.truncf %237 : vector<9x32xf32> to vector<9x32xbf16>
    %c96_108 = arith.constant 96 : index
    %c0_109 = arith.constant 0 : index
    %239 = vector.load %arg7[%c96_108, %c0_109] : memref<512x64xbf16, #tpu.memory_space<vmem>>, vector<32x64xbf16>
    %cst_110 = arith.constant dense<0.000000e+00> : vector<9x64xf32>
    %240 = tpu.matmul %238, %239, %cst_110 {dimension_numbers = #tpu.dot_dimension_numbers<[1], [0], [0], [1], [0, 0, 1, 1], [], []>} : vector<9x32xbf16>, vector<32x64xbf16>, vector<9x64xf32> -> vector<9x64xf32>
    %241 = arith.addf %236, %240 : vector<9x64xf32>
    %242 = vector.extract_strided_slice %222 {offsets = [36, 0], sizes = [9, 32], strides = [1, 1]} : vector<144x32xf32> to vector<9x32xf32>
    %243 = arith.truncf %242 : vector<9x32xf32> to vector<9x32xbf16>
    %c128_111 = arith.constant 128 : index
    %c0_112 = arith.constant 0 : index
    %244 = vector.load %arg7[%c128_111, %c0_112] : memref<512x64xbf16, #tpu.memory_space<vmem>>, vector<32x64xbf16>
    %cst_113 = arith.constant dense<0.000000e+00> : vector<9x64xf32>
    %245 = tpu.matmul %243, %244, %cst_113 {dimension_numbers = #tpu.dot_dimension_numbers<[1], [0], [0], [1], [0, 0, 1, 1], [], []>} : vector<9x32xbf16>, vector<32x64xbf16>, vector<9x64xf32> -> vector<9x64xf32>
    %246 = arith.addf %241, %245 : vector<9x64xf32>
    %247 = vector.extract_strided_slice %222 {offsets = [45, 0], sizes = [9, 32], strides = [1, 1]} : vector<144x32xf32> to vector<9x32xf32>
    %248 = arith.truncf %247 : vector<9x32xf32> to vector<9x32xbf16>
    %c160_114 = arith.constant 160 : index
    %c0_115 = arith.constant 0 : index
    %249 = vector.load %arg7[%c160_114, %c0_115] : memref<512x64xbf16, #tpu.memory_space<vmem>>, vector<32x64xbf16>
    %cst_116 = arith.constant dense<0.000000e+00> : vector<9x64xf32>
    %250 = tpu.matmul %248, %249, %cst_116 {dimension_numbers = #tpu.dot_dimension_numbers<[1], [0], [0], [1], [0, 0, 1, 1], [], []>} : vector<9x32xbf16>, vector<32x64xbf16>, vector<9x64xf32> -> vector<9x64xf32>
    %251 = arith.addf %246, %250 : vector<9x64xf32>
    %252 = vector.extract_strided_slice %222 {offsets = [54, 0], sizes = [9, 32], strides = [1, 1]} : vector<144x32xf32> to vector<9x32xf32>
    %253 = arith.truncf %252 : vector<9x32xf32> to vector<9x32xbf16>
    %c192_117 = arith.constant 192 : index
    %c0_118 = arith.constant 0 : index
    %254 = vector.load %arg7[%c192_117, %c0_118] : memref<512x64xbf16, #tpu.memory_space<vmem>>, vector<32x64xbf16>
    %cst_119 = arith.constant dense<0.000000e+00> : vector<9x64xf32>
    %255 = tpu.matmul %253, %254, %cst_119 {dimension_numbers = #tpu.dot_dimension_numbers<[1], [0], [0], [1], [0, 0, 1, 1], [], []>} : vector<9x32xbf16>, vector<32x64xbf16>, vector<9x64xf32> -> vector<9x64xf32>
    %256 = arith.addf %251, %255 : vector<9x64xf32>
    %257 = vector.extract_strided_slice %222 {offsets = [63, 0], sizes = [9, 32], strides = [1, 1]} : vector<144x32xf32> to vector<9x32xf32>
    %258 = arith.truncf %257 : vector<9x32xf32> to vector<9x32xbf16>
    %c224_120 = arith.constant 224 : index
    %c0_121 = arith.constant 0 : index
    %259 = vector.load %arg7[%c224_120, %c0_121] : memref<512x64xbf16, #tpu.memory_space<vmem>>, vector<32x64xbf16>
    %cst_122 = arith.constant dense<0.000000e+00> : vector<9x64xf32>
    %260 = tpu.matmul %258, %259, %cst_122 {dimension_numbers = #tpu.dot_dimension_numbers<[1], [0], [0], [1], [0, 0, 1, 1], [], []>} : vector<9x32xbf16>, vector<32x64xbf16>, vector<9x64xf32> -> vector<9x64xf32>
    %261 = arith.addf %256, %260 : vector<9x64xf32>
    %262 = vector.extract_strided_slice %222 {offsets = [72, 0], sizes = [9, 32], strides = [1, 1]} : vector<144x32xf32> to vector<9x32xf32>
    %263 = arith.truncf %262 : vector<9x32xf32> to vector<9x32xbf16>
    %c256 = arith.constant 256 : index
    %c0_123 = arith.constant 0 : index
    %264 = vector.load %arg7[%c256, %c0_123] : memref<512x64xbf16, #tpu.memory_space<vmem>>, vector<32x64xbf16>
    %cst_124 = arith.constant dense<0.000000e+00> : vector<9x64xf32>
    %265 = tpu.matmul %263, %264, %cst_124 {dimension_numbers = #tpu.dot_dimension_numbers<[1], [0], [0], [1], [0, 0, 1, 1], [], []>} : vector<9x32xbf16>, vector<32x64xbf16>, vector<9x64xf32> -> vector<9x64xf32>
    %266 = arith.addf %261, %265 : vector<9x64xf32>
    %267 = vector.extract_strided_slice %222 {offsets = [81, 0], sizes = [9, 32], strides = [1, 1]} : vector<144x32xf32> to vector<9x32xf32>
    %268 = arith.truncf %267 : vector<9x32xf32> to vector<9x32xbf16>
    %c288 = arith.constant 288 : index
    %c0_125 = arith.constant 0 : index
    %269 = vector.load %arg7[%c288, %c0_125] : memref<512x64xbf16, #tpu.memory_space<vmem>>, vector<32x64xbf16>
    %cst_126 = arith.constant dense<0.000000e+00> : vector<9x64xf32>
    %270 = tpu.matmul %268, %269, %cst_126 {dimension_numbers = #tpu.dot_dimension_numbers<[1], [0], [0], [1], [0, 0, 1, 1], [], []>} : vector<9x32xbf16>, vector<32x64xbf16>, vector<9x64xf32> -> vector<9x64xf32>
    %271 = arith.addf %266, %270 : vector<9x64xf32>
    %272 = vector.extract_strided_slice %222 {offsets = [90, 0], sizes = [9, 32], strides = [1, 1]} : vector<144x32xf32> to vector<9x32xf32>
    %273 = arith.truncf %272 : vector<9x32xf32> to vector<9x32xbf16>
    %c320 = arith.constant 320 : index
    %c0_127 = arith.constant 0 : index
    %274 = vector.load %arg7[%c320, %c0_127] : memref<512x64xbf16, #tpu.memory_space<vmem>>, vector<32x64xbf16>
    %cst_128 = arith.constant dense<0.000000e+00> : vector<9x64xf32>
    %275 = tpu.matmul %273, %274, %cst_128 {dimension_numbers = #tpu.dot_dimension_numbers<[1], [0], [0], [1], [0, 0, 1, 1], [], []>} : vector<9x32xbf16>, vector<32x64xbf16>, vector<9x64xf32> -> vector<9x64xf32>
    %276 = arith.addf %271, %275 : vector<9x64xf32>
    %277 = vector.extract_strided_slice %222 {offsets = [99, 0], sizes = [9, 32], strides = [1, 1]} : vector<144x32xf32> to vector<9x32xf32>
    %278 = arith.truncf %277 : vector<9x32xf32> to vector<9x32xbf16>
    %c352 = arith.constant 352 : index
    %c0_129 = arith.constant 0 : index
    %279 = vector.load %arg7[%c352, %c0_129] : memref<512x64xbf16, #tpu.memory_space<vmem>>, vector<32x64xbf16>
    %cst_130 = arith.constant dense<0.000000e+00> : vector<9x64xf32>
    %280 = tpu.matmul %278, %279, %cst_130 {dimension_numbers = #tpu.dot_dimension_numbers<[1], [0], [0], [1], [0, 0, 1, 1], [], []>} : vector<9x32xbf16>, vector<32x64xbf16>, vector<9x64xf32> -> vector<9x64xf32>
    %281 = arith.addf %276, %280 : vector<9x64xf32>
    %282 = vector.extract_strided_slice %222 {offsets = [108, 0], sizes = [9, 32], strides = [1, 1]} : vector<144x32xf32> to vector<9x32xf32>
    %283 = arith.truncf %282 : vector<9x32xf32> to vector<9x32xbf16>
    %c384 = arith.constant 384 : index
    %c0_131 = arith.constant 0 : index
    %284 = vector.load %arg7[%c384, %c0_131] : memref<512x64xbf16, #tpu.memory_space<vmem>>, vector<32x64xbf16>
    %cst_132 = arith.constant dense<0.000000e+00> : vector<9x64xf32>
    %285 = tpu.matmul %283, %284, %cst_132 {dimension_numbers = #tpu.dot_dimension_numbers<[1], [0], [0], [1], [0, 0, 1, 1], [], []>} : vector<9x32xbf16>, vector<32x64xbf16>, vector<9x64xf32> -> vector<9x64xf32>
    %286 = arith.addf %281, %285 : vector<9x64xf32>
    %287 = vector.extract_strided_slice %222 {offsets = [117, 0], sizes = [9, 32], strides = [1, 1]} : vector<144x32xf32> to vector<9x32xf32>
    %288 = arith.truncf %287 : vector<9x32xf32> to vector<9x32xbf16>
    %c416 = arith.constant 416 : index
    %c0_133 = arith.constant 0 : index
    %289 = vector.load %arg7[%c416, %c0_133] : memref<512x64xbf16, #tpu.memory_space<vmem>>, vector<32x64xbf16>
    %cst_134 = arith.constant dense<0.000000e+00> : vector<9x64xf32>
    %290 = tpu.matmul %288, %289, %cst_134 {dimension_numbers = #tpu.dot_dimension_numbers<[1], [0], [0], [1], [0, 0, 1, 1], [], []>} : vector<9x32xbf16>, vector<32x64xbf16>, vector<9x64xf32> -> vector<9x64xf32>
    %291 = arith.addf %286, %290 : vector<9x64xf32>
    %292 = vector.extract_strided_slice %222 {offsets = [126, 0], sizes = [9, 32], strides = [1, 1]} : vector<144x32xf32> to vector<9x32xf32>
    %293 = arith.truncf %292 : vector<9x32xf32> to vector<9x32xbf16>
    %c448 = arith.constant 448 : index
    %c0_135 = arith.constant 0 : index
    %294 = vector.load %arg7[%c448, %c0_135] : memref<512x64xbf16, #tpu.memory_space<vmem>>, vector<32x64xbf16>
    %cst_136 = arith.constant dense<0.000000e+00> : vector<9x64xf32>
    %295 = tpu.matmul %293, %294, %cst_136 {dimension_numbers = #tpu.dot_dimension_numbers<[1], [0], [0], [1], [0, 0, 1, 1], [], []>} : vector<9x32xbf16>, vector<32x64xbf16>, vector<9x64xf32> -> vector<9x64xf32>
    %296 = arith.addf %291, %295 : vector<9x64xf32>
    %297 = vector.extract_strided_slice %222 {offsets = [135, 0], sizes = [9, 32], strides = [1, 1]} : vector<144x32xf32> to vector<9x32xf32>
    %298 = arith.truncf %297 : vector<9x32xf32> to vector<9x32xbf16>
    %c480 = arith.constant 480 : index
    %c0_137 = arith.constant 0 : index
    %299 = vector.load %arg7[%c480, %c0_137] : memref<512x64xbf16, #tpu.memory_space<vmem>>, vector<32x64xbf16>
    %cst_138 = arith.constant dense<0.000000e+00> : vector<9x64xf32>
    %300 = tpu.matmul %298, %299, %cst_138 {dimension_numbers = #tpu.dot_dimension_numbers<[1], [0], [0], [1], [0, 0, 1, 1], [], []>} : vector<9x32xbf16>, vector<32x64xbf16>, vector<9x64xf32> -> vector<9x64xf32>
    %301 = arith.addf %296, %300 : vector<9x64xf32>
    %cst_139 = arith.constant dense<0.000000e+00> : vector<64xf32>
    %302 = vector.multi_reduction <add>, %301, %cst_139 [0] : vector<9x64xf32> to vector<64xf32>
    %303 = vector.shape_cast %302 : vector<64xf32> to vector<1x64xf32>
    %cst_140 = arith.constant 9.000000e+00 : f32
    %304 = vector.broadcast %cst_140 : f32 to vector<1x64xf32>
    %305 = arith.divf %303, %304 : vector<1x64xf32>
    %306 = vector.broadcast %305 : vector<1x64xf32> to vector<9x64xf32>
    %307 = arith.subf %301, %306 : vector<9x64xf32>
    %308 = vector.broadcast %305 : vector<1x64xf32> to vector<9x64xf32>
    %309 = arith.subf %301, %308 : vector<9x64xf32>
    %310 = arith.mulf %307, %309 : vector<9x64xf32>
    %cst_141 = arith.constant dense<0.000000e+00> : vector<64xf32>
    %311 = vector.multi_reduction <add>, %310, %cst_141 [0] : vector<9x64xf32> to vector<64xf32>
    %312 = vector.shape_cast %311 : vector<64xf32> to vector<1x64xf32>
    %cst_142 = arith.constant 9.000000e+00 : f32
    %313 = vector.broadcast %cst_142 : f32 to vector<1x64xf32>
    %314 = arith.divf %312, %313 : vector<1x64xf32>
    %315 = vector.broadcast %305 : vector<1x64xf32> to vector<9x64xf32>
    %316 = arith.subf %301, %315 : vector<9x64xf32>
    %cst_143 = arith.constant 9.99999974E-6 : f32
    %317 = vector.broadcast %cst_143 : f32 to vector<1x64xf32>
    %318 = arith.addf %314, %317 : vector<1x64xf32>
    %319 = math.rsqrt %318 : vector<1x64xf32>
    %320 = vector.broadcast %319 : vector<1x64xf32> to vector<9x64xf32>
    %321 = arith.mulf %316, %320 : vector<9x64xf32>
    %cst_144 = arith.constant 0.000000e+00 : f32
    %322 = vector.broadcast %cst_144 : f32 to vector<9x64xf32>
    %323 = arith.cmpf ogt, %321, %322 : vector<9x64xf32>
    %cst_145 = arith.constant 2.000000e-01 : f32
    %324 = vector.broadcast %cst_145 : f32 to vector<9x64xf32>
    %325 = arith.mulf %324, %321 : vector<9x64xf32>
    %326 = arith.select %323, %321, %325 : vector<9x64xi1>, vector<9x64xf32>
    %c0_146 = arith.constant 0 : index
    %c0_147 = arith.constant 0 : index
    %327 = vector.load %arg8[%c0_146, %c0_147] : memref<64x9xbf16, #tpu.memory_space<vmem>>, vector<64x9xbf16>
    %328 = arith.truncf %326 : vector<9x64xf32> to vector<9x64xbf16>
    %cst_148 = arith.constant dense<0.000000e+00> : vector<64x64xf32>
    %329 = tpu.matmul %327, %328, %cst_148 {dimension_numbers = #tpu.dot_dimension_numbers<[1], [0], [0], [1], [0, 0, 1, 1], [], []>} : vector<64x9xbf16>, vector<9x64xbf16>, vector<64x64xf32> -> vector<64x64xf32>
    %c0_149 = arith.constant 0 : index
    %c0_150 = arith.constant 0 : index
    %330 = vector.load %arg9[%c0_149, %c0_150] : memref<16x64xf32, #tpu.memory_space<vmem>>, vector<16x64xf32>
    %331 = vector.extract_strided_slice %329 {offsets = [0, 0], sizes = [4, 64], strides = [1, 1]} : vector<64x64xf32> to vector<4x64xf32>
    %332 = vector.extract_strided_slice %330 {offsets = [0, 0], sizes = [1, 64], strides = [1, 1]} : vector<16x64xf32> to vector<1x64xf32>
    %333 = vector.broadcast %332 : vector<1x64xf32> to vector<4x64xf32>
    %334 = arith.mulf %331, %333 : vector<4x64xf32>
    %335 = vector.extract_strided_slice %329 {offsets = [4, 0], sizes = [4, 64], strides = [1, 1]} : vector<64x64xf32> to vector<4x64xf32>
    %336 = vector.extract_strided_slice %330 {offsets = [1, 0], sizes = [1, 64], strides = [1, 1]} : vector<16x64xf32> to vector<1x64xf32>
    %337 = vector.broadcast %336 : vector<1x64xf32> to vector<4x64xf32>
    %338 = arith.mulf %335, %337 : vector<4x64xf32>
    %339 = arith.addf %334, %338 : vector<4x64xf32>
    %340 = vector.extract_strided_slice %329 {offsets = [8, 0], sizes = [4, 64], strides = [1, 1]} : vector<64x64xf32> to vector<4x64xf32>
    %341 = vector.extract_strided_slice %330 {offsets = [2, 0], sizes = [1, 64], strides = [1, 1]} : vector<16x64xf32> to vector<1x64xf32>
    %342 = vector.broadcast %341 : vector<1x64xf32> to vector<4x64xf32>
    %343 = arith.mulf %340, %342 : vector<4x64xf32>
    %344 = arith.addf %339, %343 : vector<4x64xf32>
    %345 = vector.extract_strided_slice %329 {offsets = [12, 0], sizes = [4, 64], strides = [1, 1]} : vector<64x64xf32> to vector<4x64xf32>
    %346 = vector.extract_strided_slice %330 {offsets = [3, 0], sizes = [1, 64], strides = [1, 1]} : vector<16x64xf32> to vector<1x64xf32>
    %347 = vector.broadcast %346 : vector<1x64xf32> to vector<4x64xf32>
    %348 = arith.mulf %345, %347 : vector<4x64xf32>
    %349 = arith.addf %344, %348 : vector<4x64xf32>
    %350 = vector.extract_strided_slice %329 {offsets = [16, 0], sizes = [4, 64], strides = [1, 1]} : vector<64x64xf32> to vector<4x64xf32>
    %351 = vector.extract_strided_slice %330 {offsets = [4, 0], sizes = [1, 64], strides = [1, 1]} : vector<16x64xf32> to vector<1x64xf32>
    %352 = vector.broadcast %351 : vector<1x64xf32> to vector<4x64xf32>
    %353 = arith.mulf %350, %352 : vector<4x64xf32>
    %354 = arith.addf %349, %353 : vector<4x64xf32>
    %355 = vector.extract_strided_slice %329 {offsets = [20, 0], sizes = [4, 64], strides = [1, 1]} : vector<64x64xf32> to vector<4x64xf32>
    %356 = vector.extract_strided_slice %330 {offsets = [5, 0], sizes = [1, 64], strides = [1, 1]} : vector<16x64xf32> to vector<1x64xf32>
    %357 = vector.broadcast %356 : vector<1x64xf32> to vector<4x64xf32>
    %358 = arith.mulf %355, %357 : vector<4x64xf32>
    %359 = arith.addf %354, %358 : vector<4x64xf32>
    %360 = vector.extract_strided_slice %329 {offsets = [24, 0], sizes = [4, 64], strides = [1, 1]} : vector<64x64xf32> to vector<4x64xf32>
    %361 = vector.extract_strided_slice %330 {offsets = [6, 0], sizes = [1, 64], strides = [1, 1]} : vector<16x64xf32> to vector<1x64xf32>
    %362 = vector.broadcast %361 : vector<1x64xf32> to vector<4x64xf32>
    %363 = arith.mulf %360, %362 : vector<4x64xf32>
    %364 = arith.addf %359, %363 : vector<4x64xf32>
    %365 = vector.extract_strided_slice %329 {offsets = [28, 0], sizes = [4, 64], strides = [1, 1]} : vector<64x64xf32> to vector<4x64xf32>
    %366 = vector.extract_strided_slice %330 {offsets = [7, 0], sizes = [1, 64], strides = [1, 1]} : vector<16x64xf32> to vector<1x64xf32>
    %367 = vector.broadcast %366 : vector<1x64xf32> to vector<4x64xf32>
    %368 = arith.mulf %365, %367 : vector<4x64xf32>
    %369 = arith.addf %364, %368 : vector<4x64xf32>
    %370 = vector.extract_strided_slice %329 {offsets = [32, 0], sizes = [4, 64], strides = [1, 1]} : vector<64x64xf32> to vector<4x64xf32>
    %371 = vector.extract_strided_slice %330 {offsets = [8, 0], sizes = [1, 64], strides = [1, 1]} : vector<16x64xf32> to vector<1x64xf32>
    %372 = vector.broadcast %371 : vector<1x64xf32> to vector<4x64xf32>
    %373 = arith.mulf %370, %372 : vector<4x64xf32>
    %374 = arith.addf %369, %373 : vector<4x64xf32>
    %375 = vector.extract_strided_slice %329 {offsets = [36, 0], sizes = [4, 64], strides = [1, 1]} : vector<64x64xf32> to vector<4x64xf32>
    %376 = vector.extract_strided_slice %330 {offsets = [9, 0], sizes = [1, 64], strides = [1, 1]} : vector<16x64xf32> to vector<1x64xf32>
    %377 = vector.broadcast %376 : vector<1x64xf32> to vector<4x64xf32>
    %378 = arith.mulf %375, %377 : vector<4x64xf32>
    %379 = arith.addf %374, %378 : vector<4x64xf32>
    %380 = vector.extract_strided_slice %329 {offsets = [40, 0], sizes = [4, 64], strides = [1, 1]} : vector<64x64xf32> to vector<4x64xf32>
    %381 = vector.extract_strided_slice %330 {offsets = [10, 0], sizes = [1, 64], strides = [1, 1]} : vector<16x64xf32> to vector<1x64xf32>
    %382 = vector.broadcast %381 : vector<1x64xf32> to vector<4x64xf32>
    %383 = arith.mulf %380, %382 : vector<4x64xf32>
    %384 = arith.addf %379, %383 : vector<4x64xf32>
    %385 = vector.extract_strided_slice %329 {offsets = [44, 0], sizes = [4, 64], strides = [1, 1]} : vector<64x64xf32> to vector<4x64xf32>
    %386 = vector.extract_strided_slice %330 {offsets = [11, 0], sizes = [1, 64], strides = [1, 1]} : vector<16x64xf32> to vector<1x64xf32>
    %387 = vector.broadcast %386 : vector<1x64xf32> to vector<4x64xf32>
    %388 = arith.mulf %385, %387 : vector<4x64xf32>
    %389 = arith.addf %384, %388 : vector<4x64xf32>
    %390 = vector.extract_strided_slice %329 {offsets = [48, 0], sizes = [4, 64], strides = [1, 1]} : vector<64x64xf32> to vector<4x64xf32>
    %391 = vector.extract_strided_slice %330 {offsets = [12, 0], sizes = [1, 64], strides = [1, 1]} : vector<16x64xf32> to vector<1x64xf32>
    %392 = vector.broadcast %391 : vector<1x64xf32> to vector<4x64xf32>
    %393 = arith.mulf %390, %392 : vector<4x64xf32>
    %394 = arith.addf %389, %393 : vector<4x64xf32>
    %395 = vector.extract_strided_slice %329 {offsets = [52, 0], sizes = [4, 64], strides = [1, 1]} : vector<64x64xf32> to vector<4x64xf32>
    %396 = vector.extract_strided_slice %330 {offsets = [13, 0], sizes = [1, 64], strides = [1, 1]} : vector<16x64xf32> to vector<1x64xf32>
    %397 = vector.broadcast %396 : vector<1x64xf32> to vector<4x64xf32>
    %398 = arith.mulf %395, %397 : vector<4x64xf32>
    %399 = arith.addf %394, %398 : vector<4x64xf32>
    %400 = vector.extract_strided_slice %329 {offsets = [56, 0], sizes = [4, 64], strides = [1, 1]} : vector<64x64xf32> to vector<4x64xf32>
    %401 = vector.extract_strided_slice %330 {offsets = [14, 0], sizes = [1, 64], strides = [1, 1]} : vector<16x64xf32> to vector<1x64xf32>
    %402 = vector.broadcast %401 : vector<1x64xf32> to vector<4x64xf32>
    %403 = arith.mulf %400, %402 : vector<4x64xf32>
    %404 = arith.addf %399, %403 : vector<4x64xf32>
    %405 = vector.extract_strided_slice %329 {offsets = [60, 0], sizes = [4, 64], strides = [1, 1]} : vector<64x64xf32> to vector<4x64xf32>
    %406 = vector.extract_strided_slice %330 {offsets = [15, 0], sizes = [1, 64], strides = [1, 1]} : vector<16x64xf32> to vector<1x64xf32>
    %407 = vector.broadcast %406 : vector<1x64xf32> to vector<4x64xf32>
    %408 = arith.mulf %405, %407 : vector<4x64xf32>
    %409 = arith.addf %404, %408 : vector<4x64xf32>
    %cst_151 = arith.constant dense<0.000000e+00> : vector<4xf32>
    %410 = vector.multi_reduction <add>, %409, %cst_151 [1] : vector<4x64xf32> to vector<4xf32>
    %411 = vector.shape_cast %410 : vector<4xf32> to vector<4x1xf32>
    %c0_152 = arith.constant 0 : index
    %c0_153 = arith.constant 0 : index
    %412 = memref.load %arg10[%c0_152, %c0_153] : memref<1x1xf32, #tpu.memory_space<smem>>
    %413 = vector.broadcast %412 : f32 to vector<4x1xf32>
    %414 = arith.addf %411, %413 : vector<4x1xf32>
    %c0_154 = arith.constant 0 : index
    %c0_155 = arith.constant 0 : index
    %c0_156 = arith.constant 0 : index
    %415 = vector.load %arg11[%c0_154, %c0_155, %c0_156] : memref<1x4x1xf32, #tpu.memory_space<vmem>>, vector<1x4x1xf32>
    %416 = vector.shape_cast %415 : vector<1x4x1xf32> to vector<4x1xf32>
    %417 = vector.shape_cast %414 : vector<4x1xf32> to vector<1x4x1xf32>
    tpu.vector_store %arg11[%c0_154, %c0_155, %c0_156], %417 {strides = array<i32>} : memref<1x4x1xf32, #tpu.memory_space<vmem>>, vector<1x4x1xf32>,
    return
  }
  func.func @transform_0(%arg0: i32) -> (i32, i32, i32) {
    %c0_i32 = arith.constant 0 : i32
    %c0_i32_0 = arith.constant 0 : i32
    %c0_i32_1 = arith.constant 0 : i32
    return %arg0, %c0_i32, %c0_i32_0 : i32, i32, i32
  }
  func.func @transform_1(%arg0: i32) -> (i32, i32) {
    %c0_i32 = arith.constant 0 : i32
    %c0_i32_0 = arith.constant 0 : i32
    %c0_i32_1 = arith.constant 0 : i32
    return %c0_i32, %c0_i32_0 : i32, i32
  }
  func.func @transform_2(%arg0: i32) -> (i32, i32) {
    %c0_i32 = arith.constant 0 : i32
    %c0_i32_0 = arith.constant 0 : i32
    %c0_i32_1 = arith.constant 0 : i32
    return %c0_i32, %c0_i32_0 : i32, i32
  }
  func.func @transform_3(%arg0: i32) -> (i32, i32) {
    %c0_i32 = arith.constant 0 : i32
    %c0_i32_0 = arith.constant 0 : i32
    %c0_i32_1 = arith.constant 0 : i32
    return %c0_i32, %c0_i32_0 : i32, i32
  }
  func.func @transform_4(%arg0: i32) -> (i32, i32) {
    %c0_i32 = arith.constant 0 : i32
    %c0_i32_0 = arith.constant 0 : i32
    %c0_i32_1 = arith.constant 0 : i32
    return %c0_i32, %c0_i32_0 : i32, i32
  }
  func.func @transform_5(%arg0: i32) -> (i32, i32) {
    %c0_i32 = arith.constant 0 : i32
    %c0_i32_0 = arith.constant 0 : i32
    %c0_i32_1 = arith.constant 0 : i32
    return %c0_i32, %c0_i32_0 : i32, i32
  }
  func.func @transform_6(%arg0: i32) -> (i32, i32) {
    %c0_i32 = arith.constant 0 : i32
    %c0_i32_0 = arith.constant 0 : i32
    %c0_i32_1 = arith.constant 0 : i32
    return %c0_i32, %c0_i32_0 : i32, i32
  }
  func.func @transform_7(%arg0: i32) -> (i32, i32) {
    %c0_i32 = arith.constant 0 : i32
    %c0_i32_0 = arith.constant 0 : i32
    %c0_i32_1 = arith.constant 0 : i32
    return %c0_i32, %c0_i32_0 : i32, i32
  }
  func.func @transform_8(%arg0: i32) -> (i32, i32) {
    %c0_i32 = arith.constant 0 : i32
    %c0_i32_0 = arith.constant 0 : i32
    %c0_i32_1 = arith.constant 0 : i32
    return %c0_i32, %c0_i32_0 : i32, i32
  }
  func.func @transform_9(%arg0: i32) -> (i32, i32) {
    %c0_i32 = arith.constant 0 : i32
    %c0_i32_0 = arith.constant 0 : i32
    %c0_i32_1 = arith.constant 0 : i32
    return %c0_i32, %c0_i32_0 : i32, i32
  }
  func.func @transform_10(%arg0: i32) -> (i32, i32, i32) {
    %c0_i32 = arith.constant 0 : i32
    %c0_i32_0 = arith.constant 0 : i32
    %c0_i32_1 = arith.constant 0 : i32
    return %arg0, %c0_i32, %c0_i32_0 : i32, i32, i32
  }
}

</mosaic_0001>

<bundles_post_ra>
// kernel: squeeze.1
= control target key start
LH: loop header
LB: loop body
LE: loop exit
PB: predicated region body
PF: predicated region fallthrough
CT: control target
= control target key end

     0   :  { %s90_s0 = inlined_call_operand.vmem [shape: f32[2,4], index: 0, kind: input, shape index: {}]   ;;  %s91_s1 = inlined_call_operand.hbm [shape: f32[2,1,2,2], index: 1, kind: output, shape index: {}]  }
   0x1   :  { %v5_v0 = vld [vmem:[%s90_s0] sm:$0x3] }
   0x2   :  { %2 = vsyncpa [#allocation1], 0  ;;  %6 = vst [vmem:[#allocation3] sm:$0x3] %v5_v0  ;;  %vm8_vm0 = vcmask 15360   ;;  %s63_s0 = smov 126  }
   0x3   :  { %s64_s8 = smov [#allocation0]  }
   0x4   :  { %s31_s9 = sshll.u32 %s64_s8, 4  ;;  %s32_s9 = int_to_ptr.vmem [resolvable:$true] %s31_s9 }
   0x5   :  { %s39_s10 = scalar_lea.vmem %s32_s9, 64  ;;  %p44_p1 = scmp.lt.s32.totalorder %s32_s9, %s32_s9 }
   0x6   :  { %p40_p0 = scmp.ne.s32.totalorder %s32_s9, %s39_s10  ;;  %p45_p2 = scmp.lt.s32.totalorder %s39_s10, %s39_s10 }
   0x8   :  { %p46_p3 = por %p45_p2, %p44_p1 }
   0x9   :  { %v10_v1 = vld [vmem:[#allocation3] sm:$0x3]  }
   0xa   :  { %v7_v2 = vld [vmem:[#allocation3] sm:$0x3]   ;;  %11 = vrot.lane.b32.xlu0 %v10_v1, %s63_s0  ;;  %p47_p4 = pnand %p46_p3, %p40_p0 }
   0xb   :  { %9 = vst.msk [vmem:[#allocation2] ss:$8 sm:$0x3] %vm8_vm0, %v7_v2  }
  0x7c   :  { %v12_v3 = vpop.permute.xlu0 %11  }
  0x7d   :  { %15 = vst.msk [vmem:[#allocation2 + $0x1] ss:$8 sm:$0x3] %vm8_vm0, %v12_v3  }
  0x84   :  { %v19_v4 = vld [vmem:[#allocation2] sm:$0x3]  ;;  %v23_v5 = vld [vmem:[#allocation2 + $0x8] sm:$0x3] }
  0x85   :  { %21 = vst [vmem:[#allocation0] sm:$0x3] %v19_v4  ;;  %26 = vst [vmem:[#allocation0 + $0x2] sm:$0x3] %v23_v5 }
  0x86   :  { %50 = shalt.err (!%p47_p4)
}
  0x87   :  { %s51_s13 = scalar_lea.hbm %s91_s1, 64 }
  0x88   :  { %p52_p5 = scmp.ne.s32.totalorder %s91_s1, %s51_s13  ;;  %p55_p6 = scmp.lt.u32.totalorder %s51_s13, %s91_s1 }
  0x8a   :  { %p57_p7 = pnand %p55_p6, %p52_p5 }
  0x8c   :  { %60 = shalt.err (!%p57_p7)
}
  0x8d   :  { %34 = dma.vmem_to_hbm [thread:$0]  %s32_s9, 64, %s91_s1, [#allocation1]  }
  0x8e   :  { %61 = dma.done.wait [#allocation1], 64  }
  0x8f   :  { %62 = vsyncadd [#allocation1], 4294967232 }
  0x90   :  { %36 = vsyncpa [#allocation1], 1 }

// kernel: cyclegan_discriminator.1
= control target key start
LH: loop header
LB: loop body
LE: loop exit
PB: predicated region body
PF: predicated region fallthrough
CT: control target
= control target key end

     0   :  { %s8072_s15 = smov 0   ;;  %s9194_s0 = inlined_call_operand.vmem [shape: bf16[2,1024,48], index: 0, kind: input, shape index: {}]   ;;  %s9195_s1 = inlined_call_operand.vmem [shape: bf16[48,8], index: 1, kind: input, shape index: {}]   ;;  %s9196_s2 = inlined_call_operand.vmem [shape: bf16[128,16], index: 2, kind: input, shape index: {}]   ;;  %s9197_s3 = inlined_call_operand.vmem [shape: bf16[256,64], index: 3, kind: input, shape index: {}]   ;;  %s9198_s4 = inlined_call_operand.vmem [shape: bf16[256,32], index: 4, kind: input, shape index: {}]   ;;  %s9199_s5 = inlined_call_operand.vmem [shape: bf16[144,16], index: 5, kind: input, shape index: {}]   ;;  %s9200_s6 = inlined_call_operand.vmem [shape: bf16[512,64], index: 6, kind: input, shape index: {}]   ;;  %s9201_s7 = inlined_call_operand.vmem [shape: bf16[64,9], index: 7, kind: input, shape index: {}]   ;;  %s9202_s8 = inlined_call_operand.vmem [shape: f32[16,64], index: 8, kind: input, shape index: {}]   ;;  %s9203_s9 = inlined_call_operand.<no memory space> [shape: f32[1,1], index: 9, kind: input, shape index: {}]   ;;  %s9204_s10 = inlined_call_operand.vmem [shape: f32[2,4,1], index: 10, kind: output, shape index: {}]  }
   0x1   :  { %15 = sst [smem:[#allocation2]] %s9203_s9 }
   0x2 LB: > { %s6368_s16 = sadd.s32 4294967295, %s8009_s15   ;;  %p6372_p0 = scmp.ge.s32.totalorder %s8009_s15, 1  ;;  %s8009_s15 = sphi %s8072_s15, %s21_s15  }
   0x3   : > { %p313_p1 = scmp.lt.s32.totalorder %s8009_s15, 3 }
   0x5   : > { %p314_p2 = pnand %p6372_p0, %p313_p1 }
   0x6   : > { %v7853_v0 = vld [vmem:[%s9195_s1] sm:$0xff] (!%p314_p2)   ;;  %p350_p3 = scmp.lt.s32.totalorder (!%p314_p2), %s6368_s16, 1  ;;  %v7854_v1 = vld [vmem:[%s9195_s1 + $0x8] sm:$0xff] (!%p314_p2)   ;;  %vm832_vm0 = vcmask (!%p314_p2), 392192   ;;  %v7855_v2 = vld [vmem:[%s9195_s1 + $0x10] sm:$0xff] (!%p314_p2)   ;;  %vm1977_vm1 = vcmask (!%p314_p2), 1043456  }
   0x7   : > { %317 = sbr.rel (%p314_p2) target bundleno = 2560 (0xa00), region = 60  ;;  %6974 = vmatprep.subr.bf16.mxu0 (!%p314_p2), %v7853_v0  ;;  %7580 = vmatprep.subr.bf16.mxu1 (!%p314_p2), %v7853_v0  ;;  %v1963_v44 = vld [vmem:[%s9196_s2 + $0x4] sm:$0xf] (!%p314_p2)  ;;  %v8193_v50 = vld [vmem:[%s9196_s2] sm:$0xf] (!%p314_p2)  ;;  %vm1964_vm14 = vcmask (!%p314_p2), 64512  }
   0x8   : > { %6975 = vmatpush3.bf16.msra.mxu0 (!%p314_p2), %v7853_v0  ;;  %7583 = vmatpush3.bf16.msra.mxu1 (!%p314_p2), %v7853_v0  ;;  %v1979_v45 = vsel (!%p314_p2), %vm1977_vm1, %v1963_v44, 0  ;;  %s6310_s26 = sld [smem:[#allocation2]] (!%p314_p2) }
   0x9   : > { %6976 = vmatprep.subr.bf16.mxu0 (!%p314_p2), %v7854_v1  ;;  %7581 = vmatprep.subr.bf16.mxu1 (!%p314_p2), %v7854_v1 }
   0xc   : > { %6977 = vmatpush3.bf16.msra.mxu0 (!%p314_p2), %v7854_v1  ;;  %7584 = vmatpush3.bf16.msra.mxu1 (!%p314_p2), %v7854_v1 }
   0xd   : > { %6978 = vmatprep.subr.bf16.mxu0 (!%p314_p2), %v7855_v2  ;;  %7582 = vmatprep.subr.bf16.mxu1 (!%p314_p2), %v7855_v2 }
   0xe   : > { %s9206_s16 = smov (!%p350_p3, %s6368_s16), 1 }
   0xf   : > { %s6711_s22 = sshll.u32 %s9206_s16, 9  ;;  %s6375_s27 = sshll.u32 %s9206_s16, 2 }
  0x10   : > { %s8095_s25 = scalar_lea.vmem %s9194_s0, %s6711_s22  ;;  %6979 = vmatpush3.bf16.msra.mxu0 %v7855_v2  ;;  %7585 = vmatpush3.bf16.msra.mxu1 %v7855_v2  ;;  %s358_s30 = scalar_lea.vmem %s9204_s10, %s6375_s27 }
  0x11   : > { %v7856_v3 = vld [vmem:[%s8095_s25] sm:$0xff]   ;;  %v7857_v4 = vld [vmem:[%s8095_s25 + $0x8] sm:$0xff]   ;;  %v7858_v5 = vld [vmem:[%s8095_s25 + $0x10] sm:$0xff]   ;;  %7826 = vmatprep.subr.msk.bf16.mxu1 %vm1977_vm1, %v1963_v44 }
  0x12   : > { %6980 = vmatprep.mubr.msk.bf16.mxu0 %vm832_vm0, %v7856_v3  ;;  %v7859_v6 = vld [vmem:[%s8095_s25 + $0x18] sm:$0xff]   ;;  %v7860_v7 = vld [vmem:[%s8095_s25 + $0x20] sm:$0xff]   ;;  %v7861_v8 = vld [vmem:[%s8095_s25 + $0x28] sm:$0xff]  }
  0x13   : > { %6981 = vmatmul.mubr.msk.bf16.vlgmr.msra.gmra.mrb[0].mxu0 %vm832_vm0, %v7857_v4  ;;  %v7862_v9 = vld [vmem:[%s8095_s25 + $0x30] sm:$0xff]   ;;  %v7863_v10 = vld [vmem:[%s8095_s25 + $0x38] sm:$0xff]   ;;  %v7864_v11 = vld [vmem:[%s8095_s25 + $0x40] sm:$0xff]  }
  0x14   : > { %6984 = vmatprep.mubr.msk.bf16.mxu0 %vm832_vm0, %v7858_v5  ;;  %v7865_v12 = vld [vmem:[%s8095_s25 + $0x48] sm:$0xff]   ;;  %v7866_v13 = vld [vmem:[%s8095_s25 + $0x50] sm:$0xff]   ;;  %v7867_v14 = vld [vmem:[%s8095_s25 + $0x58] sm:$0xff]  }
  0x15   : > { %v7868_v15 = vld [vmem:[%s8095_s25 + $0x60] sm:$0xff]   ;;  %v7901_v17 = vld [vmem:[%s8095_s25 + $0x1a8] sm:$0xff]   ;;  %v7870_v19 = vld [vmem:[%s8095_s25 + $0x70] sm:$0xff]  }
  0x16   : > { %v7900_v16 = vld [vmem:[%s8095_s25 + $0x1a0] sm:$0xff]   ;;  %v7869_v18 = vld [vmem:[%s8095_s25 + $0x68] sm:$0xff]   ;;  %v7904_v20 = vld [vmem:[%s8095_s25 + $0x1b0] sm:$0xff]  }
  0x17   : > { %7084 = vmatprep.mubr.msk.bf16.mxu1 %vm832_vm0, %v7900_v16  ;;  %v7905_v21 = vld [vmem:[%s8095_s25 + $0x1b8] sm:$0xff]   ;;  %v7872_v23 = vld [vmem:[%s8095_s25 + $0x80] sm:$0xff]   ;;  %v7909_v25 = vld [vmem:[%s8095_s25 + $0x1c8] sm:$0xff]  }
  0x18   : > { %7085 = vmatmul.mubr.msk.bf16.vlgmr.msra.gmra.mrb[0].mxu1 %vm832_vm0, %v7901_v17  ;;  %v7871_v22 = vld [vmem:[%s8095_s25 + $0x78] sm:$0xff]   ;;  %v7908_v24 = vld [vmem:[%s8095_s25 + $0x1c0] sm:$0xff]   ;;  %v7873_v26 = vld [vmem:[%s8095_s25 + $0x88] sm:$0xff]  }
  0x19   : > { %7088 = vmatprep.mubr.msk.bf16.mxu1 %vm832_vm0, %v7904_v20  ;;  %v7874_v27 = vld [vmem:[%s8095_s25 + $0x90] sm:$0xff]   ;;  %v7913_v29 = vld [vmem:[%s8095_s25 + $0x1d8] sm:$0xff]   ;;  %v7876_v31 = vld [vmem:[%s8095_s25 + $0xa0] sm:$0xff]   ;;  %7109 = vmatpush3.bf16.msra.mxu1 %v1979_v45 }
  0x1a   : > { %v7912_v28 = vld [vmem:[%s8095_s25 + $0x1d0] sm:$0xff]   ;;  %v7875_v30 = vld [vmem:[%s8095_s25 + $0x98] sm:$0xff]   ;;  %v7877_v32 = vld [vmem:[%s8095_s25 + $0xa8] sm:$0xff]   ;;  %7827 = vmatprep.subr.msk.bf16.mxu1 %vm1977_vm1, %v8193_v50 }
  0x1b   : > { %6985 = vmatmul.mubr.msk.bf16.gmra.mrb[4].mxu0 %vm832_vm0, %v7859_v6  ;;  %v7878_v33 = vld [vmem:[%s8095_s25 + $0xb0] sm:$0xff]   ;;  %v7879_v34 = vld [vmem:[%s8095_s25 + $0xb8] sm:$0xff]   ;;  %v7880_v35 = vld [vmem:[%s8095_s25 + $0xc0] sm:$0xff]  }
  0x1c   : > { %6988 = vmatprep.mubr.msk.bf16.mxu0 %vm832_vm0, %v7860_v7  ;;  %v7916_v36 = vld [vmem:[%s8095_s25 + $0x1e0] sm:$0xff]   ;;  %v7917_v37 = vld [vmem:[%s8095_s25 + $0x1e8] sm:$0xff]   ;;  %v7882_v39 = vld [vmem:[%s8095_s25 + $0xd0] sm:$0xff]  }
  0x1d   : > { %v7881_v38 = vld [vmem:[%s8095_s25 + $0xc8] sm:$0xff]   ;;  %v7918_v40 = vld [vmem:[%s8095_s25 + $0x1f0] sm:$0xff]   ;;  %v7919_v41 = vld [vmem:[%s8095_s25 + $0x1f8] sm:$0xff]  }
  0x1e   : > { %v7883_v42 = vld [vmem:[%s8095_s25 + $0xd8] sm:$0xff]   ;;  %v7884_v43 = vld [vmem:[%s8095_s25 + $0xe0] sm:$0xff]   ;;  %v7885_v46 = vld [vmem:[%s8095_s25 + $0xe8] sm:$0xff]  }
  0x1f   : > { %v7886_v47 = vld [vmem:[%s8095_s25 + $0xf0] sm:$0xff]   ;;  %v7887_v48 = vld [vmem:[%s8095_s25 + $0xf8] sm:$0xff]   ;;  %v7888_v49 = vld [vmem:[%s8095_s25 + $0x100] sm:$0xff]  }
  0x20   : > { %7089 = vmatmul.mubr.msk.bf16.gmra.mrb[4].mxu1 %vm832_vm0, %v7905_v21  ;;  %v7889_v51 = vld [vmem:[%s8095_s25 + $0x108] sm:$0xff]   ;;  %v7890_v52 = vld [vmem:[%s8095_s25 + $0x110] sm:$0xff]   ;;  %v7891_v53 = vld [vmem:[%s8095_s25 + $0x118] sm:$0xff]  }
  0x21   : > { %7092 = vmatprep.mubr.msk.bf16.mxu1 %vm832_vm0, %v7908_v24  ;;  %v7892_v54 = vld [vmem:[%s8095_s25 + $0x120] sm:$0xff]   ;;  %v7893_v55 = vld [vmem:[%s8095_s25 + $0x128] sm:$0xff]   ;;  %v7894_v56 = vld [vmem:[%s8095_s25 + $0x130] sm:$0xff]  }
  0x22   : > { %v7895_v57 = vld [vmem:[%s8095_s25 + $0x138] sm:$0xff]   ;;  %v7896_v58 = vld [vmem:[%s8095_s25 + $0x140] sm:$0xff]   ;;  %v7897_v59 = vld [vmem:[%s8095_s25 + $0x148] sm:$0xff]  }
  0x23   : > { %6989 = vmatmul.mubr.msk.bf16.gmra.mrb[8].mxu0 %vm832_vm0, %v7861_v8  ;;  %v7898_v60 = vld [vmem:[%s8095_s25 + $0x150] sm:$0xff]   ;;  %v7899_v61 = vld [vmem:[%s8095_s25 + $0x158] sm:$0xff]   ;;  %v7902_v62 = vld [vmem:[%s8095_s25 + $0x160] sm:$0xff]  }
  0x24   : > { %6992 = vmatprep.mubr.msk.bf16.mxu0 %vm832_vm0, %v7862_v9  ;;  %v7903_v63 = vld [vmem:[%s8095_s25 + $0x168] sm:$0xff]   ;;  %v7906_v0 = vld [vmem:[%s8095_s25 + $0x170] sm:$0xff]   ;;  %v7907_v1 = vld [vmem:[%s8095_s25 + $0x178] sm:$0xff]  }
  0x25   : > { %v7910_v2 = vld [vmem:[%s8095_s25 + $0x180] sm:$0xff]   ;;  %v7911_v3 = vld [vmem:[%s8095_s25 + $0x188] sm:$0xff]   ;;  %v7914_v4 = vld [vmem:[%s8095_s25 + $0x190] sm:$0xff]  }
  0x26   : > { %v7915_v5 = vld [vmem:[%s8095_s25 + $0x198] sm:$0xff]  }
  0x28   : > { %7093 = vmatmul.mubr.msk.bf16.gmra.mrb[8].mxu1 %vm832_vm0, %v7909_v25 }
  0x29   : > { %7096 = vmatprep.mubr.msk.bf16.mxu1 %vm832_vm0, %v7912_v28 }
  0x2b   : > { %6993 = vmatmul.mubr.msk.bf16.gmra.mrb[12].mxu0 %vm832_vm0, %v7863_v10 }
  0x2c   : > { %6996 = vmatprep.mubr.msk.bf16.mxu0 %vm832_vm0, %v7864_v11 }
  0x30   : > { %7097 = vmatmul.mubr.msk.bf16.gmra.mrb[12].mxu1 %vm832_vm0, %v7913_v29 }
  0x31   : > { %7100 = vmatprep.mubr.msk.bf16.mxu1 %vm832_vm0, %v7916_v36 }
  0x33   : > { %6997 = vmatmul.mubr.msk.bf16.gmra.mrb[16].mxu0 %vm832_vm0, %v7865_v12 }
  0x34   : > { %7000 = vmatprep.mubr.msk.bf16.mxu0 %vm832_vm0, %v7866_v13 }
  0x38   : > { %7101 = vmatmul.mubr.msk.bf16.gmra.mrb[16].mxu1 %vm832_vm0, %v7917_v37 }
  0x39   : > { %7104 = vmatprep.mubr.msk.bf16.mxu1 %vm832_vm0, %v7918_v40 }
  0x3b   : > { %7001 = vmatmul.mubr.msk.bf16.gmra.mrb[20].mxu0 %vm832_vm0, %v7867_v14 }
  0x3c   : > { %7004 = vmatprep.mubr.msk.bf16.mxu0 %vm832_vm0, %v7868_v15 }
  0x40   : > { %7105 = vmatmul.mubr.msk.bf16.gmra.mrb[20].mxu1 %vm832_vm0, %v7919_v41 }
  0x43   : > { %7005 = vmatmul.mubr.msk.bf16.gmra.mrb[24].mxu0 %vm832_vm0, %v7869_v18 }
  0x44   : > { %7008 = vmatprep.mubr.msk.bf16.mxu0 %vm832_vm0, %v7870_v19 }
  0x4b   : > { %7009 = vmatmul.mubr.msk.bf16.gmra.mrb[28].mxu0 %vm832_vm0, %v7871_v22 }
  0x4c   : > { %7012 = vmatprep.mubr.msk.bf16.mxu0 %vm832_vm0, %v7872_v23 }
  0x53   : > { %7013 = vmatmul.mubr.msk.bf16.gmra.mrb[32].mxu0 %vm832_vm0, %v7873_v26 }
  0x54   : > { %7016 = vmatprep.mubr.msk.bf16.mxu0 %vm832_vm0, %v7874_v27 }
  0x5b   : > { %7017 = vmatmul.mubr.msk.bf16.gmra.mrb[36].mxu0 %vm832_vm0, %v7875_v30 }
  0x5c   : > { %7020 = vmatprep.mubr.msk.bf16.mxu0 %vm832_vm0, %v7876_v31 }
  0x63   : > { %7021 = vmatmul.mubr.msk.bf16.gmra.mrb[40].mxu0 %vm832_vm0, %v7877_v32 }
  0x64   : > { %7024 = vmatprep.mubr.msk.bf16.mxu0 %vm832_vm0, %v7878_v33 }
  0x6b   : > { %7025 = vmatmul.mubr.msk.bf16.gmra.mrb[44].mxu0 %vm832_vm0, %v7879_v34 }
  0x6c   : > { %7028 = vmatprep.mubr.msk.bf16.mxu0 %vm832_vm0, %v7880_v35 }
  0x73   : > { %7029 = vmatmul.mubr.msk.bf16.gmra.mrb[48].mxu0 %vm832_vm0, %v7881_v38 }
  0x74   : > { %7032 = vmatprep.mubr.msk.bf16.mxu0 %vm832_vm0, %v7882_v39 }
  0x7b   : > { %7033 = vmatmul.mubr.msk.bf16.gmra.mrb[52].mxu0 %vm832_vm0, %v7883_v42 }
  0x7c   : > { %7036 = vmatprep.mubr.msk.bf16.mxu0 %vm832_vm0, %v7884_v43 }
  0x83   : > { %7037 = vmatmul.mubr.msk.bf16.gmra.mrb[56].mxu0 %vm832_vm0, %v7885_v46 }
  0x84   : > { %7040 = vmatprep.mubr.msk.bf16.mxu0 %vm832_vm0, %v7886_v47 }
  0x8b   : > { %7041 = vmatmul.mubr.msk.bf16.gmra.mrb[60].mxu0 %vm832_vm0, %v7887_v48 }
  0x8c   : > { %7044 = vmatprep.mubr.msk.bf16.mxu0 %vm832_vm0, %v7888_v49  ;;  %v2059_v49 = vsel %vm1977_vm1, %v8193_v50, 0 }
  0x93   : > { %7045 = vmatmul.mubr.msk.bf16.gmra.mrb[64].mxu0 %vm832_vm0, %v7889_v51 }
  0x94   : > { %7048 = vmatprep.mubr.msk.bf16.mxu0 %vm832_vm0, %v7890_v52 }
  0x9b   : > { %7049 = vmatmul.mubr.msk.bf16.gmra.mrb[68].mxu0 %vm832_vm0, %v7891_v53  ;;  %v2130_v53 = vld [vmem:[%s9196_s2 + $0x8] sm:$0xf] }
  0x9c   : > { %7052 = vmatprep.mubr.msk.bf16.mxu0 %vm832_vm0, %v7892_v54 }
  0xa3   : > { %7053 = vmatmul.mubr.msk.bf16.gmra.mrb[72].mxu0 %vm832_vm0, %v7893_v55 }
  0xa4   : > { %7056 = vmatprep.mubr.msk.bf16.mxu0 %vm832_vm0, %v7894_v56 }
  0xab   : > { %7057 = vmatmul.mubr.msk.bf16.gmra.mrb[76].mxu0 %vm832_vm0, %v7895_v57 }
  0xac   : > { %7060 = vmatprep.mubr.msk.bf16.mxu0 %vm832_vm0, %v7896_v58 }
  0xb3   : > { %7061 = vmatmul.mubr.msk.bf16.gmra.mrb[80].mxu0 %vm832_vm0, %v7897_v59 }
  0xb4   : > { %7064 = vmatprep.mubr.msk.bf16.mxu0 %vm832_vm0, %v7898_v60 }
  0xbb   : > { %7065 = vmatmul.mubr.msk.bf16.gmra.mrb[84].mxu0 %vm832_vm0, %v7899_v61 }
  0xbc   : > { %7068 = vmatprep.mubr.msk.bf16.mxu0 %vm832_vm0, %v7902_v62 }
  0xc3   : > { %7069 = vmatmul.mubr.msk.bf16.gmra.mrb[88].mxu0 %vm832_vm0, %v7903_v63 }
  0xc4   : > { %7072 = vmatprep.mubr.msk.bf16.mxu0 %vm832_vm0, %v7906_v0 }
  0xcb   : > { %7073 = vmatmul.mubr.msk.bf16.gmra.mrb[92].mxu0 %vm832_vm0, %v7907_v1 }
  0xcc   : > { %7076 = vmatprep.mubr.msk.bf16.mxu0 %vm832_vm0, %v7910_v2 }
  0xd3   : > { %7077 = vmatmul.mubr.msk.bf16.gmra.mrb[96].mxu0 %vm832_vm0, %v7911_v3 }
  0xd4   : > { %7080 = vmatprep.mubr.msk.bf16.mxu0 %vm832_vm0, %v7914_v4 }
  0xdb   : > { %7081 = vmatmul.mubr.msk.bf16.gmra.mrb[100].mxu0 %vm832_vm0, %v7915_v5 }
  0xe6   : > { %v6982_v6 = vpop.f32.mrb[0].mxu0 }
  0xe7   : > { %v1700_v7 = vmul.f32 0.2, %v6982_v6  ;;  %v1059_v8 = vpop.f32.mrb[1].mxu0  ;;  %vm1572_vm2 = vcmp.gt.f32.partialorder %v6982_v6, 0.0 }
  0xe8   : > { %v1698_v9 = vmul.f32 0.2, %v1059_v8  ;;  %v6983_v10 = vpop.f32.mrb[2].mxu0  ;;  %vm1570_vm3 = vcmp.gt.f32.partialorder %v1059_v8, 0.0 }
  0xe9   : > { %vm1573_vm4 = vcmp.gt.f32.partialorder %v6983_v10, 0.0  ;;  %v1701_v11 = vmul.f32 0.2, %v6983_v10  ;;  %v1062_v12 = vpop.f32.mrb[3].mxu0  ;;  %v8237_v14 = vsel %vm1572_vm2, %v6982_v6, %v1700_v7 }
  0xea   : > { %vm1571_vm5 = vcmp.gt.f32.partialorder %v1062_v12, 0.0  ;;  %v1699_v13 = vmul.f32 0.2, %v1062_v12  ;;  %v8241_v16 = vsel %vm1570_vm3, %v1059_v8, %v1698_v9 }
  0xeb   : > { %v8239_v15 = vsel %vm1573_vm4, %v6983_v10, %v1701_v11 }
  0xec   : > { %v1955_v17 = vpack.c.bf16 %v8239_v15, %v8237_v14  ;;  %v8245_v18 = vsel %vm1571_vm5, %v1062_v12, %v1699_v13 }
  0xed   : > { %v1954_v19 = vpack.c.bf16 %v8245_v18, %v8241_v16  ;;  %v2144_v16 = vsel %vm1977_vm1, %v2130_v53, 0 }
  0xee   : > { %v6986_v20 = vpop.f32.mrb[4].mxu0 }
  0xef   : > { %v1704_v21 = vmul.f32 0.2, %v6986_v20  ;;  %v1075_v22 = vpop.f32.mrb[5].mxu0  ;;  %vm1576_vm6 = vcmp.gt.f32.partialorder %v6986_v20, 0.0 }
  0xf0   : > { %v1702_v23 = vmul.f32 0.2, %v1075_v22  ;;  %v6987_v24 = vpop.f32.mrb[6].mxu0  ;;  %vm1574_vm7 = vcmp.gt.f32.partialorder %v1075_v22, 0.0 }
  0xf1   : > { %vm1577_vm8 = vcmp.gt.f32.partialorder %v6987_v24, 0.0  ;;  %v1705_v25 = vmul.f32 0.2, %v6987_v24  ;;  %v1078_v26 = vpop.f32.mrb[7].mxu0  ;;  %v8249_v28 = vsel %vm1576_vm6, %v6986_v20, %v1704_v21  ;;  %v2223_v21 = vld [vmem:[%s9196_s2 + $0xc] sm:$0xf] }
  0xf2   : > { %vm1575_vm9 = vcmp.gt.f32.partialorder %v1078_v26, 0.0  ;;  %v1703_v27 = vmul.f32 0.2, %v1078_v26  ;;  %v8253_v30 = vsel %vm1574_vm7, %v1075_v22, %v1702_v23 }
  0xf3   : > { %v8251_v29 = vsel %vm1577_vm8, %v6987_v24, %v1705_v25 }
  0xf4   : > { %v1957_v31 = vpack.c.bf16 %v8251_v29, %v8249_v28  ;;  %v8257_v32 = vsel %vm1575_vm9, %v1078_v26, %v1703_v27 }
  0xf5   : > { %v1956_v33 = vpack.c.bf16 %v8257_v32, %v8253_v30 }
  0xf6   : > { %v6990_v34 = vpop.f32.mrb[8].mxu0 }
  0xf7   : > { %v1708_v35 = vmul.f32 0.2, %v6990_v34  ;;  %v1091_v36 = vpop.f32.mrb[9].mxu0  ;;  %vm1580_vm10 = vcmp.gt.f32.partialorder %v6990_v34, 0.0 }
  0xf8   : > { %v1706_v37 = vmul.f32 0.2, %v1091_v36  ;;  %v6991_v38 = vpop.f32.mrb[10].mxu0  ;;  %vm1578_vm11 = vcmp.gt.f32.partialorder %v1091_v36, 0.0 }
  0xf9   : > { %vm1581_vm12 = vcmp.gt.f32.partialorder %v6991_v38, 0.0  ;;  %v1709_v39 = vmul.f32 0.2, %v6991_v38  ;;  %v1094_v40 = vpop.f32.mrb[11].mxu0  ;;  %v1836_v42 = vsel %vm1580_vm10, %v6990_v34, %v1708_v35 }
  0xfa   : > { %vm1579_vm13 = vcmp.gt.f32.partialorder %v1094_v40, 0.0  ;;  %v1707_v41 = vmul.f32 0.2, %v1094_v40  ;;  %v1834_v44 = vsel %vm1578_vm11, %v1091_v36, %v1706_v37 }
  0xfb   : > { %v1837_v43 = vsel %vm1581_vm12, %v6991_v38, %v1709_v39 }
  0xfc   : > { %v1960_v45 = vpack.c.bf16 %v1837_v43, %v1836_v42  ;;  %v1835_v46 = vsel %vm1579_vm13, %v1094_v40, %v1707_v41  ;;  %v7086_v43 = vpop.f32.mrb[0].mxu1 }
  0xfd   : > { %v1959_v47 = vpack.c.bf16 %v1835_v46, %v1834_v44  ;;  %v1804_v28 = vmul.f32 0.2, %v7086_v43  ;;  %v1475_v29 = vpop.f32.mrb[1].mxu1 }
  0xfe   : > { %v6994_v48 = vpop.f32.mrb[12].mxu0  ;;  %v1802_v46 = vmul.f32 0.2, %v1475_v29 }
  0xff   : > { %v1712_v51 = vmul.f32 0.2, %v6994_v48  ;;  %v1107_v52 = vpop.f32.mrb[13].mxu0  ;;  %7110 = vmatprep.mubr.msk.bf16.mxu1 %vm1964_vm14, %v1959_v47  ;;  %vm1584_vm15 = vcmp.gt.f32.partialorder %v6994_v48, 0.0  ;;  %v7087_v47 = vpop.f32.mrb[2].mxu1 }
 0x100   : > { %v1710_v54 = vmul.f32 0.2, %v1107_v52  ;;  %v6995_v55 = vpop.f32.mrb[14].mxu0  ;;  %7111 = vmatmul.mubr.msk.bf16.vlgmr.msra.gmra.mrb[24].mxu1 %vm1964_vm14, %v1960_v45  ;;  %vm1582_vm0 = vcmp.gt.f32.partialorder %v1107_v52, 0.0 }
 0x101   : > { %vm1585_vm2 = vcmp.gt.f32.partialorder %v6995_v55, 0.0  ;;  %v1713_v56 = vmul.f32 0.2, %v6995_v55  ;;  %v1110_v57 = vpop.f32.mrb[15].mxu0  ;;  %7119 = vmatpush3.bf16.msra.mxu1 %v2059_v49  ;;  %v1840_v58 = vsel %vm1584_vm15, %v6994_v48, %v1712_v51  ;;  %v1805_v51 = vmul.f32 0.2, %v7087_v47 }
 0x102   : > { %vm1583_vm3 = vcmp.gt.f32.partialorder %v1110_v57, 0.0  ;;  %v1711_v50 = vmul.f32 0.2, %v1110_v57  ;;  %7828 = vmatprep.subr.msk.bf16.mxu1 %vm1977_vm1, %v2130_v53  ;;  %v1838_v60 = vsel %vm1582_vm0, %v1107_v52, %v1710_v54  ;;  %v2237_v53 = vsel %vm1977_vm1, %v2223_v21, 0 }
 0x103   : > { %v1841_v59 = vsel %vm1585_vm2, %v6995_v55, %v1713_v56  ;;  %vm1676_vm2 = vcmp.gt.f32.partialorder %v7086_v43, 0.0  ;;  %v8320_v56 = vld [vmem:[%s9196_s2 + $0x10] sm:$0xf] }
 0x104   : > { %v1962_v61 = vpack.c.bf16 %v1841_v59, %v1840_v58  ;;  %v1839_v62 = vsel %vm1583_vm3, %v1110_v57, %v1711_v50  ;;  %vm1674_vm3 = vcmp.gt.f32.partialorder %v1475_v29, 0.0  ;;  %v8314_v49 = vsel %vm1676_vm2, %v7086_v43, %v1804_v28 }
 0x105   : > { %v1961_v63 = vpack.c.bf16 %v1839_v62, %v1838_v60  ;;  %v8329_v59 = vsel %vm1674_vm3, %v1475_v29, %v1802_v46  ;;  %v2330_v46 = vsel %vm1977_vm1, %v8320_v56, 0 }
 0x106   : > { %v6998_v0 = vpop.f32.mrb[16].mxu0 }
 0x107   : > { %7114 = vmatprep.mubr.msk.bf16.mxu1 %vm1964_vm14, %v1961_v63  ;;  %vm1588_vm4 = vcmp.gt.f32.partialorder %v6998_v0, 0.0  ;;  %v1716_v1 = vmul.f32 0.2, %v6998_v0  ;;  %v1123_v2 = vpop.f32.mrb[17].mxu0 }
 0x108   : > { %7115 = vmatmul.mubr.msk.bf16.gmra.mrb[28].mxu1 %vm1964_vm14, %v1962_v61  ;;  %vm1586_vm5 = vcmp.gt.f32.partialorder %v1123_v2, 0.0  ;;  %v1714_v3 = vmul.f32 0.2, %v1123_v2  ;;  %v6999_v4 = vpop.f32.mrb[18].mxu0  ;;  %v1478_v61 = vpop.f32.mrb[3].mxu1 }
 0x109   : > { %7120 = vmatprep.mubr.msk.bf16.mxu1 %vm1964_vm14, %v1954_v19  ;;  %v8275_v5 = vsel %vm1588_vm4, %v6998_v0, %v1716_v1  ;;  %vm1589_vm6 = vcmp.gt.f32.partialorder %v6999_v4, 0.0  ;;  %v1717_v6 = vmul.f32 0.2, %v6999_v4  ;;  %v1126_v7 = vpop.f32.mrb[19].mxu0  ;;  %vm1677_vm4 = vcmp.gt.f32.partialorder %v7087_v47, 0.0  ;;  %v7090_v1 = vpop.f32.mrb[4].mxu1 }
 0x10a   : > { %v1842_v8 = vsel %vm1586_vm5, %v1123_v2, %v1714_v3  ;;  %vm1587_vm7 = vcmp.gt.f32.partialorder %v1126_v7, 0.0  ;;  %v1715_v9 = vmul.f32 0.2, %v1126_v7  ;;  %v8322_v57 = vsel %vm1677_vm4, %v7087_v47, %v1805_v51 }
 0x10b   : > { %v8277_v10 = vsel %vm1589_vm6, %v6999_v4, %v1717_v6  ;;  %v3150_v60 = vpack.c.bf16 %v8322_v57, %v8314_v49  ;;  %v1803_v4 = vmul.f32 0.2, %v1478_v61  ;;  %v7920_v57 = vld [vmem:[%s9197_s3] sm:$0xff]  }
 0x10c   : > { %v2127_v11 = vpack.c.bf16 %v8277_v10, %v8275_v5  ;;  %v1843_v12 = vsel %vm1587_vm7, %v1126_v7, %v1715_v9  ;;  %v1491_v5 = vpop.f32.mrb[5].mxu1  ;;  %v1808_v7 = vmul.f32 0.2, %v7090_v1 }
 0x10d   : > { %v2126_v13 = vpack.c.bf16 %v1843_v12, %v1842_v8  ;;  %v7091_v8 = vpop.f32.mrb[6].mxu1 }
 0x10e   : > { %v7002_v20 = vpop.f32.mrb[20].mxu0 }
 0x10f   : > { %vm1592_vm8 = vcmp.gt.f32.partialorder %v7002_v20, 0.0  ;;  %v1720_v18 = vmul.f32 0.2, %v7002_v20  ;;  %v1139_v19 = vpop.f32.mrb[21].mxu0 }
 0x110   : > { %7121 = vmatmul.mubr.msk.bf16.vlgmr.msra.gmra.mrb[24].mxu1 %vm1964_vm14, %v1955_v17  ;;  %vm1590_vm9 = vcmp.gt.f32.partialorder %v1139_v19, 0.0  ;;  %v1718_v22 = vmul.f32 0.2, %v1139_v19  ;;  %v7003_v23 = vpop.f32.mrb[22].mxu0 }
 0x111   : > { %7124 = vmatprep.mubr.msk.bf16.mxu1 %vm1964_vm14, %v1956_v33  ;;  %v8293_v24 = vsel %vm1592_vm8, %v7002_v20, %v1720_v18  ;;  %vm1593_vm10 = vcmp.gt.f32.partialorder %v7003_v23, 0.0  ;;  %v1721_v25 = vmul.f32 0.2, %v7003_v23  ;;  %v1142_v26 = vpop.f32.mrb[23].mxu0  ;;  %7129 = vmatpush3.bf16.msra.mxu1 %v2144_v16  ;;  %vm1675_vm8 = vcmp.gt.f32.partialorder %v1478_v61, 0.0 }
 0x112   : > { %v1846_v27 = vsel %vm1590_vm9, %v1139_v19, %v1718_v22  ;;  %vm1591_vm11 = vcmp.gt.f32.partialorder %v1142_v26, 0.0  ;;  %v1719_v34 = vmul.f32 0.2, %v1142_v26  ;;  %7829 = vmatprep.subr.msk.bf16.mxu1 %vm1977_vm1, %v2223_v21  ;;  %v1809_v18 = vmul.f32 0.2, %v7091_v8 }
 0x113   : > { %v8296_v14 = vsel %vm1593_vm10, %v7003_v23, %v1721_v25  ;;  %vm1680_vm10 = vcmp.gt.f32.partialorder %v7090_v1, 0.0  ;;  %v1806_v22 = vmul.f32 0.2, %v1491_v5 }
 0x114   : > { %v2129_v15 = vpack.c.bf16 %v8296_v14, %v8293_v24  ;;  %v1847_v17 = vsel %vm1591_vm11, %v1142_v26, %v1719_v34  ;;  %vm1681_vm11 = vcmp.gt.f32.partialorder %v7091_v8, 0.0  ;;  %v8349_v16 = vsel %vm1680_vm10, %v7090_v1, %v1808_v7 }
 0x115   : > { %v2128_v30 = vpack.c.bf16 %v1847_v17, %v1846_v27  ;;  %v8355_v26 = vsel %vm1681_vm11, %v7091_v8, %v1809_v18  ;;  %v1494_v27 = vpop.f32.mrb[7].mxu1 }
 0x116   : > { %v7006_v32 = vpop.f32.mrb[24].mxu0  ;;  %vm1679_vm3 = vcmp.gt.f32.partialorder %v1494_v27, 0.0 }
 0x117   : > { %vm1596_vm12 = vcmp.gt.f32.partialorder %v7006_v32, 0.0  ;;  %v1724_v33 = vmul.f32 0.2, %v7006_v32  ;;  %v1155_v35 = vpop.f32.mrb[25].mxu0 }
 0x118   : > { %7125 = vmatmul.mubr.msk.bf16.gmra.mrb[28].mxu1 %vm1964_vm14, %v1957_v31  ;;  %vm1594_vm13 = vcmp.gt.f32.partialorder %v1155_v35, 0.0  ;;  %v1722_v36 = vmul.f32 0.2, %v1155_v35  ;;  %v7007_v37 = vpop.f32.mrb[26].mxu0 }
 0x119   : > { %7130 = vmatprep.mubr.msk.bf16.mxu1 %vm1964_vm14, %v2126_v13  ;;  %v8305_v38 = vsel %vm1596_vm12, %v7006_v32, %v1724_v33  ;;  %vm1597_vm15 = vcmp.gt.f32.partialorder %v7007_v37, 0.0  ;;  %v1725_v39 = vmul.f32 0.2, %v7007_v37  ;;  %v1158_v40 = vpop.f32.mrb[27].mxu0  ;;  %v3152_v32 = vpack.c.bf16 %v8355_v26, %v8349_v16 }
 0x11a   : > { %v8307_v41 = vsel %vm1594_vm13, %v1155_v35, %v1722_v36  ;;  %vm1595_vm0 = vcmp.gt.f32.partialorder %v1158_v40, 0.0  ;;  %v1723_v42 = vmul.f32 0.2, %v1158_v40  ;;  %v1807_v36 = vmul.f32 0.2, %v1494_v27 }
 0x11b   : > { %v8309_v44 = vsel %vm1597_vm15, %v7007_v37, %v1725_v39  ;;  %vm1678_vm15 = vcmp.gt.f32.partialorder %v1491_v5, 0.0 }
 0x11c   : > { %v2220_v31 = vpack.c.bf16 %v8309_v44, %v8305_v38  ;;  %v1851_v45 = vsel %vm1595_vm0, %v1158_v40, %v1723_v42  ;;  %v8366_v35 = vsel %vm1678_vm15, %v1491_v5, %v1806_v22  ;;  %v8374_v28 = vsel %vm1679_vm3, %v1494_v27, %v1807_v36 }
 0x11d   : > { %v2219_v48 = vpack.c.bf16 %v1851_v45, %v8307_v41  ;;  %v3151_v47 = vpack.c.bf16 %v8374_v28, %v8366_v35 }
 0x11e   : > { %v7010_v52 = vpop.f32.mrb[28].mxu0 }
 0x11f   : > { %vm1600_vm5 = vcmp.gt.f32.partialorder %v7010_v52, 0.0  ;;  %v1728_v54 = vmul.f32 0.2, %v7010_v52  ;;  %v1171_v55 = vpop.f32.mrb[29].mxu0 }
 0x120   : > { %7131 = vmatmul.mubr.msk.bf16.vlgmr.msra.gmra.mrb[24].mxu1 %vm1964_vm14, %v2127_v11  ;;  %vm1598_vm6 = vcmp.gt.f32.partialorder %v1171_v55, 0.0  ;;  %v1726_v50 = vmul.f32 0.2, %v1171_v55  ;;  %v7011_v58 = vpop.f32.mrb[30].mxu0  ;;  %v8344_v11 = vsel %vm1675_vm8, %v1478_v61, %v1803_v4 }
 0x121   : > { %7134 = vmatprep.mubr.msk.bf16.mxu1 %vm1964_vm14, %v2128_v30  ;;  %v8334_v62 = vsel %vm1600_vm5, %v7010_v52, %v1728_v54  ;;  %vm1601_vm7 = vcmp.gt.f32.partialorder %v7011_v58, 0.0  ;;  %v1729_v63 = vmul.f32 0.2, %v7011_v58  ;;  %v1174_v0 = vpop.f32.mrb[31].mxu0  ;;  %7139 = vmatpush3.bf16.msra.mxu1 %v2237_v53  ;;  %v3149_v13 = vpack.c.bf16 %v8344_v11, %v8329_v59  ;;  %v8385_v54 = vld [vmem:[%s9196_s2 + $0x14] sm:$0xf] }
 0x122   : > { %v8336_v2 = vsel %vm1598_vm6, %v1171_v55, %v1726_v50  ;;  %vm1599_vm9 = vcmp.gt.f32.partialorder %v1174_v0, 0.0  ;;  %v1727_v3 = vmul.f32 0.2, %v1174_v0  ;;  %7830 = vmatprep.subr.msk.bf16.mxu1 %vm1977_vm1, %v8320_v56  ;;  %v7928_v59 = vld [vmem:[%s9198_s4 + $0x8] sm:$0xff]   ;;  %v8011_v11 = vmov 0.0  }
 0x123   : > { %v8340_v6 = vsel %vm1601_vm7, %v7011_v58, %v1729_v63  ;;  %7308 = vmatprep.subr.bf16.mxu0 %v8011_v11 }
 0x124   : > { %v2222_v9 = vpack.c.bf16 %v8340_v6, %v8334_v62  ;;  %v1855_v10 = vsel %vm1599_vm9, %v1174_v0, %v1727_v3  ;;  %7309 = vmatpush3.bf16.msra.mxu0 %v7928_v59 }
 0x125   : > { %v2221_v12 = vpack.c.bf16 %v1855_v10, %v8336_v2  ;;  %7314 = vmatprep.subr.bf16.mxu0 %v8011_v11 }
 0x126   : > { %v7014_v20 = vpop.f32.mrb[32].mxu0 }
 0x127   : > { %vm1604_vm12 = vcmp.gt.f32.partialorder %v7014_v20, 0.0  ;;  %v1732_v19 = vmul.f32 0.2, %v7014_v20  ;;  %v1187_v21 = vpop.f32.mrb[33].mxu0 }
 0x128   : > { %7135 = vmatmul.mubr.msk.bf16.gmra.mrb[28].mxu1 %vm1964_vm14, %v2129_v15  ;;  %vm1602_vm13 = vcmp.gt.f32.partialorder %v1187_v21, 0.0  ;;  %v1730_v23 = vmul.f32 0.2, %v1187_v21  ;;  %v7015_v25 = vpop.f32.mrb[34].mxu0  ;;  %v7094_v15 = vpop.f32.mrb[8].mxu1 }
 0x129   : > { %7140 = vmatprep.mubr.msk.bf16.mxu1 %vm1964_vm14, %v2219_v48  ;;  %v8358_v34 = vsel %vm1604_vm12, %v7014_v20, %v1732_v19  ;;  %vm1605_vm0 = vcmp.gt.f32.partialorder %v7015_v25, 0.0  ;;  %v1733_v17 = vmul.f32 0.2, %v7015_v25  ;;  %v1190_v30 = vpop.f32.mrb[35].mxu0  ;;  %vm1684_vm4 = vcmp.gt.f32.partialorder %v7094_v15, 0.0  ;;  %v1507_v37 = vpop.f32.mrb[9].mxu1 }
 0x12a   : > { %v8362_v24 = vsel %vm1602_vm13, %v1187_v21, %v1730_v23  ;;  %vm1603_vm2 = vcmp.gt.f32.partialorder %v1190_v30, 0.0  ;;  %v1731_v14 = vmul.f32 0.2, %v1190_v30  ;;  %v1812_v41 = vmul.f32 0.2, %v7094_v15  ;;  %v7095_v42 = vpop.f32.mrb[10].mxu1 }
 0x12b   : > { %v8364_v33 = vsel %vm1605_vm0, %v7015_v25, %v1733_v17  ;;  %vm1682_vm5 = vcmp.gt.f32.partialorder %v1507_v37, 0.0  ;;  %v1810_v29 = vmul.f32 0.2, %v1507_v37  ;;  %vm1685_vm6 = vcmp.gt.f32.partialorder %v7095_v42, 0.0  ;;  %v1510_v61 = vpop.f32.mrb[11].mxu1 }
 0x12c   : > { %v2313_v39 = vpack.c.bf16 %v8364_v33, %v8358_v34  ;;  %v8370_v40 = vsel %vm1603_vm2, %v1190_v30, %v1731_v14  ;;  %v8380_v48 = vsel %vm1684_vm4, %v7094_v15, %v1812_v41  ;;  %v1813_v51 = vmul.f32 0.2, %v7095_v42  ;;  %v7098_v44 = vpop.f32.mrb[12].mxu1 }
 0x12d   : > { %v2312_v43 = vpack.c.bf16 %v8370_v40, %v8362_v24  ;;  %v8392_v50 = vsel %vm1682_vm5, %v1507_v37, %v1810_v29  ;;  %vm1683_vm11 = vcmp.gt.f32.partialorder %v1510_v61, 0.0  ;;  %v1523_v3 = vpop.f32.mrb[13].mxu1  ;;  %v1811_v5 = vmul.f32 0.2, %v1510_v61 }
 0x12e   : > { %v7018_v45 = vpop.f32.mrb[36].mxu0  ;;  %v8394_v58 = vsel %vm1685_vm6, %v7095_v42, %v1813_v51  ;;  %vm1688_vm12 = vcmp.gt.f32.partialorder %v7098_v44, 0.0  ;;  %v1816_v7 = vmul.f32 0.2, %v7098_v44  ;;  %v7099_v8 = vpop.f32.mrb[14].mxu1  ;;  %vm1686_vm2 = vcmp.gt.f32.partialorder %v1523_v3, 0.0 }
 0x12f   : > { %vm1608_vm7 = vcmp.gt.f32.partialorder %v7018_v45, 0.0  ;;  %v1736_v52 = vmul.f32 0.2, %v7018_v45  ;;  %v1203_v53 = vpop.f32.mrb[37].mxu0  ;;  %v3243_v38 = vpack.c.bf16 %v8394_v58, %v8380_v48  ;;  %v8410_v18 = vsel %vm1683_vm11, %v1510_v61, %v1811_v5  ;;  %v1526_v15 = vpop.f32.mrb[15].mxu1 }
 0x130   : > { %7141 = vmatmul.mubr.msk.bf16.vlgmr.msra.gmra.mrb[24].mxu1 %vm1964_vm14, %v2220_v31  ;;  %vm1606_vm8 = vcmp.gt.f32.partialorder %v1203_v53, 0.0  ;;  %v1734_v55 = vmul.f32 0.2, %v1203_v53  ;;  %v7019_v56 = vpop.f32.mrb[38].mxu0  ;;  %vm1689_vm13 = vcmp.gt.f32.partialorder %v7099_v8, 0.0  ;;  %v3242_v21 = vpack.c.bf16 %v8410_v18, %v8392_v50  ;;  %v7102_v61 = vpop.f32.mrb[16].mxu1 }
 0x131   : > { %7144 = vmatprep.mubr.msk.bf16.mxu1 %vm1964_vm14, %v2221_v12  ;;  %v8397_v63 = vsel %vm1608_vm7, %v7018_v45, %v1736_v52  ;;  %vm1609_vm9 = vcmp.gt.f32.partialorder %v7019_v56, 0.0  ;;  %v1737_v0 = vmul.f32 0.2, %v7019_v56  ;;  %v1206_v1 = vpop.f32.mrb[39].mxu0  ;;  %7149 = vmatpush3.bf16.msra.mxu1 %v2330_v46  ;;  %v8414_v22 = vsel %vm1688_vm12, %v7098_v44, %v1816_v7  ;;  %v1539_v44 = vpop.f32.mrb[17].mxu1 }
 0x132   : > { %v8401_v31 = vsel %vm1606_vm8, %v1203_v53, %v1734_v55  ;;  %vm1607_vm10 = vcmp.gt.f32.partialorder %v1206_v1, 0.0  ;;  %v1735_v2 = vmul.f32 0.2, %v1206_v1  ;;  %7831 = vmatprep.subr.msk.bf16.mxu1 %vm1977_vm1, %v8385_v54  ;;  %v1817_v23 = vmul.f32 0.2, %v7099_v8 }
 0x133   : > { %v8405_v4 = vsel %vm1609_vm9, %v7019_v56, %v1737_v0  ;;  %v1814_v17 = vmul.f32 0.2, %v1523_v3  ;;  %vm1687_vm5 = vcmp.gt.f32.partialorder %v1526_v15, 0.0  ;;  %v1815_v29 = vmul.f32 0.2, %v1526_v15 }
 0x134   : > { %v2315_v10 = vpack.c.bf16 %v8405_v4, %v8397_v63  ;;  %v1863_v12 = vsel %vm1607_vm10, %v1206_v1, %v1735_v2  ;;  %v8420_v14 = vsel %vm1689_vm13, %v7099_v8, %v1817_v23  ;;  %v2423_v53 = vsel %vm1977_vm1, %v8385_v54, 0  ;;  %v8443_v55 = vld [vmem:[%s9196_s2 + $0x18] sm:$0xf]  ;;  %v7103_v8 = vpop.f32.mrb[18].mxu1 }
 0x135   : > { %v2314_v20 = vpack.c.bf16 %v1863_v12, %v8401_v31  ;;  %v3245_v41 = vpack.c.bf16 %v8420_v14, %v8414_v22  ;;  %v8431_v42 = vsel %vm1686_vm2, %v1523_v3, %v1814_v17  ;;  %v8436_v51 = vsel %vm1687_vm5, %v1526_v15, %v1815_v29 }
 0x136   : > { %v7022_v19 = vpop.f32.mrb[40].mxu0  ;;  %v3244_v56 = vpack.c.bf16 %v8436_v51, %v8431_v42  ;;  %vm1692_vm7 = vcmp.gt.f32.partialorder %v7102_v61, 0.0  ;;  %v1820_v2 = vmul.f32 0.2, %v7102_v61  ;;  %vm1690_vm10 = vcmp.gt.f32.partialorder %v1539_v44, 0.0 }
 0x137   : > { %vm1612_vm15 = vcmp.gt.f32.partialorder %v7022_v19, 0.0  ;;  %v1740_v25 = vmul.f32 0.2, %v7022_v19  ;;  %v1219_v27 = vpop.f32.mrb[41].mxu0  ;;  %vm1693_vm12 = vcmp.gt.f32.partialorder %v7103_v8, 0.0 }
 0x138   : > { %7145 = vmatmul.mubr.msk.bf16.gmra.mrb[28].mxu1 %vm1964_vm14, %v2222_v9  ;;  %vm1610_vm0 = vcmp.gt.f32.partialorder %v1219_v27, 0.0  ;;  %v1738_v30 = vmul.f32 0.2, %v1219_v27  ;;  %v7023_v24 = vpop.f32.mrb[42].mxu0  ;;  %v8459_v33 = vsel %vm1692_vm7, %v7102_v61, %v1820_v2  ;;  %v1821_v23 = vmul.f32 0.2, %v7103_v8 }
 0x139   : > { %7150 = vmatprep.mubr.msk.bf16.mxu1 %vm1964_vm14, %v2312_v43  ;;  %v8423_v36 = vsel %vm1612_vm15, %v7022_v19, %v1740_v25  ;;  %vm1613_vm3 = vcmp.gt.f32.partialorder %v7023_v24, 0.0  ;;  %v1741_v37 = vmul.f32 0.2, %v7023_v24  ;;  %v1222_v40 = vpop.f32.mrb[43].mxu0  ;;  %v1818_v19 = vmul.f32 0.2, %v1539_v44 }
 0x13a   : > { %v8427_v62 = vsel %vm1610_vm0, %v1219_v27, %v1738_v30  ;;  %vm1611_vm4 = vcmp.gt.f32.partialorder %v1222_v40, 0.0  ;;  %v1739_v6 = vmul.f32 0.2, %v1222_v40  ;;  %v8469_v15 = vsel %vm1693_vm12, %v7103_v8, %v1821_v23 }
 0x13b   : > { %v8429_v9 = vsel %vm1613_vm3, %v7023_v24, %v1741_v37  ;;  %v8467_v24 = vsel %vm1690_vm10, %v1539_v44, %v1818_v19 }
 0x13c   : > { %v2406_v43 = vpack.c.bf16 %v8429_v9, %v8423_v36  ;;  %v1867_v45 = vsel %vm1611_vm4, %v1222_v40, %v1739_v6  ;;  %v3336_v40 = vpack.c.bf16 %v8469_v15, %v8459_v33 }
 0x13d   : > { %v2405_v46 = vpack.c.bf16 %v1867_v45, %v8427_v62 }
 0x13e   : > { %v7026_v52 = vpop.f32.mrb[44].mxu0 }
 0x13f   : > { %vm1616_vm6 = vcmp.gt.f32.partialorder %v7026_v52, 0.0  ;;  %v1744_v0 = vmul.f32 0.2, %v7026_v52  ;;  %v1235_v1 = vpop.f32.mrb[45].mxu0 }
 0x140   : > { %7151 = vmatmul.mubr.msk.bf16.vlgmr.msra.gmra.mrb[24].mxu1 %vm1964_vm14, %v2313_v39  ;;  %vm1614_vm8 = vcmp.gt.f32.partialorder %v1235_v1, 0.0  ;;  %v1742_v54 = vmul.f32 0.2, %v1235_v1  ;;  %v7027_v31 = vpop.f32.mrb[46].mxu0  ;;  %v1542_v39 = vpop.f32.mrb[19].mxu1 }
 0x141   : > { %7154 = vmatprep.mubr.msk.bf16.mxu1 %vm1964_vm14, %v2314_v20  ;;  %v8452_v3 = vsel %vm1616_vm6, %v7026_v52, %v1744_v0  ;;  %vm1617_vm9 = vcmp.gt.f32.partialorder %v7027_v31, 0.0  ;;  %v1745_v5 = vmul.f32 0.2, %v7027_v31  ;;  %v1238_v7 = vpop.f32.mrb[47].mxu0  ;;  %7159 = vmatpush3.bf16.msra.mxu1 %v2423_v53  ;;  %vm1691_vm13 = vcmp.gt.f32.partialorder %v1542_v39, 0.0  ;;  %v7106_v6 = vpop.f32.mrb[20].mxu1 }
 0x142   : > { %v8454_v12 = vsel %vm1614_vm8, %v1235_v1, %v1742_v54  ;;  %vm1615_vm11 = vcmp.gt.f32.partialorder %v1238_v7, 0.0  ;;  %v1743_v34 = vmul.f32 0.2, %v1238_v7  ;;  %7832 = vmatprep.subr.msk.bf16.mxu1 %vm1977_vm1, %v8443_v55  ;;  %v1819_v17 = vmul.f32 0.2, %v1542_v39  ;;  %v1555_v53 = vpop.f32.mrb[21].mxu1 }
 0x143   : > { %v8461_v20 = vsel %vm1617_vm9, %v7027_v31, %v1745_v5  ;;  %vm1696_vm0 = vcmp.gt.f32.partialorder %v7106_v6, 0.0  ;;  %v1824_v1 = vmul.f32 0.2, %v7106_v6  ;;  %vm1694_vm4 = vcmp.gt.f32.partialorder %v1555_v53, 0.0  ;;  %v7107_v2 = vpop.f32.mrb[22].mxu1 }
 0x144   : > { %v2408_v25 = vpack.c.bf16 %v8461_v20, %v8452_v3  ;;  %v1871_v27 = vsel %vm1615_vm11, %v1238_v7, %v1743_v34  ;;  %v8473_v62 = vsel %vm1691_vm13, %v1542_v39, %v1819_v17  ;;  %v1558_v4 = vpop.f32.mrb[23].mxu1  ;;  %v1822_v8 = vmul.f32 0.2, %v1555_v53 }
 0x145   : > { %v2407_v30 = vpack.c.bf16 %v1871_v27, %v8454_v12  ;;  %v3335_v52 = vpack.c.bf16 %v8473_v62, %v8467_v24  ;;  %v8485_v63 = vsel %vm1696_vm0, %v7106_v6, %v1824_v1  ;;  %vm1697_vm6 = vcmp.gt.f32.partialorder %v7107_v2, 0.0 }
 0x146   : > { %v7030_v37 = vpop.f32.mrb[48].mxu0  ;;  %v1825_v12 = vmul.f32 0.2, %v7107_v2  ;;  %vm1695_vm7 = vcmp.gt.f32.partialorder %v1558_v4, 0.0  ;;  %v1823_v39 = vmul.f32 0.2, %v1558_v4  ;;  %v8492_v23 = vsel %vm1694_vm4, %v1555_v53, %v1822_v8 }
 0x147   : > { %vm1620_vm15 = vcmp.gt.f32.partialorder %v7030_v37, 0.0  ;;  %v1748_v29 = vmul.f32 0.2, %v7030_v37  ;;  %v1251_v45 = vpop.f32.mrb[49].mxu0 }
 0x148   : > { %7155 = vmatmul.mubr.msk.bf16.gmra.mrb[28].mxu1 %vm1964_vm14, %v2315_v10  ;;  %vm1618_vm2 = vcmp.gt.f32.partialorder %v1251_v45, 0.0  ;;  %v1746_v61 = vmul.f32 0.2, %v1251_v45  ;;  %v7031_v0 = vpop.f32.mrb[50].mxu0  ;;  %v8494_v27 = vsel %vm1697_vm6, %v7107_v2, %v1825_v12 }
 0x149   : > { %7160 = vmatprep.mubr.msk.bf16.mxu1 %vm1964_vm14, %v2405_v46  ;;  %v8482_v44 = vsel %vm1620_vm15, %v7030_v37, %v1748_v29  ;;  %vm1621_vm3 = vcmp.gt.f32.partialorder %v7031_v0, 0.0  ;;  %v1749_v54 = vmul.f32 0.2, %v7031_v0  ;;  %v1254_v31 = vpop.f32.mrb[51].mxu0  ;;  %v2516_v37 = vsel %vm1977_vm1, %v8443_v55, 0 }
 0x14a   : > { %v1874_v5 = vsel %vm1618_vm2, %v1251_v45, %v1746_v61  ;;  %vm1619_vm5 = vcmp.gt.f32.partialorder %v1254_v31, 0.0  ;;  %v1747_v7 = vmul.f32 0.2, %v1254_v31  ;;  %v3338_v6 = vpack.c.bf16 %v8494_v27, %v8485_v63 }
 0x14b   : > { %v8487_v10 = vsel %vm1621_vm3, %v7031_v0, %v1749_v54  ;;  %v8500_v29 = vsel %vm1695_vm7, %v1558_v4, %v1823_v39  ;;  %v2595_v0 = vld [vmem:[%s9196_s2 + $0x1c] sm:$0xf] }
 0x14c   : > { %v2499_v46 = vpack.c.bf16 %v8487_v10, %v8482_v44  ;;  %v1875_v34 = vsel %vm1619_vm5, %v1254_v31, %v1747_v7  ;;  %v3337_v53 = vpack.c.bf16 %v8500_v29, %v8492_v23  ;;  %v2609_v3 = vsel %vm1977_vm1, %v2595_v0, 0 }
 0x14d   : > { %v2498_v19 = vpack.c.bf16 %v1875_v34, %v1874_v5 }
 0x14e   : > { %v7034_v17 = vpop.f32.mrb[52].mxu0 }
 0x14f   : > { %vm1624_vm8 = vcmp.gt.f32.partialorder %v7034_v17, 0.0  ;;  %v1752_v45 = vmul.f32 0.2, %v7034_v17  ;;  %v1267_v61 = vpop.f32.mrb[53].mxu0 }
 0x150   : > { %7161 = vmatmul.mubr.msk.bf16.vlgmr.msra.gmra.mrb[24].mxu1 %vm1964_vm14, %v2406_v43  ;;  %vm1622_vm9 = vcmp.gt.f32.partialorder %v1267_v61, 0.0  ;;  %v1750_v55 = vmul.f32 0.2, %v1267_v61  ;;  %v7035_v1 = vpop.f32.mrb[54].mxu0 }
 0x151   : > { %7164 = vmatprep.mubr.msk.bf16.mxu1 %vm1964_vm14, %v2407_v30  ;;  %v1880_v44 = vsel %vm1624_vm8, %v7034_v17, %v1752_v45  ;;  %vm1625_vm10 = vcmp.gt.f32.partialorder %v7035_v1, 0.0  ;;  %v1753_v54 = vmul.f32 0.2, %v7035_v1  ;;  %v1270_v31 = vpop.f32.mrb[55].mxu0  ;;  %7169 = vmatpush3.bf16.msra.mxu1 %v2516_v37 }
 0x152   : > { %v1878_v2 = vsel %vm1622_vm9, %v1267_v61, %v1750_v55  ;;  %vm1623_vm11 = vcmp.gt.f32.partialorder %v1270_v31, 0.0  ;;  %v1751_v5 = vmul.f32 0.2, %v1270_v31  ;;  %7833 = vmatprep.subr.msk.bf16.mxu1 %vm1977_vm1, %v2595_v0 }
 0x153   : > { %v1881_v7 = vsel %vm1625_vm10, %v7035_v1, %v1753_v54 }
 0x154   : > { %v2501_v4 = vpack.c.bf16 %v1881_v7, %v1880_v44  ;;  %v1879_v36 = vsel %vm1623_vm11, %v1270_v31, %v1751_v5 }
 0x155   : > { %v2500_v9 = vpack.c.bf16 %v1879_v36, %v1878_v2 }
 0x156   : > { %v7038_v43 = vpop.f32.mrb[56].mxu0 }
 0x157   : > { %vm1628_vm12 = vcmp.gt.f32.partialorder %v7038_v43, 0.0  ;;  %v1756_v10 = vmul.f32 0.2, %v7038_v43  ;;  %v1283_v8 = vpop.f32.mrb[57].mxu0 }
 0x158   : > { %7165 = vmatmul.mubr.msk.bf16.gmra.mrb[28].mxu1 %vm1964_vm14, %v2408_v25  ;;  %vm1626_vm13 = vcmp.gt.f32.partialorder %v1283_v8, 0.0  ;;  %v1754_v30 = vmul.f32 0.2, %v1283_v8  ;;  %v7039_v12 = vpop.f32.mrb[58].mxu0 }
 0x159   : > { %7170 = vmatprep.mubr.msk.bf16.mxu1 %vm1964_vm14, %v2498_v19  ;;  %v1884_v34 = vsel %vm1628_vm12, %v7038_v43, %v1756_v10  ;;  %vm1629_vm15 = vcmp.gt.f32.partialorder %v7039_v12, 0.0  ;;  %v1757_v39 = vmul.f32 0.2, %v7039_v12  ;;  %v1286_v17 = vpop.f32.mrb[59].mxu0  ;;  %v2688_v19 = vld [vmem:[%s9196_s2 + $0x20] sm:$0xf] }
 0x15a   : > { %v1882_v37 = vsel %vm1626_vm13, %v1283_v8, %v1754_v30  ;;  %vm1627_vm0 = vcmp.gt.f32.partialorder %v1286_v17, 0.0  ;;  %v1755_v45 = vmul.f32 0.2, %v1286_v17 }
 0x15b   : > { %v1885_v61 = vsel %vm1629_vm15, %v7039_v12, %v1757_v39 }
 0x15c   : > { %v2592_v55 = vpack.c.bf16 %v1885_v61, %v1884_v34  ;;  %v1883_v1 = vsel %vm1627_vm0, %v1286_v17, %v1755_v45 }
 0x15d   : > { %v2591_v44 = vpack.c.bf16 %v1883_v1, %v1882_v37 }
 0x15e   : > { %v7042_v54 = vpop.f32.mrb[60].mxu0 }
 0x15f   : > { %vm1632_vm2 = vcmp.gt.f32.partialorder %v7042_v54, 0.0  ;;  %v1760_v20 = vmul.f32 0.2, %v7042_v54  ;;  %v1299_v25 = vpop.f32.mrb[61].mxu0 }
 0x160   : > { %7171 = vmatmul.mubr.msk.bf16.vlgmr.msra.gmra.mrb[24].mxu1 %vm1964_vm14, %v2499_v46  ;;  %vm1630_vm3 = vcmp.gt.f32.partialorder %v1299_v25, 0.0  ;;  %v1758_v31 = vmul.f32 0.2, %v1299_v25  ;;  %v7043_v2 = vpop.f32.mrb[62].mxu0 }
 0x161   : > { %7174 = vmatprep.mubr.msk.bf16.mxu1 %vm1964_vm14, %v2500_v9  ;;  %v1888_v5 = vsel %vm1632_vm2, %v7042_v54, %v1760_v20  ;;  %vm1633_vm4 = vcmp.gt.f32.partialorder %v7043_v2, 0.0  ;;  %v1761_v7 = vmul.f32 0.2, %v7043_v2  ;;  %v1302_v36 = vpop.f32.mrb[63].mxu0  ;;  %7179 = vmatpush3.bf16.msra.mxu1 %v2609_v3 }
 0x162   : > { %v1886_v0 = vsel %vm1630_vm3, %v1299_v25, %v1758_v31  ;;  %vm1631_vm5 = vcmp.gt.f32.partialorder %v1302_v36, 0.0  ;;  %v1759_v43 = vmul.f32 0.2, %v1302_v36  ;;  %7834 = vmatprep.subr.msk.bf16.mxu1 %vm1977_vm1, %v2688_v19 }
 0x163   : > { %v1889_v10 = vsel %vm1633_vm4, %v7043_v2, %v1761_v7 }
 0x164   : > { %v2594_v8 = vpack.c.bf16 %v1889_v10, %v1888_v5  ;;  %v1887_v30 = vsel %vm1631_vm5, %v1302_v36, %v1759_v43  ;;  %v2702_v5 = vsel %vm1977_vm1, %v2688_v19, 0 }
 0x165   : > { %v2593_v12 = vpack.c.bf16 %v1887_v30, %v1886_v0 }
 0x166   : > { %v7046_v46 = vpop.f32.mrb[64].mxu0 }
 0x167   : > { %vm1636_vm6 = vcmp.gt.f32.partialorder %v7046_v46, 0.0  ;;  %v1764_v34 = vmul.f32 0.2, %v7046_v46  ;;  %v1315_v39 = vpop.f32.mrb[65].mxu0 }
 0x168   : > { %7175 = vmatmul.mubr.msk.bf16.gmra.mrb[28].mxu1 %vm1964_vm14, %v2501_v4  ;;  %vm1634_vm7 = vcmp.gt.f32.partialorder %v1315_v39, 0.0  ;;  %v1762_v9 = vmul.f32 0.2, %v1315_v39  ;;  %v7047_v17 = vpop.f32.mrb[66].mxu0 }
 0x169   : > { %7180 = vmatprep.mubr.msk.bf16.mxu1 %vm1964_vm14, %v2591_v44  ;;  %v1892_v37 = vsel %vm1636_vm6, %v7046_v46, %v1764_v34  ;;  %vm1637_vm8 = vcmp.gt.f32.partialorder %v7047_v17, 0.0  ;;  %v1765_v45 = vmul.f32 0.2, %v7047_v17  ;;  %v1318_v61 = vpop.f32.mrb[67].mxu0  ;;  %v2781_v44 = vld [vmem:[%s9196_s2 + $0x24] sm:$0xf] }
 0x16a   : > { %v1890_v1 = vsel %vm1634_vm7, %v1315_v39, %v1762_v9  ;;  %vm1635_vm9 = vcmp.gt.f32.partialorder %v1318_v61, 0.0  ;;  %v1763_v54 = vmul.f32 0.2, %v1318_v61 }
 0x16b   : > { %v1893_v3 = vsel %vm1637_vm8, %v7047_v17, %v1765_v45 }
 0x16c   : > { %v2685_v20 = vpack.c.bf16 %v1893_v3, %v1892_v37  ;;  %v1891_v25 = vsel %vm1635_vm9, %v1318_v61, %v1763_v54 }
 0x16d   : > { %v2684_v31 = vpack.c.bf16 %v1891_v25, %v1890_v1 }
 0x16e   : > { %v7050_v2 = vpop.f32.mrb[68].mxu0 }
 0x16f   : > { %vm1640_vm10 = vcmp.gt.f32.partialorder %v7050_v2, 0.0  ;;  %v1768_v4 = vmul.f32 0.2, %v7050_v2  ;;  %v1331_v7 = vpop.f32.mrb[69].mxu0 }
 0x170   : > { %7181 = vmatmul.mubr.msk.bf16.vlgmr.msra.gmra.mrb[24].mxu1 %vm1964_vm14, %v2592_v55  ;;  %vm1638_vm11 = vcmp.gt.f32.partialorder %v1331_v7, 0.0  ;;  %v1766_v36 = vmul.f32 0.2, %v1331_v7  ;;  %v7051_v0 = vpop.f32.mrb[70].mxu0 }
 0x171   : > { %7184 = vmatprep.mubr.msk.bf16.mxu1 %vm1964_vm14, %v2593_v12  ;;  %v1896_v43 = vsel %vm1640_vm10, %v7050_v2, %v1768_v4  ;;  %vm1641_vm12 = vcmp.gt.f32.partialorder %v7051_v0, 0.0  ;;  %v1769_v10 = vmul.f32 0.2, %v7051_v0  ;;  %v1334_v30 = vpop.f32.mrb[71].mxu0  ;;  %7189 = vmatpush3.bf16.msra.mxu1 %v2702_v5 }
 0x172   : > { %v1894_v19 = vsel %vm1638_vm11, %v1331_v7, %v1766_v36  ;;  %vm1639_vm13 = vcmp.gt.f32.partialorder %v1334_v30, 0.0  ;;  %v1767_v46 = vmul.f32 0.2, %v1334_v30  ;;  %7835 = vmatprep.subr.msk.bf16.mxu1 %vm1977_vm1, %v2781_v44 }
 0x173   : > { %v1897_v34 = vsel %vm1641_vm12, %v7051_v0, %v1769_v10 }
 0x174   : > { %v2687_v39 = vpack.c.bf16 %v1897_v34, %v1896_v43  ;;  %v1895_v9 = vsel %vm1639_vm13, %v1334_v30, %v1767_v46  ;;  %v2795_v43 = vsel %vm1977_vm1, %v2781_v44, 0 }
 0x175   : > { %v2686_v17 = vpack.c.bf16 %v1895_v9, %v1894_v19 }
 0x176   : > { %v7054_v55 = vpop.f32.mrb[72].mxu0 }
 0x177   : > { %vm1644_vm15 = vcmp.gt.f32.partialorder %v7054_v55, 0.0  ;;  %v1772_v37 = vmul.f32 0.2, %v7054_v55  ;;  %v1347_v45 = vpop.f32.mrb[73].mxu0 }
 0x178   : > { %7185 = vmatmul.mubr.msk.bf16.gmra.mrb[28].mxu1 %vm1964_vm14, %v2594_v8  ;;  %vm1642_vm0 = vcmp.gt.f32.partialorder %v1347_v45, 0.0  ;;  %v1770_v12 = vmul.f32 0.2, %v1347_v45  ;;  %v7055_v61 = vpop.f32.mrb[74].mxu0 }
 0x179   : > { %7190 = vmatprep.mubr.msk.bf16.mxu1 %vm1964_vm14, %v2684_v31  ;;  %v1900_v1 = vsel %vm1644_vm15, %v7054_v55, %v1772_v37  ;;  %vm1645_vm2 = vcmp.gt.f32.partialorder %v7055_v61, 0.0  ;;  %v1773_v54 = vmul.f32 0.2, %v7055_v61  ;;  %v1350_v3 = vpop.f32.mrb[75].mxu0  ;;  %v2874_v31 = vld [vmem:[%s9196_s2 + $0x28] sm:$0xf] }
 0x17a   : > { %v1898_v25 = vsel %vm1642_vm0, %v1347_v45, %v1770_v12  ;;  %vm1643_vm3 = vcmp.gt.f32.partialorder %v1350_v3, 0.0  ;;  %v1771_v2 = vmul.f32 0.2, %v1350_v3 }
 0x17b   : > { %v1901_v5 = vsel %vm1645_vm2, %v7055_v61, %v1773_v54 }
 0x17c   : > { %v2778_v4 = vpack.c.bf16 %v1901_v5, %v1900_v1  ;;  %v1899_v7 = vsel %vm1643_vm3, %v1350_v3, %v1771_v2 }
 0x17d   : > { %v2777_v36 = vpack.c.bf16 %v1899_v7, %v1898_v25 }
 0x17e   : > { %v7058_v0 = vpop.f32.mrb[76].mxu0 }
 0x17f   : > { %vm1648_vm4 = vcmp.gt.f32.partialorder %v7058_v0, 0.0  ;;  %v1776_v8 = vmul.f32 0.2, %v7058_v0  ;;  %v1363_v10 = vpop.f32.mrb[77].mxu0 }
 0x180   : > { %7191 = vmatmul.mubr.msk.bf16.vlgmr.msra.gmra.mrb[24].mxu1 %vm1964_vm14, %v2685_v20  ;;  %vm1646_vm5 = vcmp.gt.f32.partialorder %v1363_v10, 0.0  ;;  %v1774_v30 = vmul.f32 0.2, %v1363_v10  ;;  %v7059_v19 = vpop.f32.mrb[78].mxu0 }
 0x181   : > { %7194 = vmatprep.mubr.msk.bf16.mxu1 %vm1964_vm14, %v2686_v17  ;;  %v1904_v46 = vsel %vm1648_vm4, %v7058_v0, %v1776_v8  ;;  %vm1649_vm6 = vcmp.gt.f32.partialorder %v7059_v19, 0.0  ;;  %v1777_v34 = vmul.f32 0.2, %v7059_v19  ;;  %v1366_v9 = vpop.f32.mrb[79].mxu0  ;;  %7199 = vmatpush3.bf16.msra.mxu1 %v2795_v43 }
 0x182   : > { %v1902_v44 = vsel %vm1646_vm5, %v1363_v10, %v1774_v30  ;;  %vm1647_vm7 = vcmp.gt.f32.partialorder %v1366_v9, 0.0  ;;  %v1775_v55 = vmul.f32 0.2, %v1366_v9  ;;  %7836 = vmatprep.subr.msk.bf16.mxu1 %vm1977_vm1, %v2874_v31 }
 0x183   : > { %v1905_v37 = vsel %vm1649_vm6, %v7059_v19, %v1777_v34 }
 0x184   : > { %v2780_v45 = vpack.c.bf16 %v1905_v37, %v1904_v46  ;;  %v1903_v12 = vsel %vm1647_vm7, %v1366_v9, %v1775_v55  ;;  %v2888_v46 = vsel %vm1977_vm1, %v2874_v31, 0 }
 0x185   : > { %v2779_v61 = vpack.c.bf16 %v1903_v12, %v1902_v44 }
 0x186   : > { %v7062_v20 = vpop.f32.mrb[80].mxu0 }
 0x187   : > { %vm1652_vm8 = vcmp.gt.f32.partialorder %v7062_v20, 0.0  ;;  %v1780_v1 = vmul.f32 0.2, %v7062_v20  ;;  %v1379_v54 = vpop.f32.mrb[81].mxu0 }
 0x188   : > { %7195 = vmatmul.mubr.msk.bf16.gmra.mrb[28].mxu1 %vm1964_vm14, %v2687_v39  ;;  %vm1650_vm9 = vcmp.gt.f32.partialorder %v1379_v54, 0.0  ;;  %v1778_v17 = vmul.f32 0.2, %v1379_v54  ;;  %v7063_v3 = vpop.f32.mrb[82].mxu0 }
 0x189   : > { %7200 = vmatprep.mubr.msk.bf16.mxu1 %vm1964_vm14, %v2777_v36  ;;  %v1908_v25 = vsel %vm1652_vm8, %v7062_v20, %v1780_v1  ;;  %vm1653_vm10 = vcmp.gt.f32.partialorder %v7063_v3, 0.0  ;;  %v1781_v2 = vmul.f32 0.2, %v7063_v3  ;;  %v1382_v5 = vpop.f32.mrb[83].mxu0  ;;  %v2967_v36 = vld [vmem:[%s9196_s2 + $0x2c] sm:$0xf] }
 0x18a   : > { %v1906_v7 = vsel %vm1650_vm9, %v1379_v54, %v1778_v17  ;;  %vm1651_vm11 = vcmp.gt.f32.partialorder %v1382_v5, 0.0  ;;  %v1779_v0 = vmul.f32 0.2, %v1382_v5 }
 0x18b   : > { %v1909_v43 = vsel %vm1653_vm10, %v7063_v3, %v1781_v2 }
 0x18c   : > { %v2871_v8 = vpack.c.bf16 %v1909_v43, %v1908_v25  ;;  %v1907_v10 = vsel %vm1651_vm11, %v1382_v5, %v1779_v0 }
 0x18d   : > { %v2870_v30 = vpack.c.bf16 %v1907_v10, %v1906_v7 }
 0x18e   : > { %v7066_v19 = vpop.f32.mrb[84].mxu0 }
 0x18f   : > { %vm1656_vm12 = vcmp.gt.f32.partialorder %v7066_v19, 0.0  ;;  %v1784_v39 = vmul.f32 0.2, %v7066_v19  ;;  %v1395_v34 = vpop.f32.mrb[85].mxu0 }
 0x190   : > { %7201 = vmatmul.mubr.msk.bf16.vlgmr.msra.gmra.mrb[24].mxu1 %vm1964_vm14, %v2778_v4  ;;  %vm1654_vm13 = vcmp.gt.f32.partialorder %v1395_v34, 0.0  ;;  %v1782_v9 = vmul.f32 0.2, %v1395_v34  ;;  %v7067_v44 = vpop.f32.mrb[86].mxu0 }
 0x191   : > { %7204 = vmatprep.mubr.msk.bf16.mxu1 %vm1964_vm14, %v2779_v61  ;;  %v1912_v55 = vsel %vm1656_vm12, %v7066_v19, %v1784_v39  ;;  %vm1657_vm15 = vcmp.gt.f32.partialorder %v7067_v44, 0.0  ;;  %v1785_v37 = vmul.f32 0.2, %v7067_v44  ;;  %v1398_v12 = vpop.f32.mrb[87].mxu0  ;;  %7209 = vmatpush3.bf16.msra.mxu1 %v2888_v46 }
 0x192   : > { %v1910_v31 = vsel %vm1654_vm13, %v1395_v34, %v1782_v9  ;;  %vm1655_vm0 = vcmp.gt.f32.partialorder %v1398_v12, 0.0  ;;  %v1783_v20 = vmul.f32 0.2, %v1398_v12  ;;  %7837 = vmatprep.subr.msk.bf16.mxu1 %vm1977_vm1, %v2967_v36 }
 0x193   : > { %v1913_v1 = vsel %vm1657_vm15, %v7067_v44, %v1785_v37 }
 0x194   : > { %v2873_v54 = vpack.c.bf16 %v1913_v1, %v1912_v55  ;;  %v1911_v17 = vsel %vm1655_vm0, %v1398_v12, %v1783_v20  ;;  %v2981_v55 = vsel %vm1977_vm1, %v2967_v36, 0 }
 0x195   : > { %v2872_v3 = vpack.c.bf16 %v1911_v17, %v1910_v31 }
 0x196   : > { %v7070_v4 = vpop.f32.mrb[88].mxu0 }
 0x197   : > { %vm1660_vm2 = vcmp.gt.f32.partialorder %v7070_v4, 0.0  ;;  %v1788_v25 = vmul.f32 0.2, %v7070_v4  ;;  %v1411_v2 = vpop.f32.mrb[89].mxu0 }
 0x198   : > { %7205 = vmatmul.mubr.msk.bf16.gmra.mrb[28].mxu1 %vm1964_vm14, %v2780_v45  ;;  %vm1658_vm3 = vcmp.gt.f32.partialorder %v1411_v2, 0.0  ;;  %v1786_v61 = vmul.f32 0.2, %v1411_v2  ;;  %v7071_v5 = vpop.f32.mrb[90].mxu0 }
 0x199   : > { %7210 = vmatprep.mubr.msk.bf16.mxu1 %vm1964_vm14, %v2870_v30  ;;  %v1916_v7 = vsel %vm1660_vm2, %v7070_v4, %v1788_v25  ;;  %vm1661_vm4 = vcmp.gt.f32.partialorder %v7071_v5, 0.0  ;;  %v1789_v0 = vmul.f32 0.2, %v7071_v5  ;;  %v1414_v43 = vpop.f32.mrb[91].mxu0  ;;  %v3060_v30 = vld [vmem:[%s9196_s2 + $0x30] sm:$0xf] }
 0x19a   : > { %v1914_v10 = vsel %vm1658_vm3, %v1411_v2, %v1786_v61  ;;  %vm1659_vm5 = vcmp.gt.f32.partialorder %v1414_v43, 0.0  ;;  %v1787_v19 = vmul.f32 0.2, %v1414_v43 }
 0x19b   : > { %v1917_v46 = vsel %vm1661_vm4, %v7071_v5, %v1789_v0  ;;  %vm3640_vm4 = vcmask 523264  }
 0x19c   : > { %v2964_v39 = vpack.c.bf16 %v1917_v46, %v1916_v7  ;;  %v1915_v34 = vsel %vm1659_vm5, %v1414_v43, %v1787_v19  ;;  %vm3428_vm5 = vcmask 130048  }
 0x19d   : > { %v2963_v9 = vpack.c.bf16 %v1915_v34, %v1914_v10 }
 0x19e   : > { %v7074_v44 = vpop.f32.mrb[92].mxu0 }
 0x19f   : > { %vm1664_vm6 = vcmp.gt.f32.partialorder %v7074_v44, 0.0  ;;  %v1792_v45 = vmul.f32 0.2, %v7074_v44  ;;  %v1427_v37 = vpop.f32.mrb[93].mxu0 }
 0x1a0   : > { %7211 = vmatmul.mubr.msk.bf16.vlgmr.msra.gmra.mrb[24].mxu1 %vm1964_vm14, %v2871_v8  ;;  %vm1662_vm7 = vcmp.gt.f32.partialorder %v1427_v37, 0.0  ;;  %v1790_v12 = vmul.f32 0.2, %v1427_v37  ;;  %v7075_v31 = vpop.f32.mrb[94].mxu0 }
 0x1a1   : > { %7214 = vmatprep.mubr.msk.bf16.mxu1 %vm1964_vm14, %v2872_v3  ;;  %v1920_v20 = vsel %vm1664_vm6, %v7074_v44, %v1792_v45  ;;  %vm1665_vm8 = vcmp.gt.f32.partialorder %v7075_v31, 0.0  ;;  %v1793_v1 = vmul.f32 0.2, %v7075_v31  ;;  %v1430_v17 = vpop.f32.mrb[95].mxu0  ;;  %7219 = vmatpush3.bf16.msra.mxu1 %v2981_v55 }
 0x1a2   : > { %v1918_v36 = vsel %vm1662_vm7, %v1427_v37, %v1790_v12  ;;  %vm1663_vm9 = vcmp.gt.f32.partialorder %v1430_v17, 0.0  ;;  %v1791_v4 = vmul.f32 0.2, %v1430_v17  ;;  %7838 = vmatprep.subr.msk.bf16.mxu1 %vm1977_vm1, %v3060_v30 }
 0x1a3   : > { %v1921_v25 = vsel %vm1665_vm8, %v7075_v31, %v1793_v1 }
 0x1a4   : > { %v2966_v2 = vpack.c.bf16 %v1921_v25, %v1920_v20  ;;  %v1919_v61 = vsel %vm1663_vm9, %v1430_v17, %v1791_v4  ;;  %v3074_v20 = vsel %vm1977_vm1, %v3060_v30, 0 }
 0x1a5   : > { %v2965_v5 = vpack.c.bf16 %v1919_v61, %v1918_v36 }
 0x1a6   : > { %v7078_v8 = vpop.f32.mrb[96].mxu0 }
 0x1a7   : > { %vm1668_vm10 = vcmp.gt.f32.partialorder %v7078_v8, 0.0  ;;  %v1796_v7 = vmul.f32 0.2, %v7078_v8  ;;  %v1443_v0 = vpop.f32.mrb[97].mxu0 }
 0x1a8   : > { %7215 = vmatmul.mubr.msk.bf16.gmra.mrb[28].mxu1 %vm1964_vm14, %v2873_v54  ;;  %vm1666_vm11 = vcmp.gt.f32.partialorder %v1443_v0, 0.0  ;;  %v1794_v3 = vmul.f32 0.2, %v1443_v0  ;;  %v7079_v43 = vpop.f32.mrb[98].mxu0 }
 0x1a9   : > { %7220 = vmatprep.mubr.msk.bf16.mxu1 %vm1964_vm14, %v2963_v9  ;;  %v1924_v10 = vsel %vm1668_vm10, %v7078_v8, %v1796_v7  ;;  %vm1669_vm12 = vcmp.gt.f32.partialorder %v7079_v43, 0.0  ;;  %v1797_v19 = vmul.f32 0.2, %v7079_v43  ;;  %v1446_v46 = vpop.f32.mrb[99].mxu0  ;;  %v3153_v9 = vld [vmem:[%s9196_s2 + $0x34] sm:$0xf] }
 0x1aa   : > { %v1922_v34 = vsel %vm1666_vm11, %v1443_v0, %v1794_v3  ;;  %vm1667_vm13 = vcmp.gt.f32.partialorder %v1446_v46, 0.0  ;;  %v1795_v44 = vmul.f32 0.2, %v1446_v46 }
 0x1ab   : > { %v1925_v55 = vsel %vm1669_vm12, %v7079_v43, %v1797_v19 }
 0x1ac   : > { %v3057_v45 = vpack.c.bf16 %v1925_v55, %v1924_v10  ;;  %v1923_v37 = vsel %vm1667_vm13, %v1446_v46, %v1795_v44  ;;  %v3339_v10 = vld [vmem:[%s9196_s2 + $0x3c] sm:$0xf]  ;;  %vm8012_vm13 = vmmov 0  }
 0x1ad   : > { %v3056_v12 = vpack.c.bf16 %v1923_v37, %v1922_v34  ;;  %v3353_v49 = vsel %vm1977_vm1, %v3339_v10, 0  ;;  %7310 = vmatprep.mubr.msk.bf16.mxu0 %vm8012_vm13, %v8011_v11 }
 0x1ae   : > { %v7082_v31 = vpop.f32.mrb[100].mxu0 }
 0x1af   : > { %vm1672_vm15 = vcmp.gt.f32.partialorder %v7082_v31, 0.0  ;;  %v1800_v54 = vmul.f32 0.2, %v7082_v31  ;;  %v1459_v1 = vpop.f32.mrb[101].mxu0 }
 0x1b0   : > { %7221 = vmatmul.mubr.msk.bf16.vlgmr.msra.gmra.mrb[24].mxu1 %vm1964_vm14, %v2964_v39  ;;  %vm1670_vm0 = vcmp.gt.f32.partialorder %v1459_v1, 0.0  ;;  %v1798_v17 = vmul.f32 0.2, %v1459_v1  ;;  %v7083_v36 = vpop.f32.mrb[102].mxu0  ;;  %v3167_v39 = vsel %vm1977_vm1, %v3153_v9, 0 }
 0x1b1   : > { %7224 = vmatprep.mubr.msk.bf16.mxu1 %vm1964_vm14, %v2965_v5  ;;  %v1928_v4 = vsel %vm1672_vm15, %v7082_v31, %v1800_v54  ;;  %vm1673_vm2 = vcmp.gt.f32.partialorder %v7083_v36, 0.0  ;;  %v1801_v25 = vmul.f32 0.2, %v7083_v36  ;;  %v1462_v61 = vpop.f32.mrb[103].mxu0  ;;  %7229 = vmatpush3.bf16.msra.mxu1 %v3074_v20  ;;  %v3246_v5 = vld [vmem:[%s9196_s2 + $0x38] sm:$0xf] }
 0x1b2   : > { %v1926_v30 = vsel %vm1670_vm0, %v1459_v1, %v1798_v17  ;;  %vm1671_vm3 = vcmp.gt.f32.partialorder %v1462_v61, 0.0  ;;  %v1799_v8 = vmul.f32 0.2, %v1462_v61  ;;  %7839 = vmatprep.subr.msk.bf16.mxu1 %vm1977_vm1, %v3153_v9  ;;  %vm4726_vm15 = vcmask 261120  }
 0x1b3   : > { %v1929_v7 = vsel %vm1673_vm2, %v7083_v36, %v1801_v25 }
 0x1b4   : > { %v3059_v0 = vpack.c.bf16 %v1929_v7, %v1928_v4  ;;  %v1927_v3 = vsel %vm1671_vm3, %v1462_v61, %v1799_v8  ;;  %vm6101_vm3 = vcmask 72704  }
 0x1b5   : > { %v3058_v43 = vpack.c.bf16 %v1927_v3, %v1926_v30 }
 0x1b8   : > { %7225 = vmatmul.mubr.msk.bf16.gmra.mrb[28].mxu1 %vm1964_vm14, %v2966_v2  ;;  %v3260_v2 = vsel %vm1977_vm1, %v3246_v5, 0 }
 0x1b9   : > { %7230 = vmatprep.mubr.msk.bf16.mxu1 %vm1964_vm14, %v3056_v12 }
 0x1c0   : > { %7231 = vmatmul.mubr.msk.bf16.vlgmr.msra.gmra.mrb[24].mxu1 %vm1964_vm14, %v3057_v45 }
 0x1c1   : > { %7234 = vmatprep.mubr.msk.bf16.mxu1 %vm1964_vm14, %v3058_v43  ;;  %7239 = vmatpush3.bf16.msra.mxu1 %v3167_v39 }
 0x1c2   : > { %7840 = vmatprep.subr.msk.bf16.mxu1 %vm1977_vm1, %v3246_v5 }
 0x1c8   : > { %7235 = vmatmul.mubr.msk.bf16.gmra.mrb[28].mxu1 %vm1964_vm14, %v3059_v0 }
 0x1c9   : > { %7240 = vmatprep.mubr.msk.bf16.mxu1 %vm1964_vm14, %v3149_v13 }
 0x1d0   : > { %7241 = vmatmul.mubr.msk.bf16.vlgmr.msra.gmra.mrb[24].mxu1 %vm1964_vm14, %v3150_v60 }
 0x1d1   : > { %7244 = vmatprep.mubr.msk.bf16.mxu1 %vm1964_vm14, %v3151_v47  ;;  %7249 = vmatpush3.bf16.msra.mxu1 %v3260_v2 }
 0x1d2   : > { %7841 = vmatprep.subr.msk.bf16.mxu1 %vm1977_vm1, %v3339_v10 }
 0x1d8   : > { %7245 = vmatmul.mubr.msk.bf16.gmra.mrb[28].mxu1 %vm1964_vm14, %v3152_v32 }
 0x1d9   : > { %7250 = vmatprep.mubr.msk.bf16.mxu1 %vm1964_vm14, %v3242_v21 }
 0x1e0   : > { %7251 = vmatmul.mubr.msk.bf16.vlgmr.msra.gmra.mrb[24].mxu1 %vm1964_vm14, %v3243_v38 }
 0x1e1   : > { %7254 = vmatprep.mubr.msk.bf16.mxu1 %vm1964_vm14, %v3244_v56  ;;  %7259 = vmatpush3.bf16.msra.mxu1 %v3353_v49 }
 0x1e8   : > { %7255 = vmatmul.mubr.msk.bf16.gmra.mrb[28].mxu1 %vm1964_vm14, %v3245_v41 }
 0x1e9   : > { %7260 = vmatprep.mubr.msk.bf16.mxu1 %vm1964_vm14, %v3335_v52 }
 0x1f0   : > { %7261 = vmatmul.mubr.msk.bf16.vlgmr.msra.gmra.mrb[24].mxu1 %vm1964_vm14, %v3336_v40 }
 0x1f1   : > { %7264 = vmatprep.mubr.msk.bf16.mxu1 %vm1964_vm14, %v3337_v53 }
 0x1f8   : > { %7265 = vmatmul.mubr.msk.bf16.gmra.mrb[28].mxu1 %vm1964_vm14, %v3338_v6 }
 0x1f9   : > { %7276 = vmatprep.mubr.msk.bf16.mxu1 %vm3640_vm4, %v7920_v57 }
 0x2c3   : > { %v7262_v60 = vpop.f32.mrb[24].mxu1 }
 0x2c4   : > { %v3389_v13 = vpop.f32.mrb[25].mxu1  ;;  %v3432_v47 = vsel %vm3428_vm5, %v7262_v60, 0.0 }
 0x2c5   : > { %v7263_v16 = vpop.f32.mrb[26].mxu1  ;;  %v3429_v32 = vsel %vm3428_vm5, %v3389_v13, 0.0 }
 0x2c6   : > { %v3392_v26 = vpop.f32.mrb[27].mxu1  ;;  %v3434_v50 = vsel %vm3428_vm5, %v7263_v16, 0.0 }
 0x2c7   : > { %v3430_v35 = vsel %vm3428_vm5, %v3392_v26, 0.0 }
 0x2c8   : > { %v3431_v28 = vadd.f32 %v3430_v35, %v3429_v32 }
 0x2ca   : > { %v3433_v48 = vadd.f32 %v3432_v47, %v3431_v28 }
 0x2cb   : > { %v7266_v58 = vpop.f32.mrb[28].mxu1 }
 0x2cc   : > { %v3405_v38 = vpop.f32.mrb[29].mxu1  ;;  %v3435_v18 = vadd.f32 %v3434_v50, %v3433_v48  ;;  %v3440_v56 = vsel %vm3428_vm5, %v7266_v58, 0.0 }
 0x2cd   : > { %v3436_v21 = vsel %vm3428_vm5, %v3405_v38, 0.0  ;;  %v7267_v22 = vpop.f32.mrb[30].mxu1 }
 0x2ce   : > { %v3437_v14 = vadd.f32 %v3436_v21, %v3435_v18  ;;  %v3408_v41 = vpop.f32.mrb[31].mxu1  ;;  %v3442_v24 = vsel %vm3428_vm5, %v7267_v22, 0.0 }
 0x2cf   : > { %v3438_v42 = vsel %vm3428_vm5, %v3408_v41, 0.0 }
 0x2d0   : > { %v3439_v51 = vadd.f32 %v3438_v42, %v3437_v14 }
 0x2d2   : > { %v3441_v33 = vadd.f32 %v3440_v56, %v3439_v51 }
 0x2d4   : > { %v3443_v15 = vadd.f32 %v3442_v24, %v3441_v33 }
 0x2d6   : > { %v3444_v40 = vrot.slane %v3443_v15, 4 }
 0x2d8   : > { %v3445_v62 = vadd.f32 %v3444_v40, %v3443_v15 }
 0x2da   : > { %v3446_v52 = vrot.slane %v3445_v62, 2 }
 0x2dc   : > { %v3447_v63 = vadd.f32 %v3446_v52, %v3445_v62 }
 0x2de   : > { %v3448_v23 = vrot.slane %v3447_v63, 1 }
 0x2e0   : > { %v3449_v27 = vadd.f32 %v3448_v23, %v3447_v63 }
 0x2e2   : > { %v3451_v6 = vmul.f32 0.015625, %v3449_v27 }
 0x2e4   : > { %v3452_v29 = vsub.f32 %v3389_v13, %v3451_v6  ;;  %v3453_v53 = vsub.f32 %v3392_v26, %v3451_v6  ;;  %v3454_v19 = vsub.f32 %v7262_v60, %v3451_v6  ;;  %v3455_v46 = vsub.f32 %v7263_v16, %v3451_v6 }
 0x2e5   : > { %v3456_v34 = vsub.f32 %v3405_v38, %v3451_v6  ;;  %v3457_v44 = vsub.f32 %v3408_v41, %v3451_v6  ;;  %v3458_v55 = vsub.f32 %v7266_v58, %v3451_v6  ;;  %v3459_v45 = vsub.f32 %v7267_v22, %v3451_v6 }
 0x2e6   : > { %v3460_v37 = vmul.f32 %v3452_v29, %v3452_v29  ;;  %v3461_v12 = vmul.f32 %v3453_v53, %v3453_v53  ;;  %v3462_v31 = vmul.f32 %v3454_v19, %v3454_v19  ;;  %v3463_v20 = vmul.f32 %v3455_v46, %v3455_v46 }
 0x2e7   : > { %v3464_v17 = vmul.f32 %v3456_v34, %v3456_v34  ;;  %v3465_v25 = vmul.f32 %v3457_v44, %v3457_v44  ;;  %v3466_v8 = vmul.f32 %v3458_v55, %v3458_v55  ;;  %v3467_v3 = vmul.f32 %v3459_v45, %v3459_v45 }
 0x2e8   : > { %v3468_v54 = vsel %vm3428_vm5, %v3460_v37, 0.0  ;;  %v3469_v1 = vsel %vm3428_vm5, %v3461_v12, 0.0  ;;  %v3471_v36 = vsel %vm3428_vm5, %v3462_v31, 0.0  ;;  %v3473_v61 = vsel %vm3428_vm5, %v3463_v20, 0.0  ;;  %v7924_v37 = vld [vmem:[%s9197_s3 + $0x20] sm:$0xff]   ;;  %v7925_v12 = vld [vmem:[%s9197_s3 + $0x28] sm:$0xff]  }
 0x2e9   : > { %v3470_v9 = vadd.f32 %v3469_v1, %v3468_v54  ;;  %v3475_v7 = vsel %vm3428_vm5, %v3464_v17, 0.0  ;;  %v3477_v43 = vsel %vm3428_vm5, %v3465_v25, 0.0  ;;  %v3479_v5 = vsel %vm3428_vm5, %v3466_v8, 0.0  ;;  %v7926_v31 = vld [vmem:[%s9197_s3 + $0x30] sm:$0xff]   ;;  %v7927_v20 = vld [vmem:[%s9197_s3 + $0x38] sm:$0xff]   ;;  %v7929_v54 = vld [vmem:[%s9197_s3 + $0x40] sm:$0xff]  }
 0x2ea   : > { %v3481_v10 = vsel %vm3428_vm5, %v3467_v3, 0.0  ;;  %v7930_v1 = vld [vmem:[%s9197_s3 + $0x48] sm:$0xff]   ;;  %v7932_v17 = vld [vmem:[%s9197_s3 + $0x58] sm:$0xff]   ;;  %v7935_v25 = vld [vmem:[%s9197_s3 + $0x70] sm:$0xff]  }
 0x2eb   : > { %v3472_v4 = vadd.f32 %v3471_v36, %v3470_v9  ;;  %v7931_v9 = vld [vmem:[%s9197_s3 + $0x50] sm:$0xff]   ;;  %v7933_v36 = vld [vmem:[%s9197_s3 + $0x60] sm:$0xff]  }
 0x2ed   : > { %v3474_v30 = vadd.f32 %v3473_v61, %v3472_v4  ;;  %v7934_v4 = vld [vmem:[%s9197_s3 + $0x68] sm:$0xff]   ;;  %v7936_v61 = vld [vmem:[%s9197_s3 + $0x78] sm:$0xff]  }
 0x2ef   : > { %v3476_v0 = vadd.f32 %v3475_v7, %v3474_v30 }
 0x2f1   : > { %v3478_v39 = vadd.f32 %v3477_v43, %v3476_v0  ;;  %v7937_v0 = vld [vmem:[%s9198_s4] sm:$0xff]  }
 0x2f3   : > { %v3480_v2 = vadd.f32 %v3479_v5, %v3478_v39 }
 0x2f5   : > { %v3482_v49 = vadd.f32 %v3481_v10, %v3480_v2 }
 0x2f7   : > { %v3483_v57 = vrot.slane %v3482_v49, 4 }
 0x2f9   : > { %v3484_v59 = vadd.f32 %v3483_v57, %v3482_v49 }
 0x2fb   : > { %v3485_v60 = vrot.slane %v3484_v59, 2 }
 0x2fd   : > { %v3486_v13 = vadd.f32 %v3485_v60, %v3484_v59  ;;  %v7938_v60 = vld [vmem:[%s9198_s4 + $0x10] sm:$0xff]  }
 0x2ff   : > { %v3487_v16 = vrot.slane %v3486_v13, 1 }
 0x301   : > { %v3488_v26 = vadd.f32 %v3487_v16, %v3486_v13 }
 0x303   : > { %v3489_v32 = vmul.f32 0.015625, %v3488_v26 }
 0x305   : > { %v3490_v35 = vadd.f32 1e-05, %v3489_v32 }
 0x307   : > { %7997 = vrsqrt.f32 %v3490_v35 }
 0x311   : > { %v7998_v28 = vpop.eup %7997 }
 0x312   : > { %v3497_v47 = vmul.f32 %v7998_v28, %v3457_v44  ;;  %v3492_v48 = vmul.f32 %v7998_v28, %v3452_v29  ;;  %v3493_v50 = vmul.f32 %v7998_v28, %v3453_v53  ;;  %v3494_v58 = vmul.f32 %v7998_v28, %v3454_v19  ;;  %v7921_v44 = vld [vmem:[%s9197_s3 + $0x8] sm:$0xff]  }
 0x313   : > { %v3495_v38 = vmul.f32 %v7998_v28, %v3455_v46  ;;  %v3496_v18 = vmul.f32 %v7998_v28, %v3456_v34  ;;  %v3498_v21 = vmul.f32 %v7998_v28, %v3458_v55  ;;  %v3499_v22 = vmul.f32 %v7998_v28, %v3459_v45  ;;  %v7922_v55 = vld [vmem:[%s9197_s3 + $0x10] sm:$0xff]   ;;  %v7923_v45 = vld [vmem:[%s9197_s3 + $0x18] sm:$0xff]  }
 0x314   : > { %v3513_v14 = vmul.f32 0.2, %v3497_v47  ;;  %vm3500_vm14 = vcmp.gt.f32.partialorder %v3492_v48, 0.0  ;;  %vm3501_vm6 = vcmp.gt.f32.partialorder %v3493_v50, 0.0  ;;  %v3508_v41 = vmul.f32 0.2, %v3492_v48 }
 0x315   : > { %v3509_v42 = vmul.f32 0.2, %v3493_v50  ;;  %vm3502_vm7 = vcmp.gt.f32.partialorder %v3494_v58, 0.0  ;;  %vm3503_vm8 = vcmp.gt.f32.partialorder %v3495_v38, 0.0  ;;  %v3510_v51 = vmul.f32 0.2, %v3494_v58 }
 0x316   : > { %v3516_v56 = vsel %vm3500_vm14, %v3492_v48, %v3508_v41  ;;  %v3511_v33 = vmul.f32 0.2, %v3495_v38  ;;  %vm3504_vm9 = vcmp.gt.f32.partialorder %v3496_v18, 0.0  ;;  %vm3505_vm10 = vcmp.gt.f32.partialorder %v3497_v47, 0.0 }
 0x317   : > { %v3517_v24 = vsel %vm3501_vm6, %v3493_v50, %v3509_v42  ;;  %v3518_v15 = vsel %vm3502_vm7, %v3494_v58, %v3510_v51  ;;  %v3512_v40 = vmul.f32 0.2, %v3496_v18  ;;  %v3521_v62 = vsel %vm3505_vm10, %v3497_v47, %v3513_v14  ;;  %v7939_v50 = vld [vmem:[%s9198_s4 + $0x18] sm:$0xff]  }
 0x318   : > { %v3556_v52 = vpack.c.bf16 %v3517_v24, %v3516_v56  ;;  %v3519_v63 = vsel %vm3503_vm8, %v3495_v38, %v3511_v33  ;;  %vm3506_vm11 = vcmp.gt.f32.partialorder %v3498_v21, 0.0  ;;  %vm3507_vm12 = vcmp.gt.f32.partialorder %v3499_v22, 0.0  ;;  %v7940_v33 = vld [vmem:[%s9198_s4 + $0x20] sm:$0xff]  }
 0x319   : > { %v3557_v23 = vpack.c.bf16 %v3519_v63, %v3518_v15  ;;  %v3520_v27 = vsel %vm3504_vm9, %v3496_v18, %v3512_v40  ;;  %v3514_v6 = vmul.f32 0.2, %v3498_v21  ;;  %v3515_v29 = vmul.f32 0.2, %v3499_v22 }
 0x31a   : > { %7268 = vmatprep.subr.bf16.mxu1 %v3556_v52  ;;  %v3558_v53 = vpack.c.bf16 %v3521_v62, %v3520_v27  ;;  %vm6114_vm14 = vcmask 1044480   ;;  %vm6313_vm7 = vcmask 3072  }
 0x31b   : > { %7269 = vmatpush3.bf16.msra.mxu1 %v3556_v52  ;;  %v3522_v19 = vsel %vm3506_vm11, %v3498_v21, %v3514_v6  ;;  %v3523_v46 = vsel %vm3507_vm12, %v3499_v22, %v3515_v29  ;;  %v7941_v6 = vld [vmem:[%s9198_s4 + $0x28] sm:$0xff]  }
 0x31c   : > { %7270 = vmatprep.subr.bf16.mxu1 %v3557_v23  ;;  %v3559_v34 = vpack.c.bf16 %v3523_v46, %v3522_v19 }
 0x31f   : > { %7271 = vmatpush3.bf16.msra.mxu1 %v3557_v23 }
 0x320   : > { %7272 = vmatprep.subr.bf16.mxu1 %v3558_v53 }
 0x323   : > { %7273 = vmatpush3.bf16.msra.mxu1 %v3558_v53 }
 0x324   : > { %7274 = vmatprep.subr.bf16.mxu1 %v3559_v34 }
 0x327   : > { %7275 = vmatpush3.bf16.msra.mxu1 %v3559_v34 }
 0x328   : > { %7404 = vmatprep.subr.bf16.mxu1 %v8011_v11 }
 0x32a   : > { %7277 = vmatmul.mubr.msk.bf16.vlgmr.msra.gmra.mrb[32].mxu1 %vm3640_vm4, %v7921_v44 }
 0x32b   : > { %7280 = vmatprep.mubr.msk.bf16.mxu1 %vm3640_vm4, %v7922_v55 }
 0x332   : > { %7281 = vmatmul.mubr.msk.bf16.gmra.mrb[36].mxu1 %vm3640_vm4, %v7923_v45 }
 0x333   : > { %7284 = vmatprep.mubr.msk.bf16.mxu1 %vm3640_vm4, %v7924_v37 }
 0x33a   : > { %7285 = vmatmul.mubr.msk.bf16.gmra.mrb[40].mxu1 %vm3640_vm4, %v7925_v12 }
 0x33b   : > { %7288 = vmatprep.mubr.msk.bf16.mxu1 %vm3640_vm4, %v7926_v31  ;;  %v7942_v31 = vld [vmem:[%s9198_s4 + $0x30] sm:$0xff]  }
 0x342   : > { %7289 = vmatmul.mubr.msk.bf16.gmra.mrb[44].mxu1 %vm3640_vm4, %v7927_v20  ;;  %v7943_v20 = vld [vmem:[%s9198_s4 + $0x38] sm:$0xff]  }
 0x343   : > { %7292 = vmatprep.mubr.msk.bf16.mxu1 %vm3640_vm4, %v7929_v54  ;;  %v7944_v54 = vld [vmem:[%s9198_s4 + $0x40] sm:$0xff]  }
 0x34a   : > { %7293 = vmatmul.mubr.msk.bf16.gmra.mrb[48].mxu1 %vm3640_vm4, %v7930_v1  ;;  %v7945_v1 = vld [vmem:[%s9198_s4 + $0x48] sm:$0xff]  }
 0x34b   : > { %7296 = vmatprep.mubr.msk.bf16.mxu1 %vm3640_vm4, %v7931_v9  ;;  %v7946_v9 = vld [vmem:[%s9198_s4 + $0x50] sm:$0xff]  }
 0x352   : > { %7297 = vmatmul.mubr.msk.bf16.gmra.mrb[52].mxu1 %vm3640_vm4, %v7932_v17  ;;  %v7947_v17 = vld [vmem:[%s9198_s4 + $0x58] sm:$0xff]  }
 0x353   : > { %7300 = vmatprep.mubr.msk.bf16.mxu1 %vm3640_vm4, %v7933_v36  ;;  %v7948_v36 = vld [vmem:[%s9198_s4 + $0x60] sm:$0xff]  }
 0x35a   : > { %7301 = vmatmul.mubr.msk.bf16.gmra.mrb[56].mxu1 %vm3640_vm4, %v7934_v4  ;;  %v7949_v4 = vld [vmem:[%s9198_s4 + $0x68] sm:$0xff]  }
 0x35b   : > { %7304 = vmatprep.mubr.msk.bf16.mxu1 %vm3640_vm4, %v7935_v25  ;;  %v7950_v25 = vld [vmem:[%s9198_s4 + $0x70] sm:$0xff]  }
 0x362   : > { %7305 = vmatmul.mubr.msk.bf16.gmra.mrb[60].mxu1 %vm3640_vm4, %v7936_v61  ;;  %v7951_v61 = vld [vmem:[%s9198_s4 + $0x78] sm:$0xff]  }
 0x363   : > { %7406 = vmatprep.mubr.msk.bf16.mxu1 %vm8012_vm13, %v8011_v11 }
 0x3fd   : > { %v7278_v30 = vpop.f32.mrb[32].mxu1 }
 0x3fe   : > { %v3723_v8 = vpop.f32.mrb[33].mxu1 }
 0x3ff   : > { %v7279_v7 = vpop.f32.mrb[34].mxu1 }
 0x400   : > { %v3853_v3 = vpack.c.bf16 %v7279_v7, %v7278_v30  ;;  %v3726_v43 = vpop.f32.mrb[35].mxu1 }
 0x401   : > { %v3850_v39 = vpack.c.bf16 %v3726_v43, %v3723_v8 }
 0x402   : > { %7311 = vmatmul.mubr.msk.bf16.vlgmr.msra.gmra.mrb[104].mxu0 %vm3428_vm5, %v3853_v3 }
 0x403   : > { %7315 = vmatpush3.bf16.msra.mxu0 %v7937_v0  ;;  %7316 = vmatprep.mubr.msk.bf16.mxu0 %vm8012_vm13, %v8011_v11 }
 0x404   : > { %7320 = vmatprep.subr.bf16.mxu0 %v8011_v11 }
 0x405   : > { %v7282_v5 = vpop.f32.mrb[36].mxu1 }
 0x406   : > { %v3739_v2 = vpop.f32.mrb[37].mxu1 }
 0x407   : > { %v7283_v10 = vpop.f32.mrb[38].mxu1 }
 0x408   : > { %v4011_v49 = vpack.c.bf16 %v7283_v10, %v7282_v5  ;;  %v3742_v57 = vpop.f32.mrb[39].mxu1 }
 0x409   : > { %v3956_v59 = vpack.c.bf16 %v3742_v57, %v3739_v2 }
 0x40d   : > { %v7286_v13 = vpop.f32.mrb[40].mxu1 }
 0x40e   : > { %7317 = vmatmul.mubr.msk.bf16.vlgmr.msra.gmra.mrb[104].mxu0 %vm3428_vm5, %v3850_v39  ;;  %v3755_v16 = vpop.f32.mrb[41].mxu1 }
 0x40f   : > { %7321 = vmatpush3.bf16.msra.mxu0 %v7938_v60  ;;  %7322 = vmatprep.mubr.msk.bf16.mxu0 %vm8012_vm13, %v8011_v11  ;;  %v7287_v26 = vpop.f32.mrb[42].mxu1 }
 0x410   : > { %7326 = vmatprep.subr.bf16.mxu0 %v8011_v11  ;;  %v4121_v32 = vpack.c.bf16 %v7287_v26, %v7286_v13  ;;  %v3758_v35 = vpop.f32.mrb[43].mxu1 }
 0x411   : > { %v4066_v28 = vpack.c.bf16 %v3758_v35, %v3755_v16 }
 0x415   : > { %v7290_v47 = vpop.f32.mrb[44].mxu1 }
 0x416   : > { %v3771_v48 = vpop.f32.mrb[45].mxu1 }
 0x417   : > { %v7291_v58 = vpop.f32.mrb[46].mxu1 }
 0x418   : > { %v4231_v38 = vpack.c.bf16 %v7291_v58, %v7290_v47  ;;  %v3774_v18 = vpop.f32.mrb[47].mxu1 }
 0x419   : > { %v4176_v21 = vpack.c.bf16 %v3774_v18, %v3771_v48 }
 0x41a   : > { %7323 = vmatmul.mubr.msk.bf16.vlgmr.msra.gmra.mrb[104].mxu0 %vm3428_vm5, %v3956_v59 }
 0x41b   : > { %7327 = vmatpush3.bf16.msra.mxu0 %v7939_v50  ;;  %7328 = vmatprep.mubr.msk.bf16.mxu0 %vm8012_vm13, %v8011_v11 }
 0x41c   : > { %7332 = vmatprep.subr.bf16.mxu0 %v8011_v11 }
 0x41d   : > { %v7294_v22 = vpop.f32.mrb[48].mxu1 }
 0x41e   : > { %v3787_v14 = vpop.f32.mrb[49].mxu1 }
 0x41f   : > { %v7295_v41 = vpop.f32.mrb[50].mxu1 }
 0x420   : > { %v4341_v42 = vpack.c.bf16 %v7295_v41, %v7294_v22  ;;  %v3790_v51 = vpop.f32.mrb[51].mxu1 }
 0x421   : > { %v4286_v56 = vpack.c.bf16 %v3790_v51, %v3787_v14 }
 0x425   : > { %v7298_v24 = vpop.f32.mrb[52].mxu1 }
 0x426   : > { %7329 = vmatmul.mubr.msk.bf16.vlgmr.msra.gmra.mrb[104].mxu0 %vm3428_vm5, %v4011_v49  ;;  %v3803_v15 = vpop.f32.mrb[53].mxu1 }
 0x427   : > { %7333 = vmatpush3.bf16.msra.mxu0 %v7940_v33  ;;  %7334 = vmatprep.mubr.msk.bf16.mxu0 %vm8012_vm13, %v8011_v11  ;;  %v7299_v40 = vpop.f32.mrb[54].mxu1 }
 0x428   : > { %7338 = vmatprep.subr.bf16.mxu0 %v8011_v11  ;;  %v4451_v62 = vpack.c.bf16 %v7299_v40, %v7298_v24  ;;  %v3806_v52 = vpop.f32.mrb[55].mxu1 }
 0x429   : > { %v4396_v63 = vpack.c.bf16 %v3806_v52, %v3803_v15  ;;  %v7953_v52 = vld [vmem:[%s9199_s5 + $0x8] sm:$0xff]  }
 0x42d   : > { %v7302_v23 = vpop.f32.mrb[56].mxu1 }
 0x42e   : > { %v3819_v27 = vpop.f32.mrb[57].mxu1 }
 0x42f   : > { %v7303_v29 = vpop.f32.mrb[58].mxu1 }
 0x430   : > { %v4561_v53 = vpack.c.bf16 %v7303_v29, %v7302_v23  ;;  %v3822_v19 = vpop.f32.mrb[59].mxu1  ;;  %v7955_v23 = vld [vmem:[%s9199_s5 + $0x18] sm:$0xff]   ;;  %v7958_v29 = vld [vmem:[%s9199_s5 + $0x30] sm:$0xff]  }
 0x431   : > { %v4506_v46 = vpack.c.bf16 %v3822_v19, %v3819_v27  ;;  %v7956_v27 = vld [vmem:[%s9199_s5 + $0x20] sm:$0xff]  }
 0x432   : > { %7335 = vmatmul.mubr.msk.bf16.vlgmr.msra.gmra.mrb[104].mxu0 %vm3428_vm5, %v4066_v28  ;;  %v7960_v19 = vld [vmem:[%s9199_s5 + $0x40] sm:$0xff]  }
 0x433   : > { %7339 = vmatpush3.bf16.msra.mxu0 %v7941_v6  ;;  %7340 = vmatprep.mubr.msk.bf16.mxu0 %vm8012_vm13, %v8011_v11  ;;  %v7957_v6 = vld [vmem:[%s9199_s5 + $0x28] sm:$0xff]  }
 0x434   : > { %7344 = vmatprep.subr.bf16.mxu0 %v8011_v11 }
 0x435   : > { %v7306_v34 = vpop.f32.mrb[60].mxu1 }
 0x436   : > { %v3835_v44 = vpop.f32.mrb[61].mxu1 }
 0x437   : > { %v7307_v55 = vpop.f32.mrb[62].mxu1 }
 0x438   : > { %v4671_v45 = vpack.c.bf16 %v7307_v55, %v7306_v34  ;;  %v3838_v37 = vpop.f32.mrb[63].mxu1  ;;  %v7962_v34 = vld [vmem:[%s9200_s6 + $0x18] sm:$0xff]  }
 0x439   : > { %v4616_v12 = vpack.c.bf16 %v3838_v37, %v3835_v44 }
 0x43e   : > { %7341 = vmatmul.mubr.msk.bf16.vlgmr.msra.gmra.mrb[104].mxu0 %vm3428_vm5, %v4121_v32 }
 0x43f   : > { %7345 = vmatpush3.bf16.msra.mxu0 %v7942_v31  ;;  %7346 = vmatprep.mubr.msk.bf16.mxu0 %vm8012_vm13, %v8011_v11 }
 0x440   : > { %7350 = vmatprep.subr.bf16.mxu0 %v8011_v11 }
 0x44a   : > { %7347 = vmatmul.mubr.msk.bf16.vlgmr.msra.gmra.mrb[104].mxu0 %vm3428_vm5, %v4176_v21 }
 0x44b   : > { %7351 = vmatpush3.bf16.msra.mxu0 %v7943_v20  ;;  %7352 = vmatprep.mubr.msk.bf16.mxu0 %vm8012_vm13, %v8011_v11 }
 0x44c   : > { %7356 = vmatprep.subr.bf16.mxu0 %v8011_v11 }
 0x456   : > { %7353 = vmatmul.mubr.msk.bf16.vlgmr.msra.gmra.mrb[104].mxu0 %vm3428_vm5, %v4231_v38 }
 0x457   : > { %7357 = vmatpush3.bf16.msra.mxu0 %v7944_v54  ;;  %7358 = vmatprep.mubr.msk.bf16.mxu0 %vm8012_vm13, %v8011_v11 }
 0x458   : > { %7362 = vmatprep.subr.bf16.mxu0 %v8011_v11 }
 0x462   : > { %7359 = vmatmul.mubr.msk.bf16.vlgmr.msra.gmra.mrb[104].mxu0 %vm3428_vm5, %v4286_v56 }
 0x463   : > { %7363 = vmatpush3.bf16.msra.mxu0 %v7945_v1  ;;  %7364 = vmatprep.mubr.msk.bf16.mxu0 %vm8012_vm13, %v8011_v11 }
 0x464   : > { %7368 = vmatprep.subr.bf16.mxu0 %v8011_v11 }
 0x46e   : > { %7365 = vmatmul.mubr.msk.bf16.vlgmr.msra.gmra.mrb[104].mxu0 %vm3428_vm5, %v4341_v42 }
 0x46f   : > { %7369 = vmatpush3.bf16.msra.mxu0 %v7946_v9  ;;  %7370 = vmatprep.mubr.msk.bf16.mxu0 %vm8012_vm13, %v8011_v11 }
 0x470   : > { %7374 = vmatprep.subr.bf16.mxu0 %v8011_v11 }
 0x47a   : > { %7371 = vmatmul.mubr.msk.bf16.vlgmr.msra.gmra.mrb[104].mxu0 %vm3428_vm5, %v4396_v63  ;;  %v7954_v63 = vld [vmem:[%s9199_s5 + $0x10] sm:$0xff]  }
 0x47b   : > { %7375 = vmatpush3.bf16.msra.mxu0 %v7947_v17  ;;  %7376 = vmatprep.mubr.msk.bf16.mxu0 %vm8012_vm13, %v8011_v11 }
 0x47c   : > { %7380 = vmatprep.subr.bf16.mxu0 %v8011_v11 }
 0x486   : > { %7377 = vmatmul.mubr.msk.bf16.vlgmr.msra.gmra.mrb[104].mxu0 %vm3428_vm5, %v4451_v62  ;;  %v7952_v62 = vld [vmem:[%s9199_s5] sm:$0xff]  }
 0x487   : > { %7381 = vmatpush3.bf16.msra.mxu0 %v7948_v36  ;;  %7382 = vmatprep.mubr.msk.bf16.mxu0 %vm8012_vm13, %v8011_v11 }
 0x488   : > { %7386 = vmatprep.subr.bf16.mxu0 %v8011_v11 }
 0x492   : > { %7383 = vmatmul.mubr.msk.bf16.vlgmr.msra.gmra.mrb[104].mxu0 %vm3428_vm5, %v4506_v46  ;;  %v7961_v46 = vld [vmem:[%s9200_s6 + $0x10] sm:$0xff]  }
 0x493   : > { %7387 = vmatpush3.bf16.msra.mxu0 %v7949_v4  ;;  %7388 = vmatprep.mubr.msk.bf16.mxu0 %vm8012_vm13, %v8011_v11 }
 0x494   : > { %7392 = vmatprep.subr.bf16.mxu0 %v8011_v11 }
 0x49e   : > { %7389 = vmatmul.mubr.msk.bf16.vlgmr.msra.gmra.mrb[104].mxu0 %vm3428_vm5, %v4561_v53  ;;  %v7959_v53 = vld [vmem:[%s9199_s5 + $0x38] sm:$0xff]  }
 0x49f   : > { %7393 = vmatpush3.bf16.msra.mxu0 %v7950_v25  ;;  %7394 = vmatprep.mubr.msk.bf16.mxu0 %vm8012_vm13, %v8011_v11 }
 0x4a0   : > { %7398 = vmatprep.subr.bf16.mxu0 %v8011_v11 }
 0x4aa   : > { %7395 = vmatmul.mubr.msk.bf16.vlgmr.msra.gmra.mrb[104].mxu0 %vm3428_vm5, %v4616_v12 }
 0x4ab   : > { %7399 = vmatpush3.bf16.msra.mxu0 %v7951_v61  ;;  %7400 = vmatprep.mubr.msk.bf16.mxu0 %vm8012_vm13, %v8011_v11  ;;  %v7963_v61 = vld [vmem:[%s9200_s6] sm:$0xff]  }
 0x4ac   : > { %7442 = vmatprep.subr.bf16.mxu0 %v8011_v11 }
 0x4b6   : > { %7401 = vmatmul.mubr.msk.bf16.vlgmr.msra.gmra.mrb[104].mxu0 %vm3428_vm5, %v4671_v45 }
 0x4b7   : > { %7446 = vmatprep.mubr.msk.bf16.mxu0 %vm8012_vm13, %v8011_v11  ;;  %7443 = vmatpush3.bf16.msra.mxu0 %v7961_v46 }
 0x4b8   : > { %7444 = vmatprep.subr.bf16.mxu0 %v8011_v11 }
 0x4bb   : > { %7445 = vmatpush3.bf16.msra.mxu0 %v7962_v34 }
 0x4bc   : > { %7450 = vmatprep.subr.bf16.mxu0 %v8011_v11 }
 0x589   : > { %v4717_v30 = vpop.f32.mrb[104].mxu0 }
 0x58a   : > { %v7402_v8 = vpop.f32.mrb[105].mxu0  ;;  %v4727_v0 = vsel %vm4726_vm15, %v4717_v30, 0.0 }
 0x58b   : > { %v4720_v7 = vpop.f32.mrb[106].mxu0 }
 0x58c   : > { %v4728_v3 = vsel %vm4726_vm15, %v4720_v7, 0.0  ;;  %v7403_v43 = vpop.f32.mrb[107].mxu0 }
 0x58d   : > { %v4729_v39 = vadd.f32 %v4728_v3, %v4727_v0  ;;  %v7964_v3 = vld [vmem:[%s9200_s6 + $0x8] sm:$0xff]  }
 0x58f   : > { %v4730_v5 = vrot.slane %v4729_v39, 4 }
 0x591   : > { %v4731_v2 = vadd.f32 %v4730_v5, %v4729_v39 }
 0x593   : > { %v4732_v10 = vrot.slane %v4731_v2, 2 }
 0x595   : > { %v4733_v49 = vadd.f32 %v4732_v10, %v4731_v2 }
 0x597   : > { %v4734_v57 = vrot.slane %v4733_v49, 1 }
 0x599   : > { %v4735_v59 = vadd.f32 %v4734_v57, %v4733_v49  ;;  %v7965_v57 = vld [vmem:[%s9200_s6 + $0x20] sm:$0xff]  }
 0x59b   : > { %v4737_v60 = vmul.f32 0.0625, %v4735_v59 }
 0x59d   : > { %v4738_v13 = vsub.f32 %v4717_v30, %v4737_v60  ;;  %v4739_v16 = vsub.f32 %v4720_v7, %v4737_v60 }
 0x59f   : > { %v4740_v26 = vmul.f32 %v4738_v13, %v4738_v13  ;;  %v4741_v32 = vmul.f32 %v4739_v16, %v4739_v16 }
 0x5a1   : > { %v4742_v35 = vsel %vm4726_vm15, %v4740_v26, 0.0  ;;  %v4743_v28 = vsel %vm4726_vm15, %v4741_v32, 0.0 }
 0x5a2   : > { %v4744_v47 = vadd.f32 %v4743_v28, %v4742_v35 }
 0x5a4   : > { %v4745_v48 = vrot.slane %v4744_v47, 4 }
 0x5a6   : > { %v4746_v50 = vadd.f32 %v4745_v48, %v4744_v47  ;;  %v7967_v48 = vld [vmem:[%s9200_s6 + $0x30] sm:$0xff]  }
 0x5a8   : > { %v4747_v58 = vrot.slane %v4746_v50, 2 }
 0x5aa   : > { %v4748_v38 = vadd.f32 %v4747_v58, %v4746_v50 }
 0x5ac   : > { %v4749_v18 = vrot.slane %v4748_v38, 1 }
 0x5ae   : > { %v4750_v21 = vadd.f32 %v4749_v18, %v4748_v38 }
 0x5b0   : > { %v4751_v22 = vmul.f32 0.0625, %v4750_v21  ;;  %v7968_v21 = vld [vmem:[%s9200_s6 + $0x38] sm:$0xff]  }
 0x5b2   : > { %v4752_v14 = vadd.f32 1e-05, %v4751_v22 }
 0x5b4   : > { %7999 = vrsqrt.f32 %v4752_v14 }
 0x5be   : > { %v8000_v41 = vpop.eup %7999 }
 0x5bf   : > { %v4754_v42 = vmul.f32 %v8000_v41, %v4738_v13  ;;  %v4755_v51 = vmul.f32 %v8000_v41, %v4739_v16  ;;  %v7966_v16 = vld [vmem:[%s9200_s6 + $0x28] sm:$0xff]  }
 0x5c1   : > { %vm4757_vm0 = vcmp.gt.f32.partialorder %v4755_v51, 0.0  ;;  %v4758_v56 = vmul.f32 0.2, %v4754_v42  ;;  %v4759_v33 = vmul.f32 0.2, %v4755_v51  ;;  %vm4756_vm2 = vcmp.gt.f32.partialorder %v4754_v42, 0.0 }
 0x5c3   : > { %v4761_v24 = vsel %vm4757_vm0, %v4755_v51, %v4759_v33  ;;  %v4760_v15 = vsel %vm4756_vm2, %v4754_v42, %v4758_v56 }
 0x5c4   : > { %v4780_v40 = vpack.c.bf16 %v4761_v24, %v4760_v15 }
 0x5c6   : > { %7405 = vmatpush3.bf16.msra.mxu1 %v4780_v40 }
 0x5c9   : > { %7407 = vmatmul.mubr.msk.bf16.vlgmr.msra.gmra.mrb[64].mxu1 %vm3428_vm5, %v7952_v62  ;;  %v7969_v62 = vld [vmem:[%s9200_s6 + $0x40] sm:$0xff]  }
 0x5ca   : > { %7410 = vmatprep.mubr.msk.bf16.mxu1 %vm8012_vm13, %v8011_v11 }
 0x5d1   : > { %7411 = vmatmul.mubr.msk.bf16.gmra.mrb[68].mxu1 %vm3428_vm5, %v7953_v52 }
 0x5d2   : > { %7414 = vmatprep.mubr.msk.bf16.mxu1 %vm8012_vm13, %v8011_v11 }
 0x5d9   : > { %7415 = vmatmul.mubr.msk.bf16.gmra.mrb[72].mxu1 %vm3428_vm5, %v7954_v63 }
 0x5da   : > { %7418 = vmatprep.mubr.msk.bf16.mxu1 %vm8012_vm13, %v8011_v11 }
 0x5e1   : > { %7419 = vmatmul.mubr.msk.bf16.gmra.mrb[76].mxu1 %vm3428_vm5, %v7955_v23 }
 0x5e2   : > { %7422 = vmatprep.mubr.msk.bf16.mxu1 %vm8012_vm13, %v8011_v11 }
 0x5e9   : > { %7423 = vmatmul.mubr.msk.bf16.gmra.mrb[80].mxu1 %vm3428_vm5, %v7956_v27 }
 0x5ea   : > { %7426 = vmatprep.mubr.msk.bf16.mxu1 %vm8012_vm13, %v8011_v11 }
 0x5f1   : > { %7427 = vmatmul.mubr.msk.bf16.gmra.mrb[84].mxu1 %vm3428_vm5, %v7957_v6  ;;  %v7970_v6 = vld [vmem:[%s9200_s6 + $0x48] sm:$0xff]  }
 0x5f2   : > { %7430 = vmatprep.mubr.msk.bf16.mxu1 %vm8012_vm13, %v8011_v11 }
 0x5f9   : > { %7431 = vmatmul.mubr.msk.bf16.gmra.mrb[88].mxu1 %vm3428_vm5, %v7958_v29 }
 0x5fa   : > { %7434 = vmatprep.mubr.msk.bf16.mxu1 %vm8012_vm13, %v8011_v11 }
 0x601   : > { %7435 = vmatmul.mubr.msk.bf16.gmra.mrb[92].mxu1 %vm3428_vm5, %v7959_v53 }
 0x602   : > { %7438 = vmatprep.mubr.msk.bf16.mxu1 %vm8012_vm13, %v8011_v11 }
 0x609   : > { %7439 = vmatmul.mubr.msk.bf16.gmra.mrb[96].mxu1 %vm3428_vm5, %v7960_v19  ;;  %vm6037_vm5 = vcmask 516096  }
 0x69c   : > { %v4887_v44 = vpop.f32.mrb[64].mxu1 }
 0x69d   : > { %v7408_v55 = vpop.f32.mrb[65].mxu1 }
 0x69e   : > { %v4890_v45 = vpop.f32.mrb[66].mxu1  ;;  %v7971_v55 = vld [vmem:[%s9200_s6 + $0x50] sm:$0xff]  }
 0x69f   : > { %v4958_v37 = vpack.c.bf16 %v4890_v45, %v4887_v44  ;;  %v7409_v12 = vpop.f32.mrb[67].mxu1 }
 0x6a4   : > { %v4895_v31 = vpop.f32.mrb[68].mxu1 }
 0x6a5   : > { %v4963_v20 = vpack.c.bf16 %v4895_v31, %v4890_v45  ;;  %v7412_v54 = vpop.f32.mrb[69].mxu1 }
 0x6a6   : > { %v4898_v1 = vpop.f32.mrb[70].mxu1 }
 0x6a7   : > { %v4971_v9 = vshll.u32 %v4963_v20, 16  ;;  %v5087_v17 = vpack.c.bf16 %v4898_v1, %v4895_v31  ;;  %v7413_v36 = vpop.f32.mrb[71].mxu1  ;;  %v4969_v4 = vshrl.u32 %v4963_v20, 16  ;;  %v7972_v20 = vld [vmem:[%s9200_s6 + $0x58] sm:$0xff]  }
 0x6a9   : > { %v4973_v25 = vrot.slane %v4971_v9, 1  ;;  %v5093_v50 = vrot.slane %v5087_v17, 1 }
 0x6ab   : > { %v4974_v30 = vor.u32 %v4973_v25, %v4969_v4 }
 0x6ac   : > { %v8899_v8 = vpop.f32.mrb[72].mxu1 }
 0x6ad   : > { %v5152_v7 = vpack.c.bf16 %v8899_v8, %v4898_v1  ;;  %7447 = vmatmul.mubr.msk.bf16.vlgmr.msra.gmra.mrb[108].mxu0 %vm4726_vm15, %v4974_v30  ;;  %v7416_v0 = vpop.f32.mrb[73].mxu1 }
 0x6ae   : > { %7451 = vmatpush3.bf16.msra.mxu0 %v7963_v61  ;;  %7454 = vmatprep.mubr.msk.bf16.mxu0 %vm8012_vm13, %v8011_v11  ;;  %v8908_v43 = vpop.f32.mrb[74].mxu1  ;;  %v7973_v61 = vld [vmem:[%s9200_s6 + $0x60] sm:$0xff]  }
 0x6af   : > { %7452 = vmatprep.subr.bf16.mxu0 %v8011_v11  ;;  %v5223_v39 = vpack.c.bf16 %v8908_v43, %v8899_v8  ;;  %v7417_v5 = vpop.f32.mrb[75].mxu1  ;;  %v5158_v14 = vshrl.u32 %v5152_v7, 16  ;;  %v5161_v41 = vshll.u32 %v5152_v7, 16  ;;  %v7974_v8 = vld [vmem:[%s9200_s6 + $0x68] sm:$0xff]   ;;  %v7975_v7 = vld [vmem:[%s9200_s6 + $0x70] sm:$0xff]  }
 0x6b1   : > { %v5160_v56 = vrot.slane %v5158_v14, 1  ;;  %v5163_v33 = vrot.slane %v5161_v41, 2  ;;  %v5229_v45 = vrot.slane %v5223_v39, 2  ;;  %v7986_v41 = vld [vmem:[%s9200_s6 + $0xc8] sm:$0xff]  }
 0x6b2   : > { %7453 = vmatpush3.bf16.msra.mxu0 %v7964_v3  ;;  %v7976_v3 = vld [vmem:[%s9200_s6 + $0x78] sm:$0xff]  }
 0x6b3   : > { %7458 = vmatprep.subr.bf16.mxu0 %v8011_v11  ;;  %v5164_v63 = vor.u32 %v5163_v33, %v5160_v56  ;;  %v7988_v56 = vld [vmem:[%s9200_s6 + $0xd8] sm:$0xff]  }
 0x6b4   : > { %v8914_v2 = vpop.f32.mrb[76].mxu1 }
 0x6b5   : > { %v8918_v10 = vpack.c.bf16 %v8914_v2, %v8908_v43  ;;  %v7420_v49 = vpop.f32.mrb[77].mxu1 }
 0x6b6   : > { %v8923_v59 = vpop.f32.mrb[78].mxu1 }
 0x6b7   : > { %v5359_v60 = vpack.c.bf16 %v8923_v59, %v8914_v2  ;;  %v7421_v13 = vpop.f32.mrb[79].mxu1  ;;  %v5294_v1 = vshrl.u32 %v8918_v10, 16  ;;  %v5297_v9 = vshll.u32 %v8918_v10, 16  ;;  %v7977_v10 = vld [vmem:[%s9200_s6 + $0x80] sm:$0xff]  }
 0x6b9   : > { %7455 = vmatmul.mubr.msk.bf16.vlgmr.msra.gmra.mrb[108].mxu0 %vm4726_vm15, %v4958_v37  ;;  %v5296_v4 = vrot.slane %v5294_v1, 2  ;;  %v5299_v25 = vrot.slane %v5297_v9, 3  ;;  %v5365_v0 = vrot.slane %v5359_v60, 3  ;;  %v7980_v60 = vld [vmem:[%s9200_s6 + $0x98] sm:$0xff]  }
 0x6ba   : > { %7459 = vmatpush3.bf16.msra.mxu0 %v7965_v57  ;;  %7462 = vmatprep.mubr.msk.bf16.mxu0 %vm8012_vm13, %v8011_v11  ;;  %v7978_v57 = vld [vmem:[%s9200_s6 + $0x88] sm:$0xff]  }
 0x6bb   : > { %7460 = vmatprep.subr.bf16.mxu0 %v8011_v11  ;;  %v5300_v30 = vor.u32 %v5299_v25, %v5296_v4 }
 0x6bc   : > { %v4919_v26 = vpop.f32.mrb[80].mxu1 }
 0x6bd   : > { %v8935_v32 = vpack.c.bf16 %v4919_v26, %v8923_v59  ;;  %v7424_v35 = vpop.f32.mrb[81].mxu1  ;;  %v7979_v59 = vld [vmem:[%s9200_s6 + $0x90] sm:$0xff]  }
 0x6be   : > { %7461 = vmatpush3.bf16.msra.mxu0 %v7966_v16  ;;  %v8937_v28 = vpop.f32.mrb[82].mxu1 }
 0x6bf   : > { %7466 = vmatprep.subr.bf16.mxu0 %v8011_v11  ;;  %v7425_v47 = vpop.f32.mrb[83].mxu1  ;;  %v5430_v43 = vshrl.u32 %v8935_v32, 16  ;;  %v5433_v39 = vshll.u32 %v8935_v32, 16  ;;  %v7981_v32 = vld [vmem:[%s9200_s6 + $0xa0] sm:$0xff]  }
 0x6c0   : > { %v7983_v47 = vld [vmem:[%s9200_s6 + $0xb0] sm:$0xff]  }
 0x6c1   : > { %v5432_v5 = vrot.slane %v5430_v43, 3  ;;  %v5435_v2 = vrot.slane %v5433_v39, 4 }
 0x6c3   : > { %v5436_v49 = vor.u32 %v5435_v2, %v5432_v5 }
 0x6c4   : > { %v8943_v58 = vpop.f32.mrb[84].mxu1 }
 0x6c5   : > { %7463 = vmatmul.mubr.msk.bf16.vlgmr.msra.gmra.mrb[108].mxu0 %vm4726_vm15, %v5093_v50  ;;  %v5495_v38 = vpack.c.bf16 %v8943_v58, %v8937_v28  ;;  %v7428_v18 = vpop.f32.mrb[85].mxu1  ;;  %v7982_v28 = vld [vmem:[%s9200_s6 + $0xa8] sm:$0xff]   ;;  %v7984_v50 = vld [vmem:[%s9200_s6 + $0xb8] sm:$0xff]  }
 0x6c6   : > { %7467 = vmatpush3.bf16.msra.mxu0 %v7967_v48  ;;  %7470 = vmatprep.mubr.msk.bf16.mxu0 %vm8012_vm13, %v8011_v11  ;;  %v8953_v22 = vpop.f32.mrb[86].mxu1 }
 0x6c7   : > { %7468 = vmatprep.subr.bf16.mxu0 %v8011_v11  ;;  %v8958_v42 = vpack.c.bf16 %v8953_v22, %v8943_v58  ;;  %v7429_v51 = vpop.f32.mrb[87].mxu1 }
 0x6c9   : > { %v5566_v13 = vshll.u32 %v8958_v42, 16  ;;  %v5564_v16 = vshrl.u32 %v8958_v42, 16  ;;  %v7987_v42 = vld [vmem:[%s9200_s6 + $0xd0] sm:$0xff]  }
 0x6ca   : > { %7469 = vmatpush3.bf16.msra.mxu0 %v7968_v21 }
 0x6cb   : > { %7474 = vmatprep.subr.bf16.mxu0 %v8011_v11  ;;  %v5568_v26 = vrot.slane %v5566_v13, 1 }
 0x6cc   : > { %v8961_v24 = vpop.f32.mrb[88].mxu1 }
 0x6cd   : > { %v5628_v15 = vpack.c.bf16 %v8961_v24, %v8953_v22  ;;  %v7432_v40 = vpop.f32.mrb[89].mxu1  ;;  %v5569_v35 = vor.u32 %v5568_v26, %v5564_v16  ;;  %v7985_v22 = vld [vmem:[%s9200_s6 + $0xc0] sm:$0xff]  }
 0x6ce   : > { %v8968_v52 = vpop.f32.mrb[90].mxu1 }
 0x6cf   : > { %v8972_v23 = vpack.c.bf16 %v8968_v52, %v8961_v24  ;;  %v7433_v27 = vpop.f32.mrb[91].mxu1  ;;  %v5634_v48 = vrot.slane %v5628_v15, 1 }
 0x6d1   : > { %7471 = vmatmul.mubr.msk.bf16.vlgmr.msra.gmra.mrb[108].mxu0 %vm4726_vm15, %v5164_v63  ;;  %v5699_v58 = vshrl.u32 %v8972_v23, 16  ;;  %v7990_v63 = vld [vmem:[%s9200_s6 + $0xe8] sm:$0xff]  }
 0x6d2   : > { %7475 = vmatpush3.bf16.msra.mxu0 %v7969_v62  ;;  %7478 = vmatprep.mubr.msk.bf16.mxu0 %vm8012_vm13, %v8011_v11  ;;  %v7989_v62 = vld [vmem:[%s9200_s6 + $0xe0] sm:$0xff]  }
 0x6d3   : > { %7476 = vmatprep.subr.bf16.mxu0 %v8011_v11  ;;  %v5701_v18 = vrot.slane %v5699_v58, 1 }
 0x6d4   : > { %v8981_v29 = vpop.f32.mrb[92].mxu1 }
 0x6d5   : > { %v5764_v53 = vpack.c.bf16 %v8981_v29, %v8968_v52  ;;  %v7436_v19 = vpop.f32.mrb[93].mxu1 }
 0x6d6   : > { %7477 = vmatpush3.bf16.msra.mxu0 %v7970_v6  ;;  %v8985_v46 = vpop.f32.mrb[94].mxu1  ;;  %v7992_v6 = vld [vmem:[%s9200_s6 + $0xf8] sm:$0xff]  }
 0x6d7   : > { %7482 = vmatprep.subr.bf16.mxu0 %v8011_v11  ;;  %v8990_v34 = vpack.c.bf16 %v8985_v46, %v8981_v29  ;;  %v7437_v44 = vpop.f32.mrb[95].mxu1  ;;  %v5770_v51 = vrot.slane %v5764_v53, 2 }
 0x6d8   : > { %v7993_v44 = vld [vmem:[%s9201_s7] sm:$0xff]  }
 0x6d9   : > { %v5835_v33 = vshrl.u32 %v8990_v34, 16  ;;  %v5838_v24 = vshll.u32 %v8990_v34, 16  ;;  %7572 = vmatprep.mubr.msk.bf16.mxu1 %vm6101_vm3, %v7993_v44 }
 0x6db   : > { %v5837_v15 = vrot.slane %v5835_v33, 2  ;;  %v5840_v40 = vrot.slane %v5838_v24, 3 }
 0x6dc   : > { %v8998_v37 = vpop.f32.mrb[96].mxu1 }
 0x6dd   : > { %7479 = vmatmul.mubr.msk.bf16.vlgmr.msra.gmra.mrb[108].mxu0 %vm4726_vm15, %v5229_v45  ;;  %v5900_v12 = vpack.c.bf16 %v8998_v37, %v8985_v46  ;;  %v7440_v31 = vpop.f32.mrb[97].mxu1  ;;  %v5841_v52 = vor.u32 %v5840_v40, %v5837_v15 }
 0x6de   : > { %7483 = vmatpush3.bf16.msra.mxu0 %v7971_v55  ;;  %7486 = vmatprep.mubr.msk.bf16.mxu0 %vm8012_vm13, %v8011_v11  ;;  %v4954_v54 = vpop.f32.mrb[98].mxu1 }
 0x6df   : > { %7484 = vmatprep.subr.bf16.mxu0 %v8011_v11  ;;  %v9012_v17 = vpack.c.bf16 %v4954_v54, %v8998_v37  ;;  %v7441_v36 = vpop.f32.mrb[99].mxu1  ;;  %v5906_v27 = vrot.slane %v5900_v12, 3 }
 0x6e1   : > { %v5971_v29 = vshrl.u32 %v9012_v17, 16  ;;  %v5974_v53 = vshll.u32 %v9012_v17, 16 }
 0x6e2   : > { %7485 = vmatpush3.bf16.msra.mxu0 %v7972_v20 }
 0x6e3   : > { %7490 = vmatprep.subr.bf16.mxu0 %v8011_v11  ;;  %v5973_v19 = vrot.slane %v5971_v29, 3  ;;  %v5976_v46 = vrot.slane %v5974_v53, 4 }
 0x6e5   : > { %v5977_v34 = vor.u32 %v5976_v46, %v5973_v19 }
 0x6e9   : > { %7487 = vmatmul.mubr.msk.bf16.vlgmr.msra.gmra.mrb[108].mxu0 %vm4726_vm15, %v5300_v30 }
 0x6ea   : > { %7491 = vmatpush3.bf16.msra.mxu0 %v7973_v61  ;;  %7494 = vmatprep.mubr.msk.bf16.mxu0 %vm8012_vm13, %v8011_v11 }
 0x6eb   : > { %7492 = vmatprep.subr.bf16.mxu0 %v8011_v11 }
 0x6ee   : > { %7493 = vmatpush3.bf16.msra.mxu0 %v7974_v8 }
 0x6ef   : > { %7498 = vmatprep.subr.bf16.mxu0 %v8011_v11 }
 0x6f5   : > { %7495 = vmatmul.mubr.msk.bf16.vlgmr.msra.gmra.mrb[108].mxu0 %vm4726_vm15, %v5365_v0 }
 0x6f6   : > { %7499 = vmatpush3.bf16.msra.mxu0 %v7975_v7  ;;  %7502 = vmatprep.mubr.msk.bf16.mxu0 %vm8012_vm13, %v8011_v11 }
 0x6f7   : > { %7500 = vmatprep.subr.bf16.mxu0 %v8011_v11 }
 0x6fa   : > { %7501 = vmatpush3.bf16.msra.mxu0 %v7976_v3 }
 0x6fb   : > { %7506 = vmatprep.subr.bf16.mxu0 %v8011_v11 }
 0x701   : > { %7503 = vmatmul.mubr.msk.bf16.vlgmr.msra.gmra.mrb[108].mxu0 %vm4726_vm15, %v5436_v49 }
 0x702   : > { %7507 = vmatpush3.bf16.msra.mxu0 %v7977_v10  ;;  %7510 = vmatprep.mubr.msk.bf16.mxu0 %vm8012_vm13, %v8011_v11 }
 0x703   : > { %7508 = vmatprep.subr.bf16.mxu0 %v8011_v11 }
 0x706   : > { %7509 = vmatpush3.bf16.msra.mxu0 %v7978_v57 }
 0x707   : > { %7514 = vmatprep.subr.bf16.mxu0 %v8011_v11 }
 0x70d   : > { %7511 = vmatmul.mubr.msk.bf16.vlgmr.msra.gmra.mrb[108].mxu0 %vm4726_vm15, %v5495_v38  ;;  %v5702_v38 = vshll.u32 %v8972_v23, 16  ;;  %v7991_v23 = vld [vmem:[%s9200_s6 + $0xf0] sm:$0xff]  }
 0x70e   : > { %7515 = vmatpush3.bf16.msra.mxu0 %v7979_v59  ;;  %7518 = vmatprep.mubr.msk.bf16.mxu0 %vm8012_vm13, %v8011_v11 }
 0x70f   : > { %7516 = vmatprep.subr.bf16.mxu0 %v8011_v11  ;;  %v5704_v21 = vrot.slane %v5702_v38, 2 }
 0x711   : > { %v5705_v14 = vor.u32 %v5704_v21, %v5701_v18  ;;  %v7994_v21 = vld [vmem:[%s9201_s7 + $0x8] sm:$0xff]  }
 0x712   : > { %7517 = vmatpush3.bf16.msra.mxu0 %v7980_v60 }
 0x713   : > { %7522 = vmatprep.subr.bf16.mxu0 %v8011_v11 }
 0x719   : > { %7519 = vmatmul.mubr.msk.bf16.vlgmr.msra.gmra.mrb[108].mxu0 %vm4726_vm15, %v5569_v35 }
 0x71a   : > { %7523 = vmatpush3.bf16.msra.mxu0 %v7981_v32  ;;  %7526 = vmatprep.mubr.msk.bf16.mxu0 %vm8012_vm13, %v8011_v11  ;;  %v8013_v32 = vmov 65535  }
 0x71b   : > { %7524 = vmatprep.subr.bf16.mxu0 %v8011_v11  ;;  %v6115_v35 = vsel %vm1977_vm1, 4294967295, %v8013_v32  ;;  %vm6306_vm1 = vcmask 519168  }
 0x71c   : > { %v6116_v58 = vsel %vm6114_vm14, %v6115_v35, 0 }
 0x71e   : > { %7525 = vmatpush3.bf16.msra.mxu0 %v7982_v28 }
 0x71f   : > { %7530 = vmatprep.subr.bf16.mxu0 %v8011_v11 }
 0x725   : > { %7527 = vmatmul.mubr.msk.bf16.vlgmr.msra.gmra.mrb[108].mxu0 %vm4726_vm15, %v5634_v48 }
 0x726   : > { %7531 = vmatpush3.bf16.msra.mxu0 %v7983_v47  ;;  %7534 = vmatprep.mubr.msk.bf16.mxu0 %vm8012_vm13, %v8011_v11 }
 0x727   : > { %7532 = vmatprep.subr.bf16.mxu0 %v8011_v11 }
 0x72a   : > { %7533 = vmatpush3.bf16.msra.mxu0 %v7984_v50 }
 0x72b   : > { %7538 = vmatprep.subr.bf16.mxu0 %v8011_v11 }
 0x731   : > { %7535 = vmatmul.mubr.msk.bf16.vlgmr.msra.gmra.mrb[108].mxu0 %vm4726_vm15, %v5705_v14  ;;  %v7996_v14 = vld [vmem:[%s9201_s7 + $0x18] sm:$0xff]  }
 0x732   : > { %7539 = vmatpush3.bf16.msra.mxu0 %v7985_v22  ;;  %7542 = vmatprep.mubr.msk.bf16.mxu0 %vm8012_vm13, %v8011_v11  ;;  %v7995_v22 = vld [vmem:[%s9201_s7 + $0x10] sm:$0xff]  }
 0x733   : > { %7540 = vmatprep.subr.bf16.mxu0 %v8011_v11 }
 0x736   : > { %7541 = vmatpush3.bf16.msra.mxu0 %v7986_v41  ;;  %v6187_v41 = vlaneseq }
 0x737   : > { %7546 = vmatprep.subr.bf16.mxu0 %v8011_v11 }
 0x73d   : > { %7543 = vmatmul.mubr.msk.bf16.vlgmr.msra.gmra.mrb[108].mxu0 %vm4726_vm15, %v5770_v51 }
 0x73e   : > { %7547 = vmatpush3.bf16.msra.mxu0 %v7987_v42  ;;  %7550 = vmatprep.mubr.msk.bf16.mxu0 %vm8012_vm13, %v8011_v11  ;;  %v9171_v42 = vshrl.u32 %v6187_v41, 7 }
 0x73f   : > { %7548 = vmatprep.subr.bf16.mxu0 %v8011_v11 }
 0x740   : > { %v6194_v51 = vsub.s32 1, %v9171_v42  ;;  %v6189_v33 = vsub.s32 0, %v9171_v42  ;;  %v6209_v24 = vsub.s32 3, %v9171_v42  ;;  %v6203_v40 = vsub.s32 2, %v9171_v42 }
 0x742   : > { %7549 = vmatpush3.bf16.msra.mxu0 %v7988_v56  ;;  %v6185_v56 = vld [vmem:[%s9202_s8] sm:$0xff] }
 0x743   : > { %7554 = vmatprep.subr.bf16.mxu0 %v8011_v11  ;;  %v6195_v15 = vrot.slane %v6185_v56, %v6194_v51  ;;  %v6204_v19 = vrot.slane %v6185_v56, %v6203_v40 }
 0x749   : > { %7551 = vmatmul.mubr.msk.bf16.vlgmr.msra.gmra.mrb[108].mxu0 %vm4726_vm15, %v5841_v52 }
 0x74a   : > { %7555 = vmatpush3.bf16.msra.mxu0 %v7989_v62  ;;  %7558 = vmatprep.mubr.msk.bf16.mxu0 %vm8012_vm13, %v8011_v11  ;;  %v6224_v62 = vsub.s32 5, %v9171_v42 }
 0x74b   : > { %7556 = vmatprep.subr.bf16.mxu0 %v8011_v11 }
 0x74c   : > { %v6225_v46 = vrot.slane %v6185_v56, %v6224_v62 }
 0x74e   : > { %7557 = vmatpush3.bf16.msra.mxu0 %v7990_v63  ;;  %v6190_v63 = vrot.slane %v6185_v56, %v6189_v33 }
 0x74f   : > { %7562 = vmatprep.subr.bf16.mxu0 %v8011_v11 }
 0x755   : > { %7559 = vmatmul.mubr.msk.bf16.vlgmr.msra.gmra.mrb[108].mxu0 %vm4726_vm15, %v5906_v27 }
 0x756   : > { %7563 = vmatpush3.bf16.msra.mxu0 %v7991_v23  ;;  %7566 = vmatprep.mubr.msk.bf16.mxu0 %vm8012_vm13, %v8011_v11  ;;  %v6210_v23 = vrot.slane %v6185_v56, %v6209_v24 }
 0x757   : > { %7564 = vmatprep.subr.bf16.mxu0 %v8011_v11 }
 0x75a   : > { %7565 = vmatpush3.bf16.msra.mxu0 %v7992_v6  ;;  %v6218_v6 = vsub.s32 4, %v9171_v42 }
 0x761   : > { %7567 = vmatmul.mubr.msk.bf16.vlgmr.msra.gmra.mrb[108].mxu0 %vm4726_vm15, %v5977_v34 }
 0x834   : > { %v6027_v55 = vpop.f32.mrb[108].mxu0 }
 0x835   : > { %v7568_v45 = vpop.f32.mrb[109].mxu0  ;;  %v6036_v12 = vsel %vm3640_vm4, %v6027_v55, 0.0 }
 0x836   : > { %v6030_v37 = vpop.f32.mrb[110].mxu0  ;;  %v6239_v45 = vsub.s32 7, %v9171_v42 }
 0x837   : > { %v6038_v11 = vsel %vm6037_vm5, %v6030_v37, 0.0  ;;  %v7569_v31 = vpop.f32.mrb[111].mxu0 }
 0x838   : > { %v6039_v20 = vadd.f32 %v6038_v11, %v6036_v12  ;;  %v6219_v12 = vrot.slane %v6185_v56, %v6218_v6  ;;  %v6233_v31 = vsub.s32 6, %v9171_v42 }
 0x83a   : > { %v6040_v54 = vrot.slane %v6039_v20, 4 }
 0x83c   : > { %v6041_v1 = vadd.f32 %v6040_v54, %v6039_v20  ;;  %v6186_v54 = vld [vmem:[%s9202_s8 + $0x8] sm:$0xff] }
 0x83d   : > { %v6264_v35 = vrot.slane %v6186_v54, %v6203_v40  ;;  %v6294_v42 = vrot.slane %v6186_v54, %v6233_v31 }
 0x83e   : > { %v6042_v9 = vrot.slane %v6041_v1, 2 }
 0x840   : > { %v6043_v17 = vadd.f32 %v6042_v9, %v6041_v1  ;;  %v6240_v9 = vrot.slane %v6185_v56, %v6239_v45 }
 0x842   : > { %v6044_v36 = vrot.slane %v6043_v17, 1 }
 0x844   : > { %v6045_v4 = vadd.f32 %v6044_v36, %v6043_v17 }
 0x846   : > { %v6047_v25 = vmul.f32 0.11111111, %v6045_v4 }
 0x848   : > { %v6048_v61 = vsub.f32 %v6027_v55, %v6047_v25  ;;  %v6049_v30 = vsub.f32 %v6030_v37, %v6047_v25 }
 0x84a   : > { %v6050_v8 = vmul.f32 %v6048_v61, %v6048_v61  ;;  %v6051_v7 = vmul.f32 %v6049_v30, %v6049_v30 }
 0x84c   : > { %v6052_v0 = vsel %vm3640_vm4, %v6050_v8, 0.0  ;;  %v6053_v3 = vsel %vm6037_vm5, %v6051_v7, 0.0  ;;  %v6255_v7 = vrot.slane %v6186_v54, %v6194_v51 }
 0x84d   : > { %v6054_v43 = vadd.f32 %v6053_v3, %v6052_v0 }
 0x84f   : > { %v6055_v39 = vrot.slane %v6054_v43, 4 }
 0x851   : > { %v6056_v5 = vadd.f32 %v6055_v39, %v6054_v43 }
 0x853   : > { %v6057_v2 = vrot.slane %v6056_v5, 2 }
 0x855   : > { %v6058_v10 = vadd.f32 %v6057_v2, %v6056_v5  ;;  %v6249_v2 = vrot.slane %v6186_v54, %v6189_v33 }
 0x857   : > { %v6059_v49 = vrot.slane %v6058_v10, 1 }
 0x859   : > { %v6060_v57 = vadd.f32 %v6059_v49, %v6058_v10 }
 0x85b   : > { %v6061_v59 = vmul.f32 0.11111111, %v6060_v57 }
 0x85d   : > { %v6062_v60 = vadd.f32 1e-05, %v6061_v59 }
 0x85f   : > { %8001 = vrsqrt.f32 %v6062_v60 }
 0x869   : > { %v8002_v13 = vpop.eup %8001 }
 0x86a   : > { %v6064_v16 = vmul.f32 %v8002_v13, %v6048_v61  ;;  %v6065_v26 = vmul.f32 %v8002_v13, %v6049_v30  ;;  %v6234_v30 = vrot.slane %v6185_v56, %v6233_v31 }
 0x86c   : > { %vm6067_vm4 = vcmp.gt.f32.partialorder %v6065_v26, 0.0  ;;  %v6069_v28 = vmul.f32 0.2, %v6065_v26  ;;  %vm6066_vm6 = vcmp.gt.f32.partialorder %v6064_v16, 0.0  ;;  %v6068_v47 = vmul.f32 0.2, %v6064_v16 }
 0x86e   : > { %v6070_v48 = vsel %vm6066_vm6, %v6064_v16, %v6068_v47  ;;  %v6071_v50 = vsel %vm6067_vm4, %v6065_v26, %v6069_v28  ;;  %v6270_v16 = vrot.slane %v6186_v54, %v6209_v24  ;;  %v6285_v28 = vrot.slane %v6186_v54, %v6224_v62 }
 0x86f   : > { %v6080_v38 = vpack.c.bf16 %v6071_v50, %v6070_v48  ;;  %v6279_v50 = vrot.slane %v6186_v54, %v6218_v6 }
 0x871   : > { %v6118_v18 = vand.u32 %v6116_v58, %v6080_v38 }
 0x873   : > { %7570 = vmatprep.subr.bf16.mxu1 %v6118_v18 }
 0x874   : > { %7571 = vmatpush3.bf16.msra.mxu1 %v6118_v18 }
 0x877   : > { %7573 = vmatmul.mubr.msk.bf16.vlgmr.msra.gmra.mrb[100].mxu1 %vm6101_vm3, %v7994_v21  ;;  %v6300_v21 = vrot.slane %v6186_v54, %v6239_v45 }
 0x878   : > { %7576 = vmatprep.mubr.msk.bf16.mxu1 %vm6101_vm3, %v7995_v22 }
 0x87f   : > { %7577 = vmatmul.mubr.msk.bf16.gmra.mrb[104].mxu1 %vm6101_vm3, %v7996_v14 }
 0x94a   : > { %v7574_v52 = vpop.f32.mrb[100].mxu1 }
 0x94b   : > { %v6154_v27 = vpop.f32.mrb[101].mxu1  ;;  %v6226_v1 = vmul.f32 %v7574_v52, %v6225_v46  ;;  %v6220_v61 = vmul.f32 %v7574_v52, %v6219_v12 }
 0x94c   : > { %v6196_v29 = vmul.f32 %v6195_v15, %v6154_v27  ;;  %v7575_v53 = vpop.f32.mrb[102].mxu1  ;;  %v6191_v44 = vmul.f32 %v6190_v63, %v6154_v27  ;;  %v6311_v27 = vstv %s6310_s26 }
 0x94d   : > { %v6157_v34 = vpop.f32.mrb[103].mxu1  ;;  %v6228_v43 = vrot.slane %v6226_v1, 4  ;;  %v6241_v39 = vmul.f32 %v7575_v53, %v6240_v9  ;;  %v6235_v10 = vmul.f32 %v7575_v53, %v6234_v30 }
 0x94e   : > { %v6198_v55 = vrot.slane %v6196_v29, 4  ;;  %v6211_v37 = vmul.f32 %v6210_v23, %v6157_v34  ;;  %v6205_v20 = vmul.f32 %v6204_v19, %v6157_v34 }
 0x94f   : > { %v6243_v59 = vrot.slane %v6241_v39, 4 }
 0x950   : > { %v6200_v11 = vadd.f32 %v6198_v55, %v6191_v44  ;;  %v6213_v36 = vrot.slane %v6211_v37, 4 }
 0x952   : > { %v6206_v17 = vadd.f32 %v6205_v20, %v6200_v11  ;;  %v7578_v4 = vpop.f32.mrb[104].mxu1 }
 0x953   : > { %v6170_v25 = vpop.f32.mrb[105].mxu1  ;;  %v6286_v18 = vmul.f32 %v7578_v4, %v6285_v28  ;;  %v6280_v41 = vmul.f32 %v7578_v4, %v6279_v50 }
 0x954   : > { %v6215_v8 = vadd.f32 %v6213_v36, %v6206_v17  ;;  %v7579_v0 = vpop.f32.mrb[106].mxu1  ;;  %v6256_v57 = vmul.f32 %v6255_v7, %v6170_v25  ;;  %v6250_v13 = vmul.f32 %v6249_v2, %v6170_v25 }
 0x955   : > { %v6173_v3 = vpop.f32.mrb[107].mxu1  ;;  %v6288_v56 = vrot.slane %v6286_v18, 4  ;;  %v6301_v33 = vmul.f32 %v7579_v0, %v6300_v21  ;;  %v6295_v15 = vmul.f32 %v7579_v0, %v6294_v42 }
 0x956   : > { %v6221_v5 = vadd.f32 %v6220_v61, %v6215_v8  ;;  %v6258_v32 = vrot.slane %v6256_v57, 4  ;;  %v6271_v48 = vmul.f32 %v6270_v16, %v6173_v3  ;;  %v6265_v38 = vmul.f32 %v6264_v35, %v6173_v3 }
 0x957   : > { %v6303_v40 = vrot.slane %v6301_v33, 4 }
 0x958   : > { %v6230_v49 = vadd.f32 %v6228_v43, %v6221_v5  ;;  %v6273_v14 = vrot.slane %v6271_v48, 4 }
 0x95a   : > { %v6236_v60 = vadd.f32 %v6235_v10, %v6230_v49 }
 0x95c   : > { %v6245_v26 = vadd.f32 %v6243_v59, %v6236_v60 }
 0x95e   : > { %v6251_v47 = vadd.f32 %v6250_v13, %v6245_v26 }
 0x960   : > { %v6260_v58 = vadd.f32 %v6258_v32, %v6251_v47 }
 0x962   : > { %v6266_v22 = vadd.f32 %v6265_v38, %v6260_v58 }
 0x964   : > { %v6275_v51 = vadd.f32 %v6273_v14, %v6266_v22 }
 0x966   : > { %v6281_v24 = vadd.f32 %v6280_v41, %v6275_v51 }
 0x968   : > { %v6290_v52 = vadd.f32 %v6288_v56, %v6281_v24 }
 0x96a   : > { %v6296_v62 = vadd.f32 %v6295_v15, %v6290_v52 }
 0x96c   : > { %v6305_v63 = vadd.f32 %v6303_v40, %v6296_v62 }
 0x96e   : > { %v6307_v23 = vsel %vm6306_vm1, %v6305_v63, 0.0 }
 0x96f   : > { %6308 = vadd.xlane.f32.xlu0 %v6307_v23 }
 0x9fc   : > { %v6309_v6 = vpop.xlane.xlu0 %6308 }
 0x9fd   : > { %v6312_v29 = vadd.f32 %v6311_v27, %v6309_v6 }
 0x9ff   : > { %6314 = vst.msk [vmem:[%s358_s30] sm:$0xf] %vm6313_vm7, %v6312_v29 }
 0xa00 PF: > { %s21_s15 = sadd.s32 1, %s8009_s15  }
 0xa01   : > { %p18_p4 = scmp.ge.s32.totalorder %s21_s15, 4  }
 0xa03   :  { %20 = sbr.rel (!%p18_p4) target bundleno = 2 (0x2), region = 90 }

</bundles_post_ra>
